<compile_context>
chip_gen: v7x
topology: tpu7x:2x2x1
jax: 0.10.0
libtpu: 0.0.40
codegen_flags: <defaults>
</compile_context>

<pallas_src>
import math

import jax
import jax.numpy as jnp
from jax.experimental import pallas as pl
from jax.experimental.pallas import tpu as pltpu

EPS = 1e-5
_VMEM_BUDGET = 24 * 1024 * 1024        # per-core working-set target (v7x-safe)


# ----------------------------- Pallas kernel -------------------------------

def _conv3x3_ct(a, w, b, mask, W, Mt, dil, per_tap):
    """SAME 3x3 conv (dilation `dil`) on channels-major activations.

    a:    (cin, Mt), already in the MXU dtype; positions (b, h, w) flattened
          on the lane axis.
    w:    (cout, 9*cin) im2col-packed weights (tap-major, tap = ky*3+kx), MXU
          dtype.
    b:    (cout, 1) f32 bias (BN already folded).
    mask: (9, Mt) MXU-dtype in-bounds mask per tap (implements zero padding
          and kills cross-image / cross-tile contamination of the lane rolls).
    per_tap: accumulate 9 K=cin dots instead of one K=9*cin dot.
    Returns (cout, Mt) f32.
    """
    cin = a.shape[0]

    def tap_piece(tap):
        ky, kx = tap // 3, tap % 3
        shift = (ky - 1) * dil * W + (kx - 1) * dil       # flat source offset
        if shift == 0:                                    # center tap
            return a
        p = pltpu.roll(a, (-shift) % Mt, 1)               # XLU lane rotate
        return p * mask[tap:tap + 1, :]                   # zero out-of-bounds

    if per_tap:
        acc = jnp.zeros((w.shape[0], Mt), jnp.float32)
        for tap in range(9):
            acc = acc + jnp.dot(w[:, tap * cin:(tap + 1) * cin],
                                tap_piece(tap),
                                preferred_element_type=jnp.float32)
        return acc + b
    # im2col patches built directly in the MXU dtype (per-piece mask + cast).
    patches = jnp.concatenate([tap_piece(t) for t in range(9)], axis=0)
    return jnp.dot(w, patches, preferred_element_type=jnp.float32) + b


def _make_kernel(bt, H, W, local_context, mxu_dtype, per_tap_big_cin):
    HW = H * W
    Mt = bt * HW

    def conv(a_f32, w_ref, b_ref, mask, dil, per_tap):
        # Single cast per conv, BEFORE the rolls / mask-muls (review item 2).
        return _conv3x3_ct(a_f32.astype(mxu_dtype), w_ref[...], b_ref[...],
                           mask, W, Mt, dil, per_tap)

    def tail(x1, m1, w2_ref, b2_ref, w3_ref, b3_ref, w4_ref, b4_ref, o_ref):
        x2 = jnp.maximum(conv(x1, w2_ref, b2_ref, m1, 1, per_tap_big_cin), 0.0)
        x3 = jnp.maximum(conv(x2, w3_ref, b3_ref, m1, 1, False), 0.0)
        # conv4 (1x1, cout=1) on the VPU + exact sigmoid (EUP exp + vrcp).
        logits = jnp.sum(x3 * w4_ref[...], axis=0, keepdims=True) + b4_ref[...]
        o_ref[...] = pl.reciprocal(1.0 + jnp.exp(-logits)).reshape(1, 1, Mt)

    if local_context:
        def kernel(x_ref, m1_ref, mc_ref, w1_ref, b1_ref, wc_ref, bc_ref,
                   w2_ref, b2_ref, w3_ref, b3_ref, w4_ref, b4_ref, o_ref):
            m1 = m1_ref[...]
            x1 = jnp.maximum(conv(x_ref[...], w1_ref, b1_ref, m1, 1, False),
                             0.0)
            # TODO(synk): the PyTorch reference uses Conv2d(k=3, padding=1,
            # dilation=2) whose (H-2, W-2) output cannot be residual-added to
            # x; we use SAME dilated padding (pad=2) so `x + context` is
            # well-defined.
            x1 = x1 + conv(x1, wc_ref, bc_ref, mc_ref[...], 2, per_tap_big_cin)
            tail(x1, m1, w2_ref, b2_ref, w3_ref, b3_ref, w4_ref, b4_ref, o_ref)
    else:
        def kernel(x_ref, m1_ref, sel_ref, selT_ref, w1_ref, b1_ref,
                   wfc_ref, bfc_ref, w2_ref, b2_ref, w3_ref, b3_ref,
                   w4_ref, b4_ref, o_ref):
            m1 = m1_ref[...]
            x1 = jnp.maximum(conv(x_ref[...], w1_ref, b1_ref, m1, 1, False),
                             0.0)
            # Per-image global average pool + FC + channel-wise scale via
            # host-precomputed indicator matrices (lane-dense; no in-kernel
            # iota / integer division).
            pooled = jnp.dot(x1.astype(mxu_dtype), selT_ref[...],
                             preferred_element_type=jnp.float32) * (1.0 / HW)
            ctx = jnp.dot(wfc_ref[...], pooled.astype(mxu_dtype),
                          preferred_element_type=jnp.float32) + bfc_ref[...]
            x1 = x1 * jnp.dot(ctx, sel_ref[...],
                              preferred_element_type=jnp.float32)
            tail(x1, m1, w2_ref, b2_ref, w3_ref, b3_ref, w4_ref, b4_ref, o_ref)

    return kernel


# --------------------------------- wrapper ----------------------------------

def _tap_masks(H, W, bt, dil):
    """(9, bt*H*W) f32: 1 where the tap's source pixel lies inside the image."""
    q = jnp.arange(H * W)
    h, w = q // W, q % W
    rows = []
    for ky in range(3):
        for kx in range(3):
            dy, dx = (ky - 1) * dil, (kx - 1) * dil
            rows.append((h + dy >= 0) & (h + dy < H) &
                        (w + dx >= 0) & (w + dx < W))
    m = jnp.stack(rows, axis=0).astype(jnp.float32)        # (9, H*W)
    return jnp.tile(m, (1, bt))                            # (9, bt*H*W)


def _vmem_estimate(bt, HW, cin_p, mxu_bytes, local_context):
    """Rough per-grid-step VMEM working set (bytes): used to cap bt and to
    derive an explicit vmem_limit_bytes (v5e default scoped limit is 16 MiB,
    v7x physical VMEM is 64 MiB)."""
    Mt = bt * HW
    f32 = 4
    per_lane = (2 * cin_p * mxu_bytes          # input block, double-buffered
                + 2 * f32                      # output block, double-buffered
                + (64 + 64 + 32 + 16) * f32    # x1 / x1+ctx / x2 / x3 (f32)
                + 9 * 64 * mxu_bytes           # largest im2col patch buffer
                + 2 * 2 * 9 * mxu_bytes)       # tap masks (<=2 sets, 2 bufs)
    est = Mt * per_lane
    if not local_context:
        est += Mt * 2 * bt * f32               # sel / selT indicator constants
    return est + (2 << 20)                     # weights / biases + slack


def threshold_predictor(x_nchw, params, local_context=True, *,
                        batch_tile=None, mxu_dtype=jnp.bfloat16,
                        per_tap_big_cin=False):
    """Forward pass. x_nchw: (B, Cin, H, W) f32. Returns (B, 1, H, W) f32.

    mxu_dtype=bf16 (default production path: ~2-4x MXU throughput and half
    the patch traffic, f32 accumulation) or jnp.float32 for exact checking.
    On v6e, pass batch_tile=16..32 for extra per-step amortization.
    """
    B, cin, H, W = x_nchw.shape
    HW = H * W
    w1, b1, wc, bc, w2, b2, w3, b3, w4, b4 = params
    cin_p = w1.shape[1] // 9       # conv1 cin, zero-padded to a multiple of 16
    mxu_bytes = jnp.dtype(mxu_dtype).itemsize

    # --- batch tile: lane-aligned, >=2 grid steps, VMEM-budgeted -------------
    step = 128 // math.gcd(128, HW)       # smallest bt with (bt*HW) % 128 == 0
    if batch_tile is not None:
        bt = max(1, int(batch_tile))
    else:
        bt = max(1, min(8, -(-B // 2)))   # >=2 "parallel" steps when B>=2 (v7x)
    bt = -(-bt // step) * step            # 128-aligned lanes -> unmasked vst
    if batch_tile is None:
        while bt > step and _vmem_estimate(bt, HW, cin_p, mxu_bytes,
                                           local_context) > _VMEM_BUDGET:
            bt -= step
    n_tiles = pl.cdiv(B, bt)
    B_pad = n_tiles * bt
    Mt = bt * HW

    vmem_limit = int(min(max(2 * _vmem_estimate(bt, HW, cin_p, mxu_bytes,
                                                local_context),
                             32 << 20),
                         56 << 20))

    # channels-major input in the MXU dtype: (cin_p, B_pad*H*W).
    xt = jnp.transpose(x_nchw.astype(jnp.float32),
                       (1, 0, 2, 3)).reshape(cin, B * HW)
    xt = jnp.pad(xt, ((0, cin_p - cin), (0, (B_pad - B) * HW)))
    xt = xt.astype(mxu_dtype)

    # bf16 only touches MXU operands; biases / accumulation stay f32.
    w1, wc, w2, w3 = (w.astype(mxu_dtype) for w in (w1, wc, w2, w3))
    m1 = _tap_masks(H, W, bt, 1).astype(mxu_dtype)

    if local_context:
        mc = _tap_masks(H, W, bt, 2).astype(mxu_dtype)
        consts = (m1, mc, w1, b1, wc, bc, w2, b2, w3, b3, w4, b4)
    else:
        img = jnp.arange(Mt, dtype=jnp.int32) // HW
        sel = (img[None, :] == jnp.arange(bt, dtype=jnp.int32)[:, None]
               ).astype(jnp.float32)                     # (bt, Mt)
        selT = sel.T.astype(mxu_dtype)                   # (Mt, bt)
        consts = (m1, sel, selT, w1, b1, wc, bc, w2, b2, w3, b3, w4, b4)

    def full(a):                    # whole (small) constant every grid step
        return pl.BlockSpec(a.shape, lambda g: (0, 0))

    out = pl.pallas_call(
        _make_kernel(bt, H, W, local_context, mxu_dtype, per_tap_big_cin),
        out_shape=jax.ShapeDtypeStruct((n_tiles, 1, Mt), jnp.float32),
        grid=(n_tiles,),
        in_specs=[pl.BlockSpec((cin_p, Mt), lambda g: (0, g))]
                 + [full(a) for a in consts],
        out_specs=pl.BlockSpec((1, 1, Mt), lambda g: (g, 0, 0)),
        compiler_params=pltpu.CompilerParams(
            dimension_semantics=("parallel",),
            vmem_limit_bytes=vmem_limit),
    )(xt, *consts)

    out = out.reshape(B_pad, HW)[:B]                     # drop batch padding
    return out.reshape(B, 1, H, W)                       # NCHW (B, 1, H, W)


# -------------------- parameters (deterministic, synthetic) -----------------

def init_raw_params(key, cin, local_context=True):
    keys = iter(jax.random.split(key, 32))

    def nrm(shape, scale=0.1):
        return scale * jax.random.normal(next(keys), shape, jnp.float32)

    def conv_w(shape):                                   # HWIO
        fan_in = shape[0] * shape[1] * shape[2]
        return jax.random.normal(next(keys), shape, jnp.float32) / jnp.sqrt(
            jnp.float32(fan_in))

    def bn_p(c):                                         # gamma, beta, mean, var
        return (1.0 + nrm((c,)), nrm((c,)), nrm((c,)),
                1.0 + 0.1 * jax.random.uniform(next(keys), (c,), jnp.float32))

    raw = dict(
        w1=conv_w((3, 3, cin, 64)), b1=nrm((64,)), bn1=bn_p(64),
        w2=conv_w((3, 3, 64, 32)), b2=nrm((32,)), bn2=bn_p(32),
        w3=conv_w((3, 3, 32, 16)), b3=nrm((16,)), bn3=bn_p(16),
        w4=conv_w((1, 1, 16, 1)).reshape(16, 1), b4=nrm((1,)),
    )
    if local_context:
        raw['wc'] = conv_w((3, 3, 64, 64))
        raw['bc'] = nrm((64,))
    else:
        # Linear(64, 64) stored directly as the (in, out) matrix used as x @ W.
        raw['wfc'] = jax.random.normal(next(keys), (64, 64), jnp.float32) / 8.0
        raw['bfc'] = nrm((64,))
    return raw


def fold_params(raw, local_context):
    """Fold BN (inference mode, f32) into the conv; pack weights channels-major
    with the 3x3 taps laid out along the contraction (im2col) dimension."""
    def pack_conv(w, b, bn=None, pad_cin_to=None):
        if bn is not None:
            g, beta, mean, var = bn
            s = g / jnp.sqrt(var + EPS)
            w = w * s                                    # scale along cout
            b = (b - mean) * s + beta
        cin, cout = w.shape[2], w.shape[3]
        if pad_cin_to is not None and pad_cin_to > cin:
            w = jnp.pad(w, ((0, 0), (0, 0), (0, pad_cin_to - cin), (0, 0)))
        wt = jnp.transpose(w, (3, 0, 1, 2)).reshape(cout, -1)  # (cout, 9*cin_p)
        return wt, b.reshape(cout, 1)

    cin = raw['w1'].shape[2]
    # Pad conv1's cin to a multiple of 16: keeps every K-dim concat offset
    # aligned to the bf16 sublane tile (and trivially to the f32 tile).
    cin_p = -(-cin // 16) * 16
    w1, b1 = pack_conv(raw['w1'], raw['b1'], raw['bn1'], pad_cin_to=cin_p)
    w2, b2 = pack_conv(raw['w2'], raw['b2'], raw['bn2'])
    w3, b3 = pack_conv(raw['w3'], raw['b3'], raw['bn3'])
    w4 = raw['w4'].reshape(16, 1)
    b4 = raw['b4'].reshape(1, 1)
    if local_context:
        wc, bc = pack_conv(raw['wc'], raw['bc'])
    else:
        wc = raw['wfc'].T                                # (out, in): wc @ pooled
        bc = raw['bfc'].reshape(64, 1)
    return (w1, b1, wc, bc, w2, b2, w3, b3, w4, b4)


# ----------------------- pure-JAX reference (for checking) ------------------

def ref_forward(x_nchw, raw, local_context):
    x = jnp.transpose(x_nchw, (0, 2, 3, 1)).astype(jnp.float32)       # NHWC

    def conv(x, w, b, pad, dil):
        y = jax.lax.conv_general_dilated(
            x, w, (1, 1), ((pad, pad), (pad, pad)),
            rhs_dilation=(dil, dil),
            dimension_numbers=('NHWC', 'HWIO', 'NHWC'))
        return y + b

    def bn(x, p):
        g, bt, m, v = p
        return (x - m) / jnp.sqrt(v + EPS) * g + bt

    x1 = jax.nn.relu(bn(conv(x, raw['w1'], raw['b1'], 1, 1), raw['bn1']))
    if local_context:
        x1 = x1 + conv(x1, raw['wc'], raw['bc'], 2, 2)
    else:
        ctx = jnp.mean(x1, axis=(1, 2)) @ raw['wfc'] + raw['bfc']      # (B, 64)
        x1 = x1 * ctx[:, None, None, :]
    x2 = jax.nn.relu(bn(conv(x1, raw['w2'], raw['b2'], 1, 1), raw['bn2']))
    x3 = jax.nn.relu(bn(conv(x2, raw['w3'], raw['b3'], 1, 1), raw['bn3']))
    logits = jnp.einsum('bhwc,co->bhwo', x3, raw['w4']) + raw['b4']
    out = jax.nn.sigmoid(logits)
    return jnp.transpose(out, (0, 3, 1, 2))


# --------------------------------- main --------------------------------------

if __name__ == "__main__":
    key = jax.random.PRNGKey(0)
    kx_, kp = jax.random.split(key)
    B, Cin, H, W = 2, 4, 16, 16
    x = jax.random.normal(kx_, (B, Cin, H, W), jnp.float32)

    for local_context in (True, False):
        raw = init_raw_params(kp, Cin, local_context)
        params = fold_params(raw, local_context)
        ref = ref_forward(x, raw, local_context)

        # Exact-math path (f32 MXU operands): strict tolerance.
        out = jax.block_until_ready(
            threshold_predictor(x, params, local_context,
                                mxu_dtype=jnp.float32))
        assert out.shape == (B, 1, H, W), out.shape
        assert jnp.allclose(out, ref, atol=1e-4, rtol=1e-3), (
            "f32 mismatch", local_context,
            float(jnp.max(jnp.abs(out - ref))))

        # Production default (bf16 MXU operands, f32 accumulation): loose tol.
        out_bf = jax.block_until_ready(
            threshold_predictor(x, params, local_context))
        assert float(jnp.max(jnp.abs(out_bf - ref))) < 5e-2, (
            "bf16 mismatch", local_context,
            float(jnp.max(jnp.abs(out_bf - ref))))

    # Single-tile path (whole batch in one grid step).
    raw = init_raw_params(kp, Cin, True)
    params = fold_params(raw, True)
    ref = ref_forward(x, raw, True)
    out = jax.block_until_ready(
        threshold_predictor(x, params, True, batch_tile=2,
                            mxu_dtype=jnp.float32))
    assert jnp.allclose(out, ref, atol=1e-4, rtol=1e-3), (
        "single-tile mismatch", float(jnp.max(jnp.abs(out - ref))))

    # No-concat (per-tap accumulation) matmul variant for the cin=64 layers.
    out_pt = jax.block_until_ready(
        threshold_predictor(x, params, True, mxu_dtype=jnp.float32,
                            per_tap_big_cin=True))
    assert jnp.allclose(out_pt, ref, atol=1e-4, rtol=1e-3), (
        "per-tap mismatch", float(jnp.max(jnp.abs(out_pt - ref))))

    print("KERNEL_OK")
</pallas_src>

<mosaic_0001>
module attributes {stable_mosaic.version = 11 : i64} {
  func.func @kernel(%arg0: i32, %arg1: memref<16x256xf32, #tpu.memory_space<vmem>>, %arg2: memref<9x256xf32, #tpu.memory_space<vmem>>, %arg3: memref<9x256xf32, #tpu.memory_space<vmem>>, %arg4: memref<64x144xf32, #tpu.memory_space<vmem>>, %arg5: memref<64x1xf32, #tpu.memory_space<vmem>>, %arg6: memref<64x576xf32, #tpu.memory_space<vmem>>, %arg7: memref<64x1xf32, #tpu.memory_space<vmem>>, %arg8: memref<32x576xf32, #tpu.memory_space<vmem>>, %arg9: memref<32x1xf32, #tpu.memory_space<vmem>>, %arg10: memref<16x288xf32, #tpu.memory_space<vmem>>, %arg11: memref<16x1xf32, #tpu.memory_space<vmem>>, %arg12: memref<16x1xf32, #tpu.memory_space<vmem>>, %arg13: memref<1x1xf32, #tpu.memory_space<vmem>>, %arg14: memref<1x1x256xf32, #tpu.memory_space<vmem>>) attributes {dimension_semantics = [#tpu.dimension_semantics<parallel>], iteration_bounds = array<i64: 2>, scalar_prefetch = 0 : i64, scratch_operands = 0 : i64, tpu.core_type = #tpu.core_type<tc>, window_params = [{transform_indices = @transform_0, window_bounds = array<i64: 16, 256>}, {pipeline_mode = #tpu.pipeline_mode<synchronous>, transform_indices = @transform_1, window_bounds = array<i64: 9, 256>}, {pipeline_mode = #tpu.pipeline_mode<synchronous>, transform_indices = @transform_2, window_bounds = array<i64: 9, 256>}, {pipeline_mode = #tpu.pipeline_mode<synchronous>, transform_indices = @transform_3, window_bounds = array<i64: 64, 144>}, {pipeline_mode = #tpu.pipeline_mode<synchronous>, transform_indices = @transform_4, window_bounds = array<i64: 64, 1>}, {pipeline_mode = #tpu.pipeline_mode<synchronous>, transform_indices = @transform_5, window_bounds = array<i64: 64, 576>}, {pipeline_mode = #tpu.pipeline_mode<synchronous>, transform_indices = @transform_6, window_bounds = array<i64: 64, 1>}, {pipeline_mode = #tpu.pipeline_mode<synchronous>, transform_indices = @transform_7, window_bounds = array<i64: 32, 576>}, {pipeline_mode = #tpu.pipeline_mode<synchronous>, transform_indices = @transform_8, window_bounds = array<i64: 32, 1>}, {pipeline_mode = #tpu.pipeline_mode<synchronous>, transform_indices = @transform_9, window_bounds = array<i64: 16, 288>}, {pipeline_mode = #tpu.pipeline_mode<synchronous>, transform_indices = @transform_10, window_bounds = array<i64: 16, 1>}, {pipeline_mode = #tpu.pipeline_mode<synchronous>, transform_indices = @transform_11, window_bounds = array<i64: 16, 1>}, {pipeline_mode = #tpu.pipeline_mode<synchronous>, transform_indices = @transform_12, window_bounds = array<i64: 1, 1>}, {transform_indices = @transform_13, window_bounds = array<i64: 1, 1, 256>}]} {
    %c0 = arith.constant 0 : index
    %c0_0 = arith.constant 0 : index
    %0 = vector.load %arg2[%c0, %c0_0] : memref<9x256xf32, #tpu.memory_space<vmem>>, vector<9x256xf32>
    %c0_1 = arith.constant 0 : index
    %c0_2 = arith.constant 0 : index
    %1 = vector.load %arg1[%c0_1, %c0_2] : memref<16x256xf32, #tpu.memory_space<vmem>>, vector<16x256xf32>
    %c0_3 = arith.constant 0 : index
    %c0_4 = arith.constant 0 : index
    %2 = vector.load %arg4[%c0_3, %c0_4] : memref<64x144xf32, #tpu.memory_space<vmem>>, vector<64x144xf32>
    %c0_5 = arith.constant 0 : index
    %c0_6 = arith.constant 0 : index
    %3 = vector.load %arg5[%c0_5, %c0_6] : memref<64x1xf32, #tpu.memory_space<vmem>>, vector<64x1xf32>
    %c17_i32 = arith.constant 17 : i32
    %4 = tpu.dynamic_rotate %1 by %c17_i32 dim 1 : vector<16x256xf32>, i32 -> vector<16x256xf32>
    %5 = vector.extract_strided_slice %0 {offsets = [0, 0], sizes = [1, 256], strides = [1, 1]} : vector<9x256xf32> to vector<1x256xf32>
    %6 = vector.broadcast %5 : vector<1x256xf32> to vector<16x256xf32>
    %7 = arith.mulf %4, %6 : vector<16x256xf32>
    %c16_i32 = arith.constant 16 : i32
    %8 = tpu.dynamic_rotate %1 by %c16_i32 dim 1 : vector<16x256xf32>, i32 -> vector<16x256xf32>
    %9 = vector.extract_strided_slice %0 {offsets = [1, 0], sizes = [1, 256], strides = [1, 1]} : vector<9x256xf32> to vector<1x256xf32>
    %10 = vector.broadcast %9 : vector<1x256xf32> to vector<16x256xf32>
    %11 = arith.mulf %8, %10 : vector<16x256xf32>
    %c15_i32 = arith.constant 15 : i32
    %12 = tpu.dynamic_rotate %1 by %c15_i32 dim 1 : vector<16x256xf32>, i32 -> vector<16x256xf32>
    %13 = vector.extract_strided_slice %0 {offsets = [2, 0], sizes = [1, 256], strides = [1, 1]} : vector<9x256xf32> to vector<1x256xf32>
    %14 = vector.broadcast %13 : vector<1x256xf32> to vector<16x256xf32>
    %15 = arith.mulf %12, %14 : vector<16x256xf32>
    %c1_i32 = arith.constant 1 : i32
    %16 = tpu.dynamic_rotate %1 by %c1_i32 dim 1 : vector<16x256xf32>, i32 -> vector<16x256xf32>
    %17 = vector.extract_strided_slice %0 {offsets = [3, 0], sizes = [1, 256], strides = [1, 1]} : vector<9x256xf32> to vector<1x256xf32>
    %18 = vector.broadcast %17 : vector<1x256xf32> to vector<16x256xf32>
    %19 = arith.mulf %16, %18 : vector<16x256xf32>
    %c255_i32 = arith.constant 255 : i32
    %20 = tpu.dynamic_rotate %1 by %c255_i32 dim 1 : vector<16x256xf32>, i32 -> vector<16x256xf32>
    %21 = vector.extract_strided_slice %0 {offsets = [5, 0], sizes = [1, 256], strides = [1, 1]} : vector<9x256xf32> to vector<1x256xf32>
    %22 = vector.broadcast %21 : vector<1x256xf32> to vector<16x256xf32>
    %23 = arith.mulf %20, %22 : vector<16x256xf32>
    %c241_i32 = arith.constant 241 : i32
    %24 = tpu.dynamic_rotate %1 by %c241_i32 dim 1 : vector<16x256xf32>, i32 -> vector<16x256xf32>
    %25 = vector.extract_strided_slice %0 {offsets = [6, 0], sizes = [1, 256], strides = [1, 1]} : vector<9x256xf32> to vector<1x256xf32>
    %26 = vector.broadcast %25 : vector<1x256xf32> to vector<16x256xf32>
    %27 = arith.mulf %24, %26 : vector<16x256xf32>
    %c240_i32 = arith.constant 240 : i32
    %28 = tpu.dynamic_rotate %1 by %c240_i32 dim 1 : vector<16x256xf32>, i32 -> vector<16x256xf32>
    %29 = vector.extract_strided_slice %0 {offsets = [7, 0], sizes = [1, 256], strides = [1, 1]} : vector<9x256xf32> to vector<1x256xf32>
    %30 = vector.broadcast %29 : vector<1x256xf32> to vector<16x256xf32>
    %31 = arith.mulf %28, %30 : vector<16x256xf32>
    %c239_i32 = arith.constant 239 : i32
    %32 = tpu.dynamic_rotate %1 by %c239_i32 dim 1 : vector<16x256xf32>, i32 -> vector<16x256xf32>
    %33 = vector.extract_strided_slice %0 {offsets = [8, 0], sizes = [1, 256], strides = [1, 1]} : vector<9x256xf32> to vector<1x256xf32>
    %34 = vector.broadcast %33 : vector<1x256xf32> to vector<16x256xf32>
    %35 = arith.mulf %32, %34 : vector<16x256xf32>
    %36 = tpu.concatenate %7, %11, %15, %19, %1, %23, %27, %31, %35 in 0 : vector<16x256xf32>, vector<16x256xf32>, vector<16x256xf32>, vector<16x256xf32>, vector<16x256xf32>, vector<16x256xf32>, vector<16x256xf32>, vector<16x256xf32>, vector<16x256xf32> -> vector<144x256xf32>
    %cst = arith.constant dense<0.000000e+00> : vector<64x256xf32>
    %37 = tpu.matmul %2, %36, %cst {dimension_numbers = #tpu.dot_dimension_numbers<[1], [0], [0], [1], [0, 0, 1, 1], [], []>} : vector<64x144xf32>, vector<144x256xf32>, vector<64x256xf32> -> vector<64x256xf32>
    %38 = vector.broadcast %3 : vector<64x1xf32> to vector<64x256xf32>
    %39 = arith.addf %37, %38 : vector<64x256xf32>
    %cst_7 = arith.constant 0.000000e+00 : f32
    %40 = vector.broadcast %cst_7 : f32 to vector<64x256xf32>
    %41 = arith.maximumf %39, %40 : vector<64x256xf32>
    %c0_8 = arith.constant 0 : index
    %c0_9 = arith.constant 0 : index
    %42 = vector.load %arg3[%c0_8, %c0_9] : memref<9x256xf32, #tpu.memory_space<vmem>>, vector<9x256xf32>
    %c0_10 = arith.constant 0 : index
    %c0_11 = arith.constant 0 : index
    %43 = vector.load %arg6[%c0_10, %c0_11] : memref<64x576xf32, #tpu.memory_space<vmem>>, vector<64x576xf32>
    %c0_12 = arith.constant 0 : index
    %c0_13 = arith.constant 0 : index
    %44 = vector.load %arg7[%c0_12, %c0_13] : memref<64x1xf32, #tpu.memory_space<vmem>>, vector<64x1xf32>
    %c34_i32 = arith.constant 34 : i32
    %45 = tpu.dynamic_rotate %41 by %c34_i32 dim 1 : vector<64x256xf32>, i32 -> vector<64x256xf32>
    %46 = vector.extract_strided_slice %42 {offsets = [0, 0], sizes = [1, 256], strides = [1, 1]} : vector<9x256xf32> to vector<1x256xf32>
    %47 = vector.broadcast %46 : vector<1x256xf32> to vector<64x256xf32>
    %48 = arith.mulf %45, %47 : vector<64x256xf32>
    %c32_i32 = arith.constant 32 : i32
    %49 = tpu.dynamic_rotate %41 by %c32_i32 dim 1 : vector<64x256xf32>, i32 -> vector<64x256xf32>
    %50 = vector.extract_strided_slice %42 {offsets = [1, 0], sizes = [1, 256], strides = [1, 1]} : vector<9x256xf32> to vector<1x256xf32>
    %51 = vector.broadcast %50 : vector<1x256xf32> to vector<64x256xf32>
    %52 = arith.mulf %49, %51 : vector<64x256xf32>
    %c30_i32 = arith.constant 30 : i32
    %53 = tpu.dynamic_rotate %41 by %c30_i32 dim 1 : vector<64x256xf32>, i32 -> vector<64x256xf32>
    %54 = vector.extract_strided_slice %42 {offsets = [2, 0], sizes = [1, 256], strides = [1, 1]} : vector<9x256xf32> to vector<1x256xf32>
    %55 = vector.broadcast %54 : vector<1x256xf32> to vector<64x256xf32>
    %56 = arith.mulf %53, %55 : vector<64x256xf32>
    %c2_i32 = arith.constant 2 : i32
    %57 = tpu.dynamic_rotate %41 by %c2_i32 dim 1 : vector<64x256xf32>, i32 -> vector<64x256xf32>
    %58 = vector.extract_strided_slice %42 {offsets = [3, 0], sizes = [1, 256], strides = [1, 1]} : vector<9x256xf32> to vector<1x256xf32>
    %59 = vector.broadcast %58 : vector<1x256xf32> to vector<64x256xf32>
    %60 = arith.mulf %57, %59 : vector<64x256xf32>
    %c254_i32 = arith.constant 254 : i32
    %61 = tpu.dynamic_rotate %41 by %c254_i32 dim 1 : vector<64x256xf32>, i32 -> vector<64x256xf32>
    %62 = vector.extract_strided_slice %42 {offsets = [5, 0], sizes = [1, 256], strides = [1, 1]} : vector<9x256xf32> to vector<1x256xf32>
    %63 = vector.broadcast %62 : vector<1x256xf32> to vector<64x256xf32>
    %64 = arith.mulf %61, %63 : vector<64x256xf32>
    %c226_i32 = arith.constant 226 : i32
    %65 = tpu.dynamic_rotate %41 by %c226_i32 dim 1 : vector<64x256xf32>, i32 -> vector<64x256xf32>
    %66 = vector.extract_strided_slice %42 {offsets = [6, 0], sizes = [1, 256], strides = [1, 1]} : vector<9x256xf32> to vector<1x256xf32>
    %67 = vector.broadcast %66 : vector<1x256xf32> to vector<64x256xf32>
    %68 = arith.mulf %65, %67 : vector<64x256xf32>
    %c224_i32 = arith.constant 224 : i32
    %69 = tpu.dynamic_rotate %41 by %c224_i32 dim 1 : vector<64x256xf32>, i32 -> vector<64x256xf32>
    %70 = vector.extract_strided_slice %42 {offsets = [7, 0], sizes = [1, 256], strides = [1, 1]} : vector<9x256xf32> to vector<1x256xf32>
    %71 = vector.broadcast %70 : vector<1x256xf32> to vector<64x256xf32>
    %72 = arith.mulf %69, %71 : vector<64x256xf32>
    %c222_i32 = arith.constant 222 : i32
    %73 = tpu.dynamic_rotate %41 by %c222_i32 dim 1 : vector<64x256xf32>, i32 -> vector<64x256xf32>
    %74 = vector.extract_strided_slice %42 {offsets = [8, 0], sizes = [1, 256], strides = [1, 1]} : vector<9x256xf32> to vector<1x256xf32>
    %75 = vector.broadcast %74 : vector<1x256xf32> to vector<64x256xf32>
    %76 = arith.mulf %73, %75 : vector<64x256xf32>
    %77 = tpu.concatenate %48, %52, %56, %60, %41, %64, %68, %72, %76 in 0 : vector<64x256xf32>, vector<64x256xf32>, vector<64x256xf32>, vector<64x256xf32>, vector<64x256xf32>, vector<64x256xf32>, vector<64x256xf32>, vector<64x256xf32>, vector<64x256xf32> -> vector<576x256xf32>
    %cst_14 = arith.constant dense<0.000000e+00> : vector<64x256xf32>
    %78 = tpu.matmul %43, %77, %cst_14 {dimension_numbers = #tpu.dot_dimension_numbers<[1], [0], [0], [1], [0, 0, 1, 1], [], []>} : vector<64x576xf32>, vector<576x256xf32>, vector<64x256xf32> -> vector<64x256xf32>
    %79 = vector.broadcast %44 : vector<64x1xf32> to vector<64x256xf32>
    %80 = arith.addf %78, %79 : vector<64x256xf32>
    %81 = arith.addf %41, %80 : vector<64x256xf32>
    %c0_15 = arith.constant 0 : index
    %c0_16 = arith.constant 0 : index
    %82 = vector.load %arg8[%c0_15, %c0_16] : memref<32x576xf32, #tpu.memory_space<vmem>>, vector<32x576xf32>
    %c0_17 = arith.constant 0 : index
    %c0_18 = arith.constant 0 : index
    %83 = vector.load %arg9[%c0_17, %c0_18] : memref<32x1xf32, #tpu.memory_space<vmem>>, vector<32x1xf32>
    %c17_i32_19 = arith.constant 17 : i32
    %84 = tpu.dynamic_rotate %81 by %c17_i32_19 dim 1 : vector<64x256xf32>, i32 -> vector<64x256xf32>
    %85 = vector.extract_strided_slice %0 {offsets = [0, 0], sizes = [1, 256], strides = [1, 1]} : vector<9x256xf32> to vector<1x256xf32>
    %86 = vector.broadcast %85 : vector<1x256xf32> to vector<64x256xf32>
    %87 = arith.mulf %84, %86 : vector<64x256xf32>
    %c16_i32_20 = arith.constant 16 : i32
    %88 = tpu.dynamic_rotate %81 by %c16_i32_20 dim 1 : vector<64x256xf32>, i32 -> vector<64x256xf32>
    %89 = vector.extract_strided_slice %0 {offsets = [1, 0], sizes = [1, 256], strides = [1, 1]} : vector<9x256xf32> to vector<1x256xf32>
    %90 = vector.broadcast %89 : vector<1x256xf32> to vector<64x256xf32>
    %91 = arith.mulf %88, %90 : vector<64x256xf32>
    %c15_i32_21 = arith.constant 15 : i32
    %92 = tpu.dynamic_rotate %81 by %c15_i32_21 dim 1 : vector<64x256xf32>, i32 -> vector<64x256xf32>
    %93 = vector.extract_strided_slice %0 {offsets = [2, 0], sizes = [1, 256], strides = [1, 1]} : vector<9x256xf32> to vector<1x256xf32>
    %94 = vector.broadcast %93 : vector<1x256xf32> to vector<64x256xf32>
    %95 = arith.mulf %92, %94 : vector<64x256xf32>
    %c1_i32_22 = arith.constant 1 : i32
    %96 = tpu.dynamic_rotate %81 by %c1_i32_22 dim 1 : vector<64x256xf32>, i32 -> vector<64x256xf32>
    %97 = vector.extract_strided_slice %0 {offsets = [3, 0], sizes = [1, 256], strides = [1, 1]} : vector<9x256xf32> to vector<1x256xf32>
    %98 = vector.broadcast %97 : vector<1x256xf32> to vector<64x256xf32>
    %99 = arith.mulf %96, %98 : vector<64x256xf32>
    %c255_i32_23 = arith.constant 255 : i32
    %100 = tpu.dynamic_rotate %81 by %c255_i32_23 dim 1 : vector<64x256xf32>, i32 -> vector<64x256xf32>
    %101 = vector.extract_strided_slice %0 {offsets = [5, 0], sizes = [1, 256], strides = [1, 1]} : vector<9x256xf32> to vector<1x256xf32>
    %102 = vector.broadcast %101 : vector<1x256xf32> to vector<64x256xf32>
    %103 = arith.mulf %100, %102 : vector<64x256xf32>
    %c241_i32_24 = arith.constant 241 : i32
    %104 = tpu.dynamic_rotate %81 by %c241_i32_24 dim 1 : vector<64x256xf32>, i32 -> vector<64x256xf32>
    %105 = vector.extract_strided_slice %0 {offsets = [6, 0], sizes = [1, 256], strides = [1, 1]} : vector<9x256xf32> to vector<1x256xf32>
    %106 = vector.broadcast %105 : vector<1x256xf32> to vector<64x256xf32>
    %107 = arith.mulf %104, %106 : vector<64x256xf32>
    %c240_i32_25 = arith.constant 240 : i32
    %108 = tpu.dynamic_rotate %81 by %c240_i32_25 dim 1 : vector<64x256xf32>, i32 -> vector<64x256xf32>
    %109 = vector.extract_strided_slice %0 {offsets = [7, 0], sizes = [1, 256], strides = [1, 1]} : vector<9x256xf32> to vector<1x256xf32>
    %110 = vector.broadcast %109 : vector<1x256xf32> to vector<64x256xf32>
    %111 = arith.mulf %108, %110 : vector<64x256xf32>
    %c239_i32_26 = arith.constant 239 : i32
    %112 = tpu.dynamic_rotate %81 by %c239_i32_26 dim 1 : vector<64x256xf32>, i32 -> vector<64x256xf32>
    %113 = vector.extract_strided_slice %0 {offsets = [8, 0], sizes = [1, 256], strides = [1, 1]} : vector<9x256xf32> to vector<1x256xf32>
    %114 = vector.broadcast %113 : vector<1x256xf32> to vector<64x256xf32>
    %115 = arith.mulf %112, %114 : vector<64x256xf32>
    %116 = tpu.concatenate %87, %91, %95, %99, %81, %103, %107, %111, %115 in 0 : vector<64x256xf32>, vector<64x256xf32>, vector<64x256xf32>, vector<64x256xf32>, vector<64x256xf32>, vector<64x256xf32>, vector<64x256xf32>, vector<64x256xf32>, vector<64x256xf32> -> vector<576x256xf32>
    %cst_27 = arith.constant dense<0.000000e+00> : vector<32x256xf32>
    %117 = tpu.matmul %82, %116, %cst_27 {dimension_numbers = #tpu.dot_dimension_numbers<[1], [0], [0], [1], [0, 0, 1, 1], [], []>} : vector<32x576xf32>, vector<576x256xf32>, vector<32x256xf32> -> vector<32x256xf32>
    %118 = vector.broadcast %83 : vector<32x1xf32> to vector<32x256xf32>
    %119 = arith.addf %117, %118 : vector<32x256xf32>
    %cst_28 = arith.constant 0.000000e+00 : f32
    %120 = vector.broadcast %cst_28 : f32 to vector<32x256xf32>
    %121 = arith.maximumf %119, %120 : vector<32x256xf32>
    %c0_29 = arith.constant 0 : index
    %c0_30 = arith.constant 0 : index
    %122 = vector.load %arg10[%c0_29, %c0_30] : memref<16x288xf32, #tpu.memory_space<vmem>>, vector<16x288xf32>
    %c0_31 = arith.constant 0 : index
    %c0_32 = arith.constant 0 : index
    %123 = vector.load %arg11[%c0_31, %c0_32] : memref<16x1xf32, #tpu.memory_space<vmem>>, vector<16x1xf32>
    %c17_i32_33 = arith.constant 17 : i32
    %124 = tpu.dynamic_rotate %121 by %c17_i32_33 dim 1 : vector<32x256xf32>, i32 -> vector<32x256xf32>
    %125 = vector.extract_strided_slice %0 {offsets = [0, 0], sizes = [1, 256], strides = [1, 1]} : vector<9x256xf32> to vector<1x256xf32>
    %126 = vector.broadcast %125 : vector<1x256xf32> to vector<32x256xf32>
    %127 = arith.mulf %124, %126 : vector<32x256xf32>
    %c16_i32_34 = arith.constant 16 : i32
    %128 = tpu.dynamic_rotate %121 by %c16_i32_34 dim 1 : vector<32x256xf32>, i32 -> vector<32x256xf32>
    %129 = vector.extract_strided_slice %0 {offsets = [1, 0], sizes = [1, 256], strides = [1, 1]} : vector<9x256xf32> to vector<1x256xf32>
    %130 = vector.broadcast %129 : vector<1x256xf32> to vector<32x256xf32>
    %131 = arith.mulf %128, %130 : vector<32x256xf32>
    %c15_i32_35 = arith.constant 15 : i32
    %132 = tpu.dynamic_rotate %121 by %c15_i32_35 dim 1 : vector<32x256xf32>, i32 -> vector<32x256xf32>
    %133 = vector.extract_strided_slice %0 {offsets = [2, 0], sizes = [1, 256], strides = [1, 1]} : vector<9x256xf32> to vector<1x256xf32>
    %134 = vector.broadcast %133 : vector<1x256xf32> to vector<32x256xf32>
    %135 = arith.mulf %132, %134 : vector<32x256xf32>
    %c1_i32_36 = arith.constant 1 : i32
    %136 = tpu.dynamic_rotate %121 by %c1_i32_36 dim 1 : vector<32x256xf32>, i32 -> vector<32x256xf32>
    %137 = vector.extract_strided_slice %0 {offsets = [3, 0], sizes = [1, 256], strides = [1, 1]} : vector<9x256xf32> to vector<1x256xf32>
    %138 = vector.broadcast %137 : vector<1x256xf32> to vector<32x256xf32>
    %139 = arith.mulf %136, %138 : vector<32x256xf32>
    %c255_i32_37 = arith.constant 255 : i32
    %140 = tpu.dynamic_rotate %121 by %c255_i32_37 dim 1 : vector<32x256xf32>, i32 -> vector<32x256xf32>
    %141 = vector.extract_strided_slice %0 {offsets = [5, 0], sizes = [1, 256], strides = [1, 1]} : vector<9x256xf32> to vector<1x256xf32>
    %142 = vector.broadcast %141 : vector<1x256xf32> to vector<32x256xf32>
    %143 = arith.mulf %140, %142 : vector<32x256xf32>
    %c241_i32_38 = arith.constant 241 : i32
    %144 = tpu.dynamic_rotate %121 by %c241_i32_38 dim 1 : vector<32x256xf32>, i32 -> vector<32x256xf32>
    %145 = vector.extract_strided_slice %0 {offsets = [6, 0], sizes = [1, 256], strides = [1, 1]} : vector<9x256xf32> to vector<1x256xf32>
    %146 = vector.broadcast %145 : vector<1x256xf32> to vector<32x256xf32>
    %147 = arith.mulf %144, %146 : vector<32x256xf32>
    %c240_i32_39 = arith.constant 240 : i32
    %148 = tpu.dynamic_rotate %121 by %c240_i32_39 dim 1 : vector<32x256xf32>, i32 -> vector<32x256xf32>
    %149 = vector.extract_strided_slice %0 {offsets = [7, 0], sizes = [1, 256], strides = [1, 1]} : vector<9x256xf32> to vector<1x256xf32>
    %150 = vector.broadcast %149 : vector<1x256xf32> to vector<32x256xf32>
    %151 = arith.mulf %148, %150 : vector<32x256xf32>
    %c239_i32_40 = arith.constant 239 : i32
    %152 = tpu.dynamic_rotate %121 by %c239_i32_40 dim 1 : vector<32x256xf32>, i32 -> vector<32x256xf32>
    %153 = vector.extract_strided_slice %0 {offsets = [8, 0], sizes = [1, 256], strides = [1, 1]} : vector<9x256xf32> to vector<1x256xf32>
    %154 = vector.broadcast %153 : vector<1x256xf32> to vector<32x256xf32>
    %155 = arith.mulf %152, %154 : vector<32x256xf32>
    %156 = tpu.concatenate %127, %131, %135, %139, %121, %143, %147, %151, %155 in 0 : vector<32x256xf32>, vector<32x256xf32>, vector<32x256xf32>, vector<32x256xf32>, vector<32x256xf32>, vector<32x256xf32>, vector<32x256xf32>, vector<32x256xf32>, vector<32x256xf32> -> vector<288x256xf32>
    %cst_41 = arith.constant dense<0.000000e+00> : vector<16x256xf32>
    %157 = tpu.matmul %122, %156, %cst_41 {dimension_numbers = #tpu.dot_dimension_numbers<[1], [0], [0], [1], [0, 0, 1, 1], [], []>} : vector<16x288xf32>, vector<288x256xf32>, vector<16x256xf32> -> vector<16x256xf32>
    %158 = vector.broadcast %123 : vector<16x1xf32> to vector<16x256xf32>
    %159 = arith.addf %157, %158 : vector<16x256xf32>
    %cst_42 = arith.constant 0.000000e+00 : f32
    %160 = vector.broadcast %cst_42 : f32 to vector<16x256xf32>
    %161 = arith.maximumf %159, %160 : vector<16x256xf32>
    %c0_43 = arith.constant 0 : index
    %c0_44 = arith.constant 0 : index
    %162 = vector.load %arg12[%c0_43, %c0_44] : memref<16x1xf32, #tpu.memory_space<vmem>>, vector<16x1xf32>
    %163 = vector.broadcast %162 : vector<16x1xf32> to vector<16x256xf32>
    %164 = arith.mulf %161, %163 : vector<16x256xf32>
    %cst_45 = arith.constant dense<0.000000e+00> : vector<256xf32>
    %165 = vector.multi_reduction <add>, %164, %cst_45 [0] : vector<16x256xf32> to vector<256xf32>
    %166 = vector.shape_cast %165 : vector<256xf32> to vector<1x256xf32>
    %c0_46 = arith.constant 0 : index
    %c0_47 = arith.constant 0 : index
    %167 = vector.load %arg13[%c0_46, %c0_47] : memref<1x1xf32, #tpu.memory_space<vmem>>, vector<1x1xf32>
    %168 = vector.broadcast %167 : vector<1x1xf32> to vector<1x256xf32>
    %169 = arith.addf %166, %168 : vector<1x256xf32>
    %cst_48 = arith.constant 0.000000e+00 : f32
    %170 = vector.broadcast %cst_48 : f32 to vector<1x256xf32>
    %171 = arith.subf %170, %169 : vector<1x256xf32>
    %172 = math.exp %171 : vector<1x256xf32>
    %cst_49 = arith.constant 1.000000e+00 : f32
    %173 = vector.broadcast %cst_49 : f32 to vector<1x256xf32>
    %174 = arith.addf %173, %172 : vector<1x256xf32>
    %175 = tpu.reciprocal %174 : vector<1x256xf32> -> vector<1x256xf32>
    %176 = vector.shape_cast %175 : vector<1x256xf32> to vector<1x1x256xf32>
    %c0_50 = arith.constant 0 : index
    %c0_51 = arith.constant 0 : index
    %c0_52 = arith.constant 0 : index
    %177 = vector.load %arg14[%c0_50, %c0_51, %c0_52] : memref<1x1x256xf32, #tpu.memory_space<vmem>>, vector<1x1x256xf32>
    tpu.vector_store %arg14[%c0_50, %c0_51, %c0_52], %176 {strides = array<i32>} : memref<1x1x256xf32, #tpu.memory_space<vmem>>, vector<1x1x256xf32>,
    return
  }
  func.func @transform_0(%arg0: i32) -> (i32, i32) {
    %c0_i32 = arith.constant 0 : i32
    %c0_i32_0 = arith.constant 0 : i32
    return %c0_i32, %arg0 : i32, i32
  }
  func.func @transform_1(%arg0: i32) -> (i32, i32) {
    %c0_i32 = arith.constant 0 : i32
    %c0_i32_0 = arith.constant 0 : i32
    %c0_i32_1 = arith.constant 0 : i32
    return %c0_i32, %c0_i32_0 : i32, i32
  }
  func.func @transform_2(%arg0: i32) -> (i32, i32) {
    %c0_i32 = arith.constant 0 : i32
    %c0_i32_0 = arith.constant 0 : i32
    %c0_i32_1 = arith.constant 0 : i32
    return %c0_i32, %c0_i32_0 : i32, i32
  }
  func.func @transform_3(%arg0: i32) -> (i32, i32) {
    %c0_i32 = arith.constant 0 : i32
    %c0_i32_0 = arith.constant 0 : i32
    %c0_i32_1 = arith.constant 0 : i32
    return %c0_i32, %c0_i32_0 : i32, i32
  }
  func.func @transform_4(%arg0: i32) -> (i32, i32) {
    %c0_i32 = arith.constant 0 : i32
    %c0_i32_0 = arith.constant 0 : i32
    %c0_i32_1 = arith.constant 0 : i32
    return %c0_i32, %c0_i32_0 : i32, i32
  }
  func.func @transform_5(%arg0: i32) -> (i32, i32) {
    %c0_i32 = arith.constant 0 : i32
    %c0_i32_0 = arith.constant 0 : i32
    %c0_i32_1 = arith.constant 0 : i32
    return %c0_i32, %c0_i32_0 : i32, i32
  }
  func.func @transform_6(%arg0: i32) -> (i32, i32) {
    %c0_i32 = arith.constant 0 : i32
    %c0_i32_0 = arith.constant 0 : i32
    %c0_i32_1 = arith.constant 0 : i32
    return %c0_i32, %c0_i32_0 : i32, i32
  }
  func.func @transform_7(%arg0: i32) -> (i32, i32) {
    %c0_i32 = arith.constant 0 : i32
    %c0_i32_0 = arith.constant 0 : i32
    %c0_i32_1 = arith.constant 0 : i32
    return %c0_i32, %c0_i32_0 : i32, i32
  }
  func.func @transform_8(%arg0: i32) -> (i32, i32) {
    %c0_i32 = arith.constant 0 : i32
    %c0_i32_0 = arith.constant 0 : i32
    %c0_i32_1 = arith.constant 0 : i32
    return %c0_i32, %c0_i32_0 : i32, i32
  }
  func.func @transform_9(%arg0: i32) -> (i32, i32) {
    %c0_i32 = arith.constant 0 : i32
    %c0_i32_0 = arith.constant 0 : i32
    %c0_i32_1 = arith.constant 0 : i32
    return %c0_i32, %c0_i32_0 : i32, i32
  }
  func.func @transform_10(%arg0: i32) -> (i32, i32) {
    %c0_i32 = arith.constant 0 : i32
    %c0_i32_0 = arith.constant 0 : i32
    %c0_i32_1 = arith.constant 0 : i32
    return %c0_i32, %c0_i32_0 : i32, i32
  }
  func.func @transform_11(%arg0: i32) -> (i32, i32) {
    %c0_i32 = arith.constant 0 : i32
    %c0_i32_0 = arith.constant 0 : i32
    %c0_i32_1 = arith.constant 0 : i32
    return %c0_i32, %c0_i32_0 : i32, i32
  }
  func.func @transform_12(%arg0: i32) -> (i32, i32) {
    %c0_i32 = arith.constant 0 : i32
    %c0_i32_0 = arith.constant 0 : i32
    %c0_i32_1 = arith.constant 0 : i32
    return %c0_i32, %c0_i32_0 : i32, i32
  }
  func.func @transform_13(%arg0: i32) -> (i32, i32, i32) {
    %c0_i32 = arith.constant 0 : i32
    %c0_i32_0 = arith.constant 0 : i32
    %c0_i32_1 = arith.constant 0 : i32
    return %arg0, %c0_i32, %c0_i32_0 : i32, i32, i32
  }
}

</mosaic_0001>

<bundles_post_ra>
// kernel: tpu_custom_call.1
= control target key start
LH: loop header
LB: loop body
LE: loop exit
PB: predicated region body
PF: predicated region fallthrough
CT: control target
= control target key end

     0   :  { %s7833_s0 = inlined_call_operand.vmem [shape: f32[16,512], index: 0, kind: input, shape index: {}]   ;;  %s7834_s1 = inlined_call_operand.hbm [shape: f32[9,256], index: 1, kind: input, shape index: {}]   ;;  %s7835_s2 = inlined_call_operand.hbm [shape: f32[9,256], index: 2, kind: input, shape index: {}]   ;;  %s7836_s3 = inlined_call_operand.hbm [shape: f32[64,144], index: 3, kind: input, shape index: {}]   ;;  %s7837_s4 = inlined_call_operand.vmem [shape: f32[64,1], index: 4, kind: input, shape index: {}]   ;;  %s7838_s5 = inlined_call_operand.hbm [shape: f32[64,576], index: 5, kind: input, shape index: {}]   ;;  %s7839_s6 = inlined_call_operand.vmem [shape: f32[64,1], index: 6, kind: input, shape index: {}]   ;;  %s7840_s7 = inlined_call_operand.vmem [shape: f32[32,576], index: 7, kind: input, shape index: {}]   ;;  %s7841_s8 = inlined_call_operand.vmem [shape: f32[32,1], index: 8, kind: input, shape index: {}]   ;;  %s7842_s9 = inlined_call_operand.hbm [shape: f32[16,288], index: 9, kind: input, shape index: {}]   ;;  %s7843_s10 = inlined_call_operand.vmem [shape: f32[16,1], index: 10, kind: input, shape index: {}]   ;;  %s7844_s11 = inlined_call_operand.vmem [shape: f32[16,1], index: 11, kind: input, shape index: {}]   ;;  %s7845_s12 = inlined_call_operand.<no memory space> [shape: f32[1,1], index: 12, kind: input, shape index: {}]   ;;  %s7846_s13 = inlined_call_operand.hbm [shape: f32[2,1,256], index: 13, kind: output, shape index: {}]  }
   0x1   :  { %7979 = sst [smem:[#allocation74_spill]] %s7835_s2  ;;  %v18_v0 = vstv %s7845_s12 }
   0x2   :  { %7980 = sst [smem:[#allocation75_spill]] %s7843_s10  ;;  %19 = vst [vmem:[#allocation2] sm:$0x1] %v18_v0 }
   0x3   :  { %7981 = sst [smem:[#allocation76_spill]] %s7844_s11 }
   0x4   :  { %7982 = sst [smem:[#allocation77_spill]] %s7846_s13 }
   0x5   :  { %20 = vsyncpa [#allocation5], 0 }
   0x6   :  { %21 = vsyncpa [#allocation8], 0 }
   0x7   :  { %22 = vsyncpa [#allocation11], 0 }
   0x8   :  { %23 = vsyncpa [#allocation6], 0 }
   0x9   :  { %25 = vsyncpa [#allocation6 + $0x1], 0  ;;  %s4489_s27 = smov 0   ;;  %s4491_s28 = smov 0  }
   0xa   :  { %s4493_s29 = smov 0   ;;  %s4495_s30 = smov 0  }
   0xb LB: > { %7983 = sst [smem:[#allocation18_spill]] %s4371_s27  ;;  %s4510_s12 = sadd.s32 4294967295, %s4383_s30   ;;  %s4383_s30 = sphi %s4495_s30, %s8177_s30   ;;  %s4379_s29 = sphi %s4493_s29, %s8181_s29   ;;  %s4375_s28 = sphi %s4491_s28, %s8180_s28   ;;  %s4371_s27 = sphi %s4489_s27, %s8179_s27  }
   0xc   : > { %s3512_s14 = sadd.s32 4294967294, %s4383_s30   ;;  %s4514_s15 = sadd.s32 1, %s4383_s30  }
   0xd   : > { %7984 = sst [smem:[#allocation19_spill]] %s4514_s15  ;;  %s38_s16 = sadd.s32 1, %s4379_s29 }
   0xe   : > { %s35_s17 = ssub.s32 %s4383_s30, %s4514_s15  ;;  %p45_p0 = scmp.ne.s32.totalorder %s4379_s29, %s4375_s28 }
   0xf   : > { %p36_p1 = scmp.eq.s32.totalorder %s35_s17, 0  ;;  %p46_p2 = scmp.eq.s32.totalorder %s4383_s30, 0 }
  0x10   : > { %p327_p3 = scmp.eq.s32.totalorder %s4510_s12, 1  ;;  %p332_p4 = scmp.ne.s32.totalorder %s4375_s28, %s4371_s27 }
  0x11   : > { %s4526_s18 = scalar_select %p36_p1, %s4379_s29, %s38_s16  }
  0x12   : > { %p4528_p5 = por %p46_p2, %p45_p0  ;;  %p4532_p6 = por %p327_p3, %p45_p0 }
  0x13   : > { %7985 = sst [smem:[#allocation20_spill]] %s4526_s18  ;;  %p333_p7 = scmp.eq.s32.totalorder %s3512_s14, 1 }
  0x14   : > { %s7986_s19 = scalar_select %p4528_p5, 1, 0 }
  0x15   : > { %s7987_s20 = scalar_select %p4532_p6, 1, 0 }
  0x16   : > { %p3513_p8 = scmp.ge.s32.totalorder %s4383_s30, 1  ;;  %p340_p9 = scmp.lt.s32.totalorder %s4383_s30, 3 }
  0x17   : > { %7988 = sst [smem:[#allocation21_spill]] %s7987_s20  ;;  %p4538_p10 = por %p333_p7, %p332_p4 }
  0x18   : > { %p7851_p11 = scmp.eq.s32.totalorder %s4510_s12, 0  ;;  %p4543_p12 = pnand %p3513_p8, %p340_p9 }
  0x19   : > { %s7989_s21 = scalar_select %p4538_p10, 1, 0 }
  0x1a   : > { %s7991_s22 = scalar_select %p4543_p12, 1, 0 }
  0x1b   : > { %7990 = sst [smem:[#allocation22_spill]] %s7989_s21  ;;  %p4062_p13 = pneg %p4543_p12 }
  0x1c   : > { %s4385_s23 = smov [#allocation7]   ;;  %s4386_s26 = smov [#allocation10]  }
  0x1d   : > { %s365_s24 = sshll.u32 %s4385_s23, 4  ;;  %p4551_p0 = pnand %p7851_p11, %p4062_p13  ;;  %s366_s24 = int_to_ptr.vmem [resolvable:$true] %s365_s24 }
  0x1e   : > { %s394_s14 = sshll.u32 %s4386_s26, 4  ;;  %s7993_s2 = sld [smem:[#allocation74_spill]]  ;;  %s4555_s14 = int_to_ptr.vmem [resolvable:$true] %s394_s14 }
  0x1f   : > { %p4565_p2 = pneg %p4551_p0 }
  0x24   : > { %s4169_s18 = scalar_lea.hbm %s7993_s2, 512 }
  0x25   : > { %p4170_p1 = scmp.ne.s32.totalorder %s7993_s2, %s4169_s18  ;;  %p4176_p7 = scmp.lt.u32.totalorder %s4169_s18, %s7993_s2 }
  0x27   : > { %p4172_p3 = pnand %p4565_p2, %p4170_p1 }
  0x29   : > { %p4173_p4 = pneg %p4172_p3 }
  0x2b   : > { %p4178_p8 = pnand %p4176_p7, %p4173_p4 }
  0x2d   : > { %4181 = shalt.err (!%p4178_p8)
}
  0x2e   : > { %s4182_s16 = scalar_lea.vmem %s366_s24, 512  ;;  %p4190_p10 = scmp.lt.s32.totalorder %s366_s24, %s366_s24 }
  0x2f   : > { %p4183_p9 = scmp.ne.s32.totalorder %s366_s24, %s4182_s16  ;;  %p4191_p6 = scmp.lt.s32.totalorder %s4182_s16, %s4182_s16 }
  0x31   : > { %p4185_p13 = pnand %p4183_p9, %p4565_p2  ;;  %p4192_p12 = por %p4191_p6, %p4190_p10 }
  0x33   : > { %p4186_p11 = pneg %p4185_p13 }
  0x35   : > { %p4193_p5 = pnand %p4192_p12, %p4186_p11 }
  0x37   : > { %4196 = shalt.err (!%p4193_p5)
}
  0x38   : > { %s7859_s15 = smov 256   ;;  %s7861_s21 = smov 16  }
  0x39   : > { %4068 = dma.hbm_to_vmem [thread:$0]  (!%p4551_p0), %s7993_s2, 512, %s366_s24, [#allocation8], %s7859_s15, %s7859_s15, %s7861_s21  }
  0x3a   : > { %s4197_s13 = scalar_lea.hbm %s7838_s5, 5120 }
  0x3b   : > { %p4198_p5 = scmp.ne.s32.totalorder %s7838_s5, %s4197_s13  ;;  %p4204_p11 = scmp.lt.u32.totalorder %s4197_s13, %s7838_s5 }
  0x3d   : > { %p4200_p6 = pnand %p4198_p5, %p4565_p2 }
  0x3f   : > { %p4201_p10 = pneg %p4200_p6 }
  0x41   : > { %p4206_p12 = pnand %p4204_p11, %p4201_p10 }
  0x43   : > { %4209 = shalt.err (!%p4206_p12)
}
  0x44   : > { %s4210_s24 = scalar_lea.vmem %s4555_s14, 5120  ;;  %p4218_p7 = scmp.lt.s32.totalorder %s4555_s14, %s4555_s14 }
  0x45   : > { %p4211_p1 = scmp.ne.s32.totalorder %s4555_s14, %s4210_s24  ;;  %p4219_p8 = scmp.lt.s32.totalorder %s4210_s24, %s4210_s24 }
  0x47   : > { %p4213_p3 = pnand %p4211_p1, %p4565_p2  ;;  %p4220_p9 = por %p4219_p8, %p4218_p7 }
  0x49   : > { %p4214_p4 = pneg %p4213_p3 }
  0x4b   : > { %p4221_p13 = pnand %p4220_p9, %p4214_p4 }
  0x4d   : > { %4224 = shalt.err (!%p4221_p13)
}
  0x4e   : > { %s4389_s20 = smov 640   ;;  %s4390_s10 = smov 40  }
  0x4f   : > { %4074 = dma.hbm_to_vmem [thread:$0]  (!%p4551_p0), %s7838_s5, 5120, %s4555_s14, [#allocation11], %s4389_s20, %s4389_s20, %s4390_s10  }
  0x50   : > { %s4391_s27 = smov [#allocation4]   ;;  %s4392_s17 = smov [#allocation9]  }
  0x51   : > { %s352_s18 = sshll.u32 %s4391_s27, 4  ;;  %s378_s26 = sshll.u32 %s4392_s17, 4  ;;  %s353_s18 = int_to_ptr.vmem [resolvable:$true] %s352_s18  ;;  %s4607_s26 = int_to_ptr.vmem [resolvable:$true] %s378_s26 }
  0x52   : > { %s4225_s15 = scalar_lea.hbm %s7834_s1, 512 }
  0x53   : > { %p4226_p5 = scmp.ne.s32.totalorder %s7834_s1, %s4225_s15  ;;  %p4232_p11 = scmp.lt.u32.totalorder %s4225_s15, %s7834_s1 }
  0x55   : > { %p4228_p6 = pnand %p4226_p5, %p4565_p2 }
  0x57   : > { %p4229_p10 = pneg %p4228_p6 }
  0x59   : > { %p4234_p12 = pnand %p4232_p11, %p4229_p10 }
  0x5b   : > { %4237 = shalt.err (!%p4234_p12)
}
  0x5c   : > { %s4238_s20 = scalar_lea.vmem %s353_s18, 512  ;;  %p4246_p7 = scmp.lt.s32.totalorder %s353_s18, %s353_s18 }
  0x5d   : > { %p4239_p1 = scmp.ne.s32.totalorder %s353_s18, %s4238_s20  ;;  %p4247_p8 = scmp.lt.s32.totalorder %s4238_s20, %s4238_s20 }
  0x5f   : > { %p4241_p3 = pnand %p4239_p1, %p4565_p2  ;;  %p4248_p9 = por %p4247_p8, %p4246_p7 }
  0x61   : > { %p4242_p4 = pneg %p4241_p3 }
  0x63   : > { %p4249_p13 = pnand %p4248_p9, %p4242_p4 }
  0x65   : > { %4252 = shalt.err (!%p4249_p13)
}
  0x66   : > { %s7995_s2 = smov 16   ;;  %s7996_s21 = smov 256  }
  0x67   : > { %4065 = dma.hbm_to_vmem [thread:$0]  (!%p4551_p0), %s7834_s1, 512, %s353_s18, [#allocation5], %s7996_s21, %s7996_s21, %s7995_s2  }
  0x68   : > { %s4253_s17 = scalar_lea.hbm %s7836_s3, 2048 }
  0x69   : > { %p4254_p5 = scmp.ne.s32.totalorder %s7836_s3, %s4253_s17  ;;  %p4260_p11 = scmp.lt.u32.totalorder %s4253_s17, %s7836_s3 }
  0x6b   : > { %p4256_p6 = pnand %p4254_p5, %p4565_p2 }
  0x6d   : > { %p4257_p10 = pneg %p4256_p6 }
  0x6f   : > { %p4262_p12 = pnand %p4260_p11, %p4257_p10 }
  0x71   : > { %4265 = shalt.err (!%p4262_p12)
}
  0x72   : > { %s4266_s18 = scalar_lea.vmem %s4607_s26, 2048  ;;  %p4274_p7 = scmp.lt.s32.totalorder %s4607_s26, %s4607_s26 }
  0x73   : > { %p4267_p1 = scmp.ne.s32.totalorder %s4607_s26, %s4266_s18  ;;  %p4275_p8 = scmp.lt.s32.totalorder %s4266_s18, %s4266_s18 }
  0x75   : > { %p4269_p3 = pnand %p4267_p1, %p4565_p2  ;;  %p4276_p9 = por %p4275_p8, %p4274_p7 }
  0x77   : > { %p4270_p4 = pneg %p4269_p3 }
  0x79   : > { %p4277_p13 = pnand %p4276_p9, %p4270_p4 }
  0x7b   : > { %4280 = shalt.err (!%p4277_p13)
}
  0x7c   : > { %4071 = dma.hbm_to_vmem [thread:$0]  (!%p4551_p0), %s7836_s3, 2048, %s4607_s26, [#allocation8], %s7996_s21, %s7996_s21, %s7995_s2  }
  0x7d   : > { %s4393_s15 = smov [#allocation12]   ;;  %s4281_s16 = scalar_lea.hbm %s7842_s9, 768 }
  0x7e   : > { %s416_s13 = sshll.u32 %s4393_s15, 4  ;;  %p4282_p5 = scmp.ne.s32.totalorder %s7842_s9, %s4281_s16  ;;  %s417_s13 = int_to_ptr.vmem [resolvable:$true] %s416_s13 }
  0x7f   : > { %p4288_p11 = scmp.lt.u32.totalorder %s4281_s16, %s7842_s9 }
  0x80   : > { %p4284_p6 = pnand %p4282_p5, %p4565_p2 }
  0x82   : > { %p4285_p10 = pneg %p4284_p6 }
  0x84   : > { %p4290_p12 = pnand %p4288_p11, %p4285_p10 }
  0x86   : > { %4293 = shalt.err (!%p4290_p12)
}
  0x87   : > { %s4294_s26 = scalar_lea.vmem %s417_s13, 768  ;;  %p4302_p7 = scmp.lt.s32.totalorder %s417_s13, %s417_s13 }
  0x88   : > { %p4295_p1 = scmp.ne.s32.totalorder %s417_s13, %s4294_s26  ;;  %p4303_p8 = scmp.lt.s32.totalorder %s4294_s26, %s4294_s26 }
  0x8a   : > { %p4297_p3 = pnand %p4295_p1, %p4565_p2  ;;  %p4304_p9 = por %p4303_p8, %p4302_p7 }
  0x8c   : > { %p4298_p4 = pneg %p4297_p3 }
  0x8e   : > { %p4305_p13 = pnand %p4304_p9, %p4298_p4 }
  0x90   : > { %4308 = shalt.err (!%p4305_p13)
}
  0x91   : > { %s4394_s2 = smov 384   ;;  %s4395_s21 = smov 24  }
  0x92   : > { %4077 = dma.hbm_to_vmem [thread:$0]  (!%p4551_p0), %s7842_s9, 768, %s417_s13, [#allocation11], %s4394_s2, %s4394_s2, %s4395_s21  }
  0x93   : > { %p3519_p5 = scmp.ge.s32.totalorder %s4383_s30, 2 }
  0x94   : > { %p7997_p2 = scmp.ne.s32.totalorder (!%p3519_p5), %s7986_s19, 0 }
  0x95   : > { %435 = sbr.rel (%p3519_p5) target bundleno = 163 (0xa3), region = 64 }
  0x9c   : > { %438 = sbr.rel (!%p7997_p2) target bundleno = 163 (0xa3), region = 68  ;;  %s440_s23 = sand.u32 (%p7997_p2), 1, %s4379_s29  }
  0x9d   : > { %s3562_s15 = sshll.u32 (%p7997_p2), %s4383_s30, 4  ;;  %s3520_s27 = sshll.u32 (%p7997_p2), %s440_s23, 5 }
  0x9e   : > { %s445_s25 = scalar_lea.vmem (%p7997_p2), %s7833_s0, %s3562_s15  ;;  %s442_s13 = scalar_lea.vmem (%p7997_p2), [#allocation3], %s3520_s27 }
  0x9f   : > { %v458_v1 = vld [vmem:[%s445_s25] sm:$0xff] (%p7997_p2)  ;;  %v460_v2 = vld [vmem:[%s445_s25 + $0x8] sm:$0xff] (%p7997_p2) }
  0xa0   : > { %v462_v3 = vld [vmem:[%s445_s25 + $0x20] sm:$0xff] (%p7997_p2)  ;;  %459 = vst [vmem:[%s442_s13] sm:$0xff] (%p7997_p2), %v458_v1  ;;  %461 = vst [vmem:[%s442_s13 + $0x8] sm:$0xff] (%p7997_p2), %v460_v2  ;;  %v464_v4 = vld [vmem:[%s445_s25 + $0x28] sm:$0xff] (%p7997_p2) }
  0xa1   : > { %463 = vst [vmem:[%s442_s13 + $0x10] sm:$0xff] (%p7997_p2), %v462_v3  ;;  %465 = vst [vmem:[%s442_s13 + $0x18] sm:$0xff] (%p7997_p2), %v464_v4 }
  0xa3 PF: > { %p7998_p0 = scmp.ne.s32.totalorder %s7991_s22, 0 }
  0xa5   : > { %474 = sbr.rel (%p7998_p0) target bundleno = 2315 (0x90b), region = 91 }
  0xac   : > { %s4687_s19 = sand.u32 1, %s4375_s28   ;;  %p7999_p6 = scmp.eq.s32.totalorder %s4510_s12, 0 }
  0xad   : > { %s3524_s24 = sshll.u32 %s4687_s19, 5 }
  0xae   : > { %s479_s11 = scalar_lea.vmem [#allocation3], %s3524_s24 }
  0xaf   : > { %4354 = dma.done.wait (%p7999_p6), [#allocation5], 512   ;;  %p8000_p10 = pmov %p7999_p6 }
  0xb0   : > { %p8001_p11 = pmov %p7999_p6 }
  0xb1   : > { %4356 = vsyncadd (%p8000_p10), [#allocation5], 4294966784 }
  0xb2   : > { %4358 = dma.done.wait (%p8001_p11), [#allocation8], 2560   ;;  %p8002_p12 = pmov %p7999_p6 }
  0xb3   : > { %p8003_p1 = pmov %p7999_p6 }
  0xb4   : > { %4360 = vsyncadd (%p8002_p12), [#allocation8], 4294964736 }
  0xb5   : > { %4362 = dma.done.wait (%p8003_p1), [#allocation11], 5888   ;;  %p8004_p3 = pmov %p8003_p1 }
  0xb6   : > { %v4702_v5 = vld [vmem:[%s479_s11 + $0x8] sm:$0xff]  ;;  %v4704_v6 = vld [vmem:[%s479_s11] sm:$0xff]  ;;  %s4396_s22 = smov 17   ;;  %v4710_v7 = vld [vmem:[%s479_s11 + $0x18] sm:$0xff]  ;;  %s4397_s14 = smov 16   ;;  %vm815_vm0 = vcmask 130048   ;;  %v7865_v21 = vlaneseq }
  0xb7   : > { %4364 = vsyncadd (%p8004_p3), [#allocation11], 4294961408  ;;  %577 = vrot.lane.b32.xlu1 %v4702_v5, %s4396_s22  ;;  %573 = vrot.lane.b32.xlu0 %v4704_v6, %s4396_s22  ;;  %v4712_v8 = vld [vmem:[%s479_s11 + $0x10] sm:$0xff]  ;;  %s4398_s18 = smov 15   ;;  %v3580_v9 = vpack.c.bf16 %v4710_v7, %v4702_v5  ;;  %s4399_s26 = smov 1   ;;  %v550_v11 = vld [vmem:[#allocation9 + $0x8] sm:$0xff] }
  0xb8   : > { %v3582_v10 = vpack.c.bf16 %v4712_v8, %v4704_v6  ;;  %s4400_s2 = smov 127   ;;  %s4401_s21 = smov 113   ;;  %3533 = vmatprep.mubr.msk.f32.mxu0 %vm815_vm0, %v550_v11  ;;  %v566_v12 = vld [vmem:[%s7837_s4 + $0x8] sm:$0xff]  ;;  %v565_v13 = vld [vmem:[%s7837_s4] sm:$0xff]  ;;  %v4404_v14 = vmov 0   ;;  %v567_v15 = vld [vmem:[%s7837_s4 + $0x10] sm:$0xff] }
  0xb9   : > { %s4402_s20 = smov 112   ;;  %s7863_s10 = smov 111   ;;  %4156 = vset.pattern.permute.xlu1 %v4404_v14  ;;  %4155 = vset.pattern.permute.xlu0 %v4404_v14  ;;  %v568_v16 = vld [vmem:[%s7837_s4 + $0x18] sm:$0xff]  ;;  %v569_v17 = vld [vmem:[%s7837_s4 + $0x20] sm:$0xff]  ;;  %v570_v18 = vld [vmem:[%s7837_s4 + $0x28] sm:$0xff]  ;;  %v4804_v22 = vshrl.u32 %v7865_v21, 7 }
  0xba   : > { %v571_v19 = vld [vmem:[%s7837_s4 + $0x30] sm:$0xff]  ;;  %v572_v20 = vld [vmem:[%s7837_s4 + $0x38] sm:$0xff]  ;;  %v4807_v23 = vand.u32 127, %v7865_v21  ;;  %v4814_v26 = vld [vmem:[#allocation4] sm:$0xff]  ;;  %s4406_s13 = smov 32   ;;  %s4407_s24 = smov 30  }
  0xbb   : > { %579 = vrot.lane.b32.xlu1 %v4710_v7, %s4396_s22  ;;  %575 = vrot.lane.b32.xlu0 %v4712_v8, %s4396_s22  ;;  %8005 = vst [vmem:[#allocation23_spill] sm:$0xff] %v4804_v22  ;;  %v4810_v24 = vsub.s32 0, %v4804_v22  ;;  %v4812_v25 = vld [vmem:[#allocation4 + $0x8] sm:$0xff]  ;;  %v4834_v37 = vsub.s32 1, %v4804_v22  ;;  %v4850_v50 = vsub.s32 2, %v4804_v22  ;;  %v4874_v3 = vsub.s32 3, %v4804_v22 }
  0xbc   : > { %vm583_vm1 = vcmp.lt.s32.totalorder %v4807_v23, 17  ;;  %vm608_vm2 = vcmp.lt.s32.totalorder %v4807_v23, 16  ;;  %vm633_vm3 = vcmp.lt.s32.totalorder %v4807_v23, 15  ;;  %vm658_vm4 = vcmp.lt.s32.totalorder %v4807_v23, 1  ;;  %s4408_s11 = smov 2   ;;  %s4409_s23 = smov 126  }
  0xbd   : > { %8006 = vst [vmem:[#allocation24_spill] sm:$0xff] %v4810_v24  ;;  %v4819_v29 = vrot.slane %v4812_v25, %v4810_v24  ;;  %v4823_v30 = vrot.slane %v4814_v26, %v4810_v24  ;;  %v4843_v46 = vrot.slane %v4814_v26, %v4834_v37  ;;  %v4847_v47 = vrot.slane %v4812_v25, %v4834_v37  ;;  %s4410_s15 = smov 98   ;;  %s4411_s27 = smov 96  }
  0xbe   : > { %v4867_v63 = vrot.slane %v4814_v26, %v4850_v50  ;;  %v4871_v0 = vrot.slane %v4812_v25, %v4850_v50  ;;  %vm683_vm5 = vcmp.lt.s32.totalorder %v4807_v23, 127  ;;  %vm708_vm6 = vcmp.lt.s32.totalorder %v4807_v23, 113  ;;  %s4412_s17 = smov 94   ;;  %s8156_s16 = sld [smem:[#allocation76_spill]] }
  0xbf   : > { %602 = vrot.lane.b32.xlu1 %v4712_v8, %s4397_s14  ;;  %600 = vrot.lane.b32.xlu0 %v4704_v6, %s4397_s14  ;;  %8007 = vst [vmem:[#allocation25_spill] sm:$0xff] %v4819_v29  ;;  %8008 = vst [vmem:[#allocation26_spill] sm:$0xff] %v4823_v30  ;;  %vm733_vm7 = vcmp.lt.s32.totalorder %v4807_v23, 112  ;;  %vm758_vm8 = vcmp.lt.s32.totalorder %v4807_v23, 111  ;;  %vm1053_vm9 = vcmp.lt.s32.totalorder %v4807_v23, 34  ;;  %vm1126_vm10 = vcmp.lt.s32.totalorder %v4807_v23, 32 }
  0xc0   : > { %8009 = vst [vmem:[#allocation27_spill] sm:$0xff] %v4843_v46  ;;  %8010 = vst [vmem:[#allocation28_spill] sm:$0xff] %v4847_v47  ;;  %vm1199_vm11 = vcmp.lt.s32.totalorder %v4807_v23, 30  ;;  %vm1272_vm12 = vcmp.lt.s32.totalorder %v4807_v23, 2  ;;  %vm1564_vm13 = vcmp.lt.s32.totalorder %v4807_v23, 94  ;;  %vm1345_vm14 = vcmp.lt.s32.totalorder %v4807_v23, 126 }
  0xc1   : > { %8011 = vst [vmem:[#allocation29_spill] sm:$0xff] %v4867_v63  ;;  %8012 = vst [vmem:[#allocation30_spill] sm:$0xff] %v4871_v0  ;;  %vm1418_vm15 = vcmp.lt.s32.totalorder %v4807_v23, 98 }
  0xc3   : > { %606 = vrot.lane.b32.xlu1 %v4710_v7, %s4397_s14  ;;  %604 = vrot.lane.b32.xlu0 %v4702_v5, %s4397_s14 }
  0xc7   : > { %627 = vrot.lane.b32.xlu1 %v4712_v8, %s4398_s18  ;;  %625 = vrot.lane.b32.xlu0 %v4704_v6, %s4398_s18 }
  0xcb   : > { %631 = vrot.lane.b32.xlu1 %v4710_v7, %s4398_s18  ;;  %629 = vrot.lane.b32.xlu0 %v4702_v5, %s4398_s18 }
  0xcf   : > { %652 = vrot.lane.b32.xlu1 %v4712_v8, %s4399_s26  ;;  %650 = vrot.lane.b32.xlu0 %v4704_v6, %s4399_s26 }
  0xd3   : > { %656 = vrot.lane.b32.xlu1 %v4710_v7, %s4399_s26  ;;  %654 = vrot.lane.b32.xlu0 %v4702_v5, %s4399_s26 }
  0xd7   : > { %677 = vrot.lane.b32.xlu1 %v4712_v8, %s4400_s2  ;;  %675 = vrot.lane.b32.xlu0 %v4704_v6, %s4400_s2 }
  0xdb   : > { %681 = vrot.lane.b32.xlu1 %v4710_v7, %s4400_s2  ;;  %679 = vrot.lane.b32.xlu0 %v4702_v5, %s4400_s2 }
  0xdf   : > { %702 = vrot.lane.b32.xlu1 %v4712_v8, %s4401_s21  ;;  %700 = vrot.lane.b32.xlu0 %v4704_v6, %s4401_s21 }
  0xe3   : > { %706 = vrot.lane.b32.xlu1 %v4710_v7, %s4401_s21  ;;  %704 = vrot.lane.b32.xlu0 %v4702_v5, %s4401_s21 }
  0xe7   : > { %727 = vrot.lane.b32.xlu1 %v4712_v8, %s4402_s20  ;;  %725 = vrot.lane.b32.xlu0 %v4704_v6, %s4402_s20 }
  0xeb   : > { %731 = vrot.lane.b32.xlu1 %v4710_v7, %s4402_s20  ;;  %729 = vrot.lane.b32.xlu0 %v4702_v5, %s4402_s20 }
  0xef   : > { %752 = vrot.lane.b32.xlu1 %v4712_v8, %s7863_s10  ;;  %750 = vrot.lane.b32.xlu0 %v4704_v6, %s7863_s10  ;;  %v4952_v6 = vsub.s32 7, %v4804_v22 }
  0xf1   : > { %8021 = vst [vmem:[#allocation39_spill] sm:$0xff] %v4952_v6 }
  0xf3   : > { %756 = vrot.lane.b32.xlu1 %v4710_v7, %s7863_s10  ;;  %754 = vrot.lane.b32.xlu0 %v4702_v5, %s7863_s10  ;;  %s4405_s10 = smov 34  }
  0xf7   : > { %782 = vperm.xlu1 %4156, %v566_v12   ;;  %777 = vperm.xlu0 %4155, %v565_v13  }
  0xfb   : > { %787 = vperm.xlu1 %4156, %v567_v15   ;;  %792 = vperm.xlu0 %4155, %v568_v16  }
  0xff   : > { %797 = vperm.xlu1 %4156, %v569_v17   ;;  %802 = vperm.xlu0 %4155, %v570_v18  }
 0x103   : > { %807 = vperm.xlu1 %4156, %v571_v19   ;;  %812 = vperm.xlu0 %4155, %v572_v20  }
 0x129   : > { %v578_v27 = vpop.permute.xlu1 %577  ;;  %v574_v28 = vpop.permute.xlu0 %573 }
 0x12a   : > { %v586_v31 = vsel %vm583_vm1, %v578_v27, %v574_v28  ;;  %v584_v32 = vsel %vm583_vm1, %v574_v28, %v578_v27  ;;  %v4891_v28 = vrot.slane %v4814_v26, %v4874_v3 }
 0x12b   : > { %v597_v38 = vmul.f32 %v4819_v29, %v584_v32  ;;  %v596_v40 = vmul.f32 %v4823_v30, %v586_v31  ;;  %v4895_v31 = vrot.slane %v4812_v25, %v4874_v3 }
 0x12c   : > { %8013 = vst [vmem:[#allocation31_spill] sm:$0xff] %v4891_v28 }
 0x12d   : > { %v580_v33 = vpop.permute.xlu1 %579  ;;  %v576_v34 = vpop.permute.xlu0 %575  ;;  %8014 = vst [vmem:[#allocation32_spill] sm:$0xff] %v4895_v31 }
 0x12e   : > { %v587_v35 = vsel %vm583_vm1, %v580_v33, %v576_v34  ;;  %v585_v36 = vsel %vm583_vm1, %v576_v34, %v580_v33  ;;  %v4898_v34 = vsub.s32 5, %v4804_v22 }
 0x12f   : > { %v599_v39 = vmul.f32 %v4819_v29, %v585_v36  ;;  %v598_v41 = vmul.f32 %v4823_v30, %v587_v35 }
 0x130   : > { %8015 = vst [vmem:[#allocation33_spill] sm:$0xff] %v4898_v34 }
 0x131   : > { %v603_v42 = vpop.permute.xlu1 %602  ;;  %v601_v43 = vpop.permute.xlu0 %600  ;;  %v3564_v44 = vpack.c.bf16 %v599_v39, %v597_v38  ;;  %v3566_v45 = vpack.c.bf16 %v598_v41, %v596_v40 }
 0x133   : > { %3565 = vmatprep.subr.bf16.mxu0 %v3564_v44 }
 0x134   : > { %3567 = vmatpush1.bf16.msra.mxu0 %v3566_v45 }
 0x135   : > { %v607_v48 = vpop.permute.xlu1 %606  ;;  %v605_v49 = vpop.permute.xlu0 %604 }
 0x136   : > { %v610_v51 = vsel %vm608_vm2, %v603_v42, %v607_v48  ;;  %v612_v52 = vsel %vm608_vm2, %v607_v48, %v603_v42  ;;  %v609_v53 = vsel %vm608_vm2, %v601_v43, %v605_v49  ;;  %v611_v54 = vsel %vm608_vm2, %v605_v49, %v601_v43 }
 0x137   : > { %v623_v55 = vmul.f32 %v4843_v46, %v612_v52  ;;  %v624_v56 = vmul.f32 %v4847_v47, %v610_v51  ;;  %v621_v57 = vmul.f32 %v4843_v46, %v611_v54  ;;  %v622_v58 = vmul.f32 %v4847_v47, %v609_v53 }
 0x138   : > { %v4915_v51 = vrot.slane %v4814_v26, %v4898_v34  ;;  %v4919_v52 = vrot.slane %v4812_v25, %v4898_v34 }
 0x139   : > { %v628_v59 = vpop.permute.xlu1 %627  ;;  %v626_v60 = vpop.permute.xlu0 %625  ;;  %v3568_v61 = vpack.c.bf16 %v624_v56, %v622_v58  ;;  %v3570_v62 = vpack.c.bf16 %v623_v55, %v621_v57  ;;  %v4925_v55 = vsub.s32 6, %v4804_v22 }
 0x13a   : > { %8016 = vst [vmem:[#allocation34_spill] sm:$0xff] %v4915_v51  ;;  %8017 = vst [vmem:[#allocation35_spill] sm:$0xff] %v4919_v52 }
 0x13b   : > { %3569 = vmatprep.subr.bf16.mxu0 %v3568_v61  ;;  %8018 = vst [vmem:[#allocation36_spill] sm:$0xff] %v4925_v55 }
 0x13c   : > { %3571 = vmatpush1.bf16.msra.mxu0 %v3570_v62 }
 0x13d   : > { %v632_v1 = vpop.permute.xlu1 %631  ;;  %v630_v2 = vpop.permute.xlu0 %629 }
 0x13e   : > { %v635_v4 = vsel %vm633_vm3, %v628_v59, %v632_v1  ;;  %v637_v11 = vsel %vm633_vm3, %v632_v1, %v628_v59  ;;  %v634_v12 = vsel %vm633_vm3, %v626_v60, %v630_v2  ;;  %v636_v13 = vsel %vm633_vm3, %v630_v2, %v626_v60 }
 0x13f   : > { %v648_v14 = vmul.f32 %v4867_v63, %v637_v11  ;;  %v649_v15 = vmul.f32 %v4871_v0, %v635_v4  ;;  %v646_v16 = vmul.f32 %v4867_v63, %v636_v13  ;;  %v647_v17 = vmul.f32 %v4871_v0, %v634_v12 }
 0x140   : > { %v4945_v4 = vrot.slane %v4814_v26, %v4925_v55  ;;  %v4949_v11 = vrot.slane %v4812_v25, %v4925_v55 }
 0x141   : > { %v653_v18 = vpop.permute.xlu1 %652  ;;  %v651_v19 = vpop.permute.xlu0 %650  ;;  %v3572_v20 = vpack.c.bf16 %v649_v15, %v647_v17  ;;  %v3574_v27 = vpack.c.bf16 %v648_v14, %v646_v16 }
 0x142   : > { %8019 = vst [vmem:[#allocation37_spill] sm:$0xff] %v4945_v4  ;;  %8020 = vst [vmem:[#allocation38_spill] sm:$0xff] %v4949_v11 }
 0x143   : > { %3573 = vmatprep.subr.bf16.mxu0 %v3572_v20 }
 0x144   : > { %3575 = vmatpush1.bf16.msra.mxu0 %v3574_v27 }
 0x145   : > { %v657_v32 = vpop.permute.xlu1 %656  ;;  %v655_v33 = vpop.permute.xlu0 %654 }
 0x146   : > { %v660_v35 = vsel %vm658_vm4, %v653_v18, %v657_v32  ;;  %v662_v36 = vsel %vm658_vm4, %v657_v32, %v653_v18  ;;  %v659_v38 = vsel %vm658_vm4, %v651_v19, %v655_v33  ;;  %v661_v39 = vsel %vm658_vm4, %v655_v33, %v651_v19 }
 0x147   : > { %v673_v40 = vmul.f32 %v4891_v28, %v662_v36  ;;  %v674_v41 = vmul.f32 %v4895_v31, %v660_v35  ;;  %v671_v42 = vmul.f32 %v4891_v28, %v661_v39  ;;  %v672_v43 = vmul.f32 %v4895_v31, %v659_v38 }
 0x148   : > { %v4969_v35 = vrot.slane %v4814_v26, %v4952_v6  ;;  %v4973_v36 = vrot.slane %v4812_v25, %v4952_v6 }
 0x149   : > { %v678_v44 = vpop.permute.xlu1 %677  ;;  %v676_v45 = vpop.permute.xlu0 %675  ;;  %v3576_v48 = vpack.c.bf16 %v674_v41, %v672_v43  ;;  %v3578_v49 = vpack.c.bf16 %v673_v40, %v671_v42 }
 0x14a   : > { %8022 = vst [vmem:[#allocation40_spill] sm:$0xff] %v4969_v35  ;;  %8023 = vst [vmem:[#allocation41_spill] sm:$0xff] %v4973_v36 }
 0x14b   : > { %3577 = vmatprep.subr.bf16.mxu0 %v3576_v48 }
 0x14c   : > { %3579 = vmatpush1.bf16.msra.mxu0 %v3578_v49 }
 0x14d   : > { %v682_v53 = vpop.permute.xlu1 %681  ;;  %v680_v54 = vpop.permute.xlu0 %679  ;;  %3581 = vmatprep.subr.bf16.mxu0 %v3580_v9 }
 0x14e   : > { %v685_v56 = vsel %vm683_vm5, %v678_v44, %v682_v53  ;;  %v687_v57 = vsel %vm683_vm5, %v682_v53, %v678_v44  ;;  %v684_v58 = vsel %vm683_vm5, %v676_v45, %v680_v54  ;;  %v686_v59 = vsel %vm683_vm5, %v680_v54, %v676_v45 }
 0x14f   : > { %v698_v60 = vmul.f32 %v4915_v51, %v685_v56  ;;  %v699_v5 = vmul.f32 %v4919_v52, %v687_v57  ;;  %v696_v7 = vmul.f32 %v4915_v51, %v684_v58  ;;  %v697_v9 = vmul.f32 %v4919_v52, %v686_v59  ;;  %v3531_v56 = vld [vmem:[#allocation4 + $0x10] ss:$0 sm:$0xff]  ;;  %v3532_v57 = vld [vmem:[#allocation4 + $0x18] ss:$0 sm:$0xff] }
 0x150   : > { %3583 = vmatpush1.bf16.msra.mxu0 %v3582_v10 }
 0x151   : > { %v703_v61 = vpop.permute.xlu1 %702  ;;  %v701_v62 = vpop.permute.xlu0 %700  ;;  %v3584_v1 = vpack.c.bf16 %v699_v5, %v697_v9  ;;  %v3586_v2 = vpack.c.bf16 %v698_v60, %v696_v7 }
 0x153   : > { %3585 = vmatprep.subr.bf16.mxu0 %v3584_v1 }
 0x154   : > { %3587 = vmatpush1.bf16.msra.mxu0 %v3586_v2 }
 0x155   : > { %v707_v12 = vpop.permute.xlu1 %706  ;;  %v705_v13 = vpop.permute.xlu0 %704 }
 0x156   : > { %v710_v8 = vsel %vm708_vm6, %v703_v61, %v707_v12  ;;  %v712_v10 = vsel %vm708_vm6, %v707_v12, %v703_v61  ;;  %v709_v14 = vsel %vm708_vm6, %v701_v62, %v705_v13  ;;  %v711_v15 = vsel %vm708_vm6, %v705_v13, %v701_v62 }
 0x157   : > { %v723_v16 = vmul.f32 %v4945_v4, %v710_v8  ;;  %v724_v17 = vmul.f32 %v4949_v11, %v712_v10  ;;  %v721_v18 = vmul.f32 %v4945_v4, %v709_v14  ;;  %v722_v19 = vmul.f32 %v4949_v11, %v711_v15  ;;  %v549_v8 = vld [vmem:[#allocation9] sm:$0xff]  ;;  %v552_v10 = vld [vmem:[#allocation9 + $0x18] sm:$0xff]  ;;  %v551_v14 = vld [vmem:[#allocation9 + $0x10] sm:$0xff] }
 0x158   : > { %v554_v15 = vld [vmem:[#allocation9 + $0x28] sm:$0xff] }
 0x159   : > { %v728_v20 = vpop.permute.xlu1 %727  ;;  %v726_v27 = vpop.permute.xlu0 %725  ;;  %v3588_v32 = vpack.c.bf16 %v724_v17, %v722_v19  ;;  %v3590_v33 = vpack.c.bf16 %v723_v16, %v721_v18  ;;  %v553_v16 = vld [vmem:[#allocation9 + $0x20] sm:$0xff]  ;;  %v556_v17 = vld [vmem:[#allocation9 + $0x38] sm:$0xff]  ;;  %v555_v18 = vld [vmem:[#allocation9 + $0x30] sm:$0xff] }
 0x15a   : > { %v558_v19 = vld [vmem:[#allocation9 + $0x48] sm:$0xff] }
 0x15b   : > { %3589 = vmatprep.subr.bf16.mxu0 %v3588_v32  ;;  %v559_v32 = vld [vmem:[#allocation9 + $0x50] sm:$0xff] }
 0x15c   : > { %3591 = vmatpush1.bf16.msra.mxu0 %v3590_v33  ;;  %v562_v33 = vld [vmem:[#allocation9 + $0x68] sm:$0xff] }
 0x15d   : > { %v732_v38 = vpop.permute.xlu1 %731  ;;  %v730_v39 = vpop.permute.xlu0 %729 }
 0x15e   : > { %v735_v40 = vsel %vm733_vm7, %v728_v20, %v732_v38  ;;  %v737_v41 = vsel %vm733_vm7, %v732_v38, %v728_v20  ;;  %v734_v42 = vsel %vm733_vm7, %v726_v27, %v730_v39  ;;  %v736_v26 = vsel %vm733_vm7, %v730_v39, %v726_v27  ;;  %v557_v20 = vld [vmem:[#allocation9 + $0x40] sm:$0xff]  ;;  %v560_v27 = vld [vmem:[#allocation9 + $0x58] sm:$0xff] }
 0x15f   : > { %v748_v43 = vmul.f32 %v4969_v35, %v735_v40  ;;  %v749_v25 = vmul.f32 %v4973_v36, %v737_v41  ;;  %v746_v44 = vmul.f32 %v4969_v35, %v734_v42  ;;  %v747_v45 = vmul.f32 %v4973_v36, %v736_v26  ;;  %v561_v38 = vld [vmem:[#allocation9 + $0x60] sm:$0xff]  ;;  %v564_v39 = vld [vmem:[#allocation9 + $0x78] sm:$0xff]  ;;  %v563_v40 = vld [vmem:[#allocation9 + $0x70] sm:$0xff] }
 0x161   : > { %v753_v48 = vpop.permute.xlu1 %752  ;;  %v751_v49 = vpop.permute.xlu0 %750  ;;  %v3592_v53 = vpack.c.bf16 %v749_v25, %v747_v45  ;;  %v3594_v54 = vpack.c.bf16 %v748_v43, %v746_v44 }
 0x163   : > { %3593 = vmatprep.subr.bf16.mxu0 %v3592_v53 }
 0x164   : > { %3595 = vmatpush1.bf16.msra.mxu0 %v3594_v54 }
 0x165   : > { %v757_v58 = vpop.permute.xlu1 %756  ;;  %v755_v59 = vpop.permute.xlu0 %754 }
 0x166   : > { %v760_v60 = vsel %vm758_vm8, %v753_v48, %v757_v58  ;;  %v762_v5 = vsel %vm758_vm8, %v757_v58, %v753_v48  ;;  %v759_v7 = vsel %vm758_vm8, %v751_v49, %v755_v59  ;;  %v761_v9 = vsel %vm758_vm8, %v755_v59, %v751_v49 }
 0x167   : > { %v773_v61 = vmul.f32 %v3531_v56, %v760_v60  ;;  %v774_v62 = vmul.f32 %v3532_v57, %v762_v5  ;;  %v771_v1 = vmul.f32 %v3531_v56, %v759_v7  ;;  %v772_v2 = vmul.f32 %v3532_v57, %v761_v9 }
 0x169   : > { %v3596_v12 = vpack.c.bf16 %v774_v62, %v772_v2  ;;  %v3598_v13 = vpack.c.bf16 %v773_v61, %v771_v1 }
 0x16b   : > { %3597 = vmatprep.subr.bf16.mxu0 %v3596_v12 }
 0x16c   : > { %3599 = vmatpush1.bf16.msra.mxu0 %v3598_v13 }
 0x16f   : > { %905 = vmatmul.mubr.f32.vlgmr.msra.gmra.mrb[0].mxu0 %v549_v8 }
 0x170   : > { %3534 = vmatprep.mubr.msk.f32.mxu0 %vm815_vm0, %v552_v10 }
 0x173   : > { %911 = vmatmul.mubr.f32.gmra.mrb[2].mxu0 %v551_v14 }
 0x174   : > { %3535 = vmatprep.mubr.msk.f32.mxu0 %vm815_vm0, %v554_v15 }
 0x176   : > { %v778_v41 = vpop.permute.xlu0 %777  ;;  %v783_v44 = vpop.permute.xlu1 %782 }
 0x177   : > { %917 = vmatmul.mubr.f32.gmra.mrb[4].mxu0 %v553_v16 }
 0x178   : > { %3536 = vmatprep.mubr.msk.f32.mxu0 %vm815_vm0, %v556_v17 }
 0x17a   : > { %v788_v10 = vpop.permute.xlu1 %787  ;;  %v793_v15 = vpop.permute.xlu0 %792 }
 0x17b   : > { %923 = vmatmul.mubr.f32.gmra.mrb[6].mxu0 %v555_v18 }
 0x17c   : > { %3537 = vmatprep.mubr.msk.f32.mxu0 %vm815_vm0, %v558_v19 }
 0x17f   : > { %929 = vmatmul.mubr.f32.gmra.mrb[8].mxu0 %v557_v20 }
 0x180   : > { %3538 = vmatprep.mubr.msk.f32.mxu0 %vm815_vm0, %v560_v27 }
 0x183   : > { %935 = vmatmul.mubr.f32.gmra.mrb[10].mxu0 %v559_v32 }
 0x184   : > { %3539 = vmatprep.mubr.msk.f32.mxu0 %vm815_vm0, %v562_v33  ;;  %v798_v33 = vpop.permute.xlu1 %797 }
 0x187   : > { %941 = vmatmul.mubr.f32.gmra.mrb[12].mxu0 %v561_v38 }
 0x188   : > { %3540 = vmatprep.mubr.msk.f32.mxu0 %vm815_vm0, %v564_v39  ;;  %v803_v39 = vpop.permute.xlu0 %802  ;;  %vm1491_vm0 = vcmp.lt.s32.totalorder %v4807_v23, 96  ;;  %v2870_v23 = vld [vmem:[#allocation12 + $0x10] sm:$0xff] }
 0x18b   : > { %947 = vmatmul.mubr.f32.gmra.mrb[14].mxu0 %v563_v40 }
 0x242   : > { %v906_v42 = vpop.f32.mrb[0].mxu0 }
 0x243   : > { %v907_v26 = vadd.f32 %v906_v42, %v778_v41  ;;  %v908_v43 = vpop.f32.mrb[1].mxu0 }
 0x244   : > { %v909_v5 = vadd.f32 %v908_v43, %v778_v41 }
 0x245   : > { %v5003_v25 = vmax.f32 %v907_v26, 0.0 }
 0x246   : > { %v912_v45 = vpop.f32.mrb[2].mxu0  ;;  %v5029_v61 = vmax.f32 %v909_v5, 0.0 }
 0x247   : > { %8024 = vst [vmem:[#allocation42_spill] sm:$0xff] %v5003_v25  ;;  %v913_v48 = vadd.f32 %v912_v45, %v783_v44  ;;  %v914_v49 = vpop.f32.mrb[3].mxu0  ;;  %1021 = vrot.lane.b32.xlu1 %v5003_v25, %s4405_s10 }
 0x248   : > { %8026 = vst [vmem:[#allocation44_spill] sm:$0xff] %v5029_v61  ;;  %v915_v62 = vadd.f32 %v914_v49, %v783_v44  ;;  %v813_v49 = vpop.permute.xlu0 %812 }
 0x249   : > { %v5007_v53 = vmax.f32 %v913_v48, 0.0  ;;  %v808_v48 = vpop.permute.xlu1 %807 }
 0x24a   : > { %v918_v54 = vpop.f32.mrb[4].mxu0  ;;  %v5039_v12 = vmax.f32 %v915_v62, 0.0 }
 0x24b   : > { %8025 = vst [vmem:[#allocation43_spill] sm:$0xff] %v5007_v53  ;;  %v920_v56 = vpop.f32.mrb[5].mxu0  ;;  %1023 = vrot.lane.b32.xlu0 %v5007_v53, %s4405_s10  ;;  %1094 = vrot.lane.b32.xlu1 %v5003_v25, %s4406_s13  ;;  %v919_v14 = vadd.f32 %v918_v54, %v788_v10 }
 0x24c   : > { %8027 = vst [vmem:[#allocation45_spill] sm:$0xff] %v5039_v12  ;;  %v921_v19 = vadd.f32 %v920_v56, %v788_v10 }
 0x24d   : > { %v5061_v16 = vmax.f32 %v919_v14, 0.0 }
 0x24e   : > { %v924_v57 = vpop.f32.mrb[6].mxu0  ;;  %v5085_v20 = vmax.f32 %v921_v19, 0.0 }
 0x24f   : > { %v926_v58 = vpop.f32.mrb[7].mxu0  ;;  %1096 = vrot.lane.b32.xlu0 %v5007_v53, %s4406_s13  ;;  %1167 = vrot.lane.b32.xlu1 %v5003_v25, %s4407_s24  ;;  %8028 = vst [vmem:[#allocation46_spill] sm:$0xff] %v5061_v16  ;;  %v925_v17 = vadd.f32 %v924_v57, %v793_v15 }
 0x250   : > { %8030 = vst [vmem:[#allocation48_spill] sm:$0xff] %v5085_v20  ;;  %v927_v27 = vadd.f32 %v926_v58, %v793_v15  ;;  %v5196_v15 = vld [vmem:[#allocation7 + $0x8] sm:$0xff] }
 0x251   : > { %v5067_v18 = vmax.f32 %v925_v17, 0.0 }
 0x252   : > { %v930_v59 = vpop.f32.mrb[8].mxu0  ;;  %v5091_v32 = vmax.f32 %v927_v27, 0.0 }
 0x253   : > { %v5017_v60 = vpop.f32.mrb[9].mxu0  ;;  %1169 = vrot.lane.b32.xlu0 %v5007_v53, %s4407_s24  ;;  %1240 = vrot.lane.b32.xlu1 %v5003_v25, %s4408_s11  ;;  %8029 = vst [vmem:[#allocation47_spill] sm:$0xff] %v5067_v18  ;;  %v931_v38 = vadd.f32 %v930_v59, %v798_v33 }
 0x254   : > { %8031 = vst [vmem:[#allocation49_spill] sm:$0xff] %v5091_v32  ;;  %v933_v26 = vadd.f32 %v5017_v60, %v798_v33  ;;  %v5208_v33 = vld [vmem:[#allocation7] sm:$0xff] }
 0x255   : > { %v5109_v40 = vmax.f32 %v931_v38, 0.0  ;;  %v5212_v38 = vrot.slane %v5196_v15, %v4810_v24 }
 0x256   : > { %v936_v7 = vpop.f32.mrb[10].mxu0  ;;  %v5134_v43 = vmax.f32 %v933_v26, 0.0 }
 0x257   : > { %v5023_v9 = vpop.f32.mrb[11].mxu0  ;;  %1242 = vrot.lane.b32.xlu0 %v5007_v53, %s4408_s11  ;;  %1313 = vrot.lane.b32.xlu1 %v5003_v25, %s4409_s23  ;;  %8032 = vst [vmem:[#allocation50_spill] sm:$0xff] %v5109_v40  ;;  %v937_v41 = vadd.f32 %v936_v7, %v803_v39 }
 0x258   : > { %8034 = vst [vmem:[#allocation52_spill] sm:$0xff] %v5134_v43  ;;  %v939_v44 = vadd.f32 %v5023_v9, %v803_v39 }
 0x259   : > { %v5115_v42 = vmax.f32 %v937_v41, 0.0 }
 0x25a   : > { %v5031_v1 = vpop.f32.mrb[12].mxu0  ;;  %v5141_v45 = vmax.f32 %v939_v44, 0.0 }
 0x25b   : > { %v5033_v2 = vpop.f32.mrb[13].mxu0  ;;  %1315 = vrot.lane.b32.xlu0 %v5007_v53, %s4409_s23  ;;  %1037 = vrot.lane.b32.xlu1 %v5029_v61, %s4405_s10  ;;  %8033 = vst [vmem:[#allocation51_spill] sm:$0xff] %v5115_v42  ;;  %v943_v54 = vadd.f32 %v5031_v1, %v808_v48 }
 0x25c   : > { %8035 = vst [vmem:[#allocation53_spill] sm:$0xff] %v5141_v45 }
 0x25d   : > { %v5160_v57 = vmax.f32 %v943_v54, 0.0 }
 0x25e   : > { %v5041_v13 = vpop.f32.mrb[14].mxu0 }
 0x25f   : > { %v5043_v8 = vpop.f32.mrb[15].mxu0  ;;  %1039 = vrot.lane.b32.xlu0 %v5039_v12, %s4405_s10  ;;  %1110 = vrot.lane.b32.xlu1 %v5029_v61, %s4406_s13  ;;  %8036 = vst [vmem:[#allocation54_spill] sm:$0xff] %v5160_v57  ;;  %v949_v58 = vadd.f32 %v5041_v13, %v813_v49  ;;  %v945_v13 = vadd.f32 %v5033_v2, %v808_v48 }
 0x260   : > { %v951_v19 = vadd.f32 %v5043_v8, %v813_v49  ;;  %v5226_v49 = vrot.slane %v5208_v33, %v4810_v24 }
 0x261   : > { %v5169_v5 = vmax.f32 %v949_v58, 0.0  ;;  %v5198_v17 = vmax.f32 %v945_v13, 0.0 }
 0x262   : > { %v5216_v39 = vmax.f32 %v951_v19, 0.0 }
 0x263   : > { %1112 = vrot.lane.b32.xlu0 %v5039_v12, %s4406_s13  ;;  %1183 = vrot.lane.b32.xlu1 %v5029_v61, %s4407_s24  ;;  %8037 = vst [vmem:[#allocation55_spill] sm:$0xff] %v5169_v5  ;;  %8039 = vst [vmem:[#allocation57_spill] sm:$0xff] %v5198_v17 }
 0x264   : > { %8041 = vst [vmem:[#allocation59_spill] sm:$0xff] %v5216_v39 }
 0x267   : > { %1185 = vrot.lane.b32.xlu0 %v5039_v12, %s4407_s24  ;;  %1256 = vrot.lane.b32.xlu1 %v5029_v61, %s4408_s11 }
 0x26b   : > { %1258 = vrot.lane.b32.xlu0 %v5039_v12, %s4408_s11  ;;  %1329 = vrot.lane.b32.xlu1 %v5029_v61, %s4409_s23 }
 0x26f   : > { %1331 = vrot.lane.b32.xlu0 %v5039_v12, %s4409_s23  ;;  %1025 = vrot.lane.b32.xlu1 %v5061_v16, %s4405_s10 }
 0x273   : > { %1027 = vrot.lane.b32.xlu0 %v5067_v18, %s4405_s10  ;;  %1098 = vrot.lane.b32.xlu1 %v5061_v16, %s4406_s13 }
 0x277   : > { %1100 = vrot.lane.b32.xlu0 %v5067_v18, %s4406_s13  ;;  %1171 = vrot.lane.b32.xlu1 %v5061_v16, %s4407_s24 }
 0x27b   : > { %1173 = vrot.lane.b32.xlu0 %v5067_v18, %s4407_s24  ;;  %1244 = vrot.lane.b32.xlu1 %v5061_v16, %s4408_s11 }
 0x27f   : > { %1246 = vrot.lane.b32.xlu0 %v5067_v18, %s4408_s11  ;;  %1317 = vrot.lane.b32.xlu1 %v5061_v16, %s4409_s23 }
 0x283   : > { %1319 = vrot.lane.b32.xlu0 %v5067_v18, %s4409_s23  ;;  %1041 = vrot.lane.b32.xlu1 %v5085_v20, %s4405_s10 }
 0x287   : > { %1043 = vrot.lane.b32.xlu0 %v5091_v32, %s4405_s10  ;;  %1114 = vrot.lane.b32.xlu1 %v5085_v20, %s4406_s13 }
 0x28b   : > { %1116 = vrot.lane.b32.xlu0 %v5091_v32, %s4406_s13  ;;  %1187 = vrot.lane.b32.xlu1 %v5085_v20, %s4407_s24 }
 0x28f   : > { %1189 = vrot.lane.b32.xlu0 %v5091_v32, %s4407_s24  ;;  %1260 = vrot.lane.b32.xlu1 %v5085_v20, %s4408_s11 }
 0x293   : > { %1262 = vrot.lane.b32.xlu0 %v5091_v32, %s4408_s11  ;;  %1333 = vrot.lane.b32.xlu1 %v5085_v20, %s4409_s23 }
 0x297   : > { %1335 = vrot.lane.b32.xlu0 %v5091_v32, %s4409_s23  ;;  %1029 = vrot.lane.b32.xlu1 %v5109_v40, %s4405_s10 }
 0x29b   : > { %1031 = vrot.lane.b32.xlu0 %v5115_v42, %s4405_s10  ;;  %1102 = vrot.lane.b32.xlu1 %v5109_v40, %s4406_s13 }
 0x29f   : > { %1104 = vrot.lane.b32.xlu0 %v5115_v42, %s4406_s13  ;;  %1175 = vrot.lane.b32.xlu1 %v5109_v40, %s4407_s24 }
 0x2a3   : > { %1177 = vrot.lane.b32.xlu0 %v5115_v42, %s4407_s24  ;;  %1248 = vrot.lane.b32.xlu1 %v5109_v40, %s4408_s11 }
 0x2a7   : > { %1250 = vrot.lane.b32.xlu0 %v5115_v42, %s4408_s11  ;;  %1321 = vrot.lane.b32.xlu1 %v5109_v40, %s4409_s23 }
 0x2ab   : > { %1323 = vrot.lane.b32.xlu0 %v5115_v42, %s4409_s23  ;;  %1045 = vrot.lane.b32.xlu1 %v5134_v43, %s4405_s10 }
 0x2af   : > { %1047 = vrot.lane.b32.xlu0 %v5141_v45, %s4405_s10  ;;  %1118 = vrot.lane.b32.xlu1 %v5134_v43, %s4406_s13 }
 0x2b3   : > { %1120 = vrot.lane.b32.xlu0 %v5141_v45, %s4406_s13  ;;  %1191 = vrot.lane.b32.xlu1 %v5134_v43, %s4407_s24 }
 0x2b7   : > { %1193 = vrot.lane.b32.xlu0 %v5141_v45, %s4407_s24  ;;  %1264 = vrot.lane.b32.xlu1 %v5134_v43, %s4408_s11 }
 0x2b9   : > { %v1022_v56 = vpop.permute.xlu1 %1021 }
 0x2bb   : > { %1266 = vrot.lane.b32.xlu0 %v5141_v45, %s4408_s11  ;;  %1337 = vrot.lane.b32.xlu1 %v5134_v43, %s4409_s23 }
 0x2bd   : > { %v1024_v59 = vpop.permute.xlu0 %1023  ;;  %v5163_v60 = vpop.permute.xlu1 %1094 }
 0x2bf   : > { %1339 = vrot.lane.b32.xlu0 %v5141_v45, %s4409_s23  ;;  %1033 = vrot.lane.b32.xlu1 %v5160_v57, %s4405_s10 }
 0x2c1   : > { %v5171_v7 = vpop.permute.xlu0 %1096  ;;  %v5173_v9 = vpop.permute.xlu1 %1167 }
 0x2c3   : > { %1035 = vrot.lane.b32.xlu0 %v5169_v5, %s4405_s10  ;;  %1106 = vrot.lane.b32.xlu1 %v5160_v57, %s4406_s13 }
 0x2c5   : > { %v5179_v62 = vpop.permute.xlu0 %1169  ;;  %v5181_v1 = vpop.permute.xlu1 %1240 }
 0x2c7   : > { %1108 = vrot.lane.b32.xlu0 %v5169_v5, %s4406_s13  ;;  %1179 = vrot.lane.b32.xlu1 %v5160_v57, %s4407_s24 }
 0x2c9   : > { %v5188_v10 = vpop.permute.xlu0 %1242  ;;  %v5190_v14 = vpop.permute.xlu1 %1313 }
 0x2ca   : > { %8038 = vst [vmem:[#allocation56_spill] sm:$0xff] %v5190_v14 }
 0x2cb   : > { %1181 = vrot.lane.b32.xlu0 %v5169_v5, %s4407_s24  ;;  %1252 = vrot.lane.b32.xlu1 %v5160_v57, %s4408_s11 }
 0x2cd   : > { %v5201_v27 = vpop.permute.xlu0 %1315  ;;  %v1038_v2 = vpop.permute.xlu1 %1037 }
 0x2ce   : > { %8040 = vst [vmem:[#allocation58_spill] sm:$0xff] %v5201_v27  ;;  %v1054_v8 = vsel %vm1053_vm9, %v1022_v56, %v1038_v2  ;;  %v1062_v54 = vsel %vm1053_vm9, %v1038_v2, %v1022_v56 }
 0x2cf   : > { %1254 = vrot.lane.b32.xlu0 %v5169_v5, %s4408_s11  ;;  %1049 = vrot.lane.b32.xlu1 %v5198_v17, %s4405_s10  ;;  %v1079_v58 = vmul.f32 %v5212_v38, %v1054_v8  ;;  %v1078_v22 = vmul.f32 %v5226_v49, %v1062_v54 }
 0x2d1   : > { %v1040_v41 = vpop.permute.xlu0 %1039  ;;  %v5218_v26 = vpop.permute.xlu1 %1110 }
 0x2d2   : > { %v1063_v44 = vsel %vm1053_vm9, %v1040_v41, %v1024_v59  ;;  %v1055_v48 = vsel %vm1053_vm9, %v1024_v59, %v1040_v41 }
 0x2d3   : > { %1051 = vrot.lane.b32.xlu0 %v5216_v39, %s4405_s10  ;;  %1325 = vrot.lane.b32.xlu1 %v5160_v57, %s4409_s23  ;;  %v1081_v13 = vmul.f32 %v5212_v38, %v1055_v48  ;;  %v1080_v19 = vmul.f32 %v5226_v49, %v1063_v44 }
 0x2d5   : > { %v5237_v59 = vpop.permute.xlu0 %1112  ;;  %v5239_v41 = vpop.permute.xlu1 %1183  ;;  %v3600_v21 = vpack.c.bf16 %v1081_v13, %v1079_v58  ;;  %v3602_v56 = vpack.c.bf16 %v1080_v19, %v1078_v22 }
 0x2d7   : > { %1327 = vrot.lane.b32.xlu0 %v5169_v5, %s4409_s23  ;;  %1122 = vrot.lane.b32.xlu1 %v5198_v17, %s4406_s13 }
 0x2d8   : > { %3601 = vmatprep.subr.bf16.mxu1 %v3600_v21 }
 0x2d9   : > { %v5246_v2 = vpop.permute.xlu0 %1185  ;;  %v5248_v8 = vpop.permute.xlu1 %1256  ;;  %3603 = vmatpush1.bf16.msra.mxu1 %v3602_v56 }
 0x2db   : > { %1388 = vrot.lane.b32.xlu0 %v5007_v53, %s4410_s15  ;;  %1195 = vrot.lane.b32.xlu1 %v5198_v17, %s4407_s24 }
 0x2dd   : > { %v5254_v44 = vpop.permute.xlu0 %1258  ;;  %v5256_v48 = vpop.permute.xlu1 %1329 }
 0x2de   : > { %8042 = vst [vmem:[#allocation60_spill] sm:$0xff] %v5256_v48 }
 0x2df   : > { %1404 = vrot.lane.b32.xlu0 %v5039_v12, %s4410_s15  ;;  %1268 = vrot.lane.b32.xlu1 %v5198_v17, %s4408_s11 }
 0x2e1   : > { %v5262_v21 = vpop.permute.xlu0 %1331  ;;  %v1026_v22 = vpop.permute.xlu1 %1025 }
 0x2e2   : > { %8043 = vst [vmem:[#allocation61_spill] sm:$0xff] %v5262_v21 }
 0x2e3   : > { %1124 = vrot.lane.b32.xlu0 %v5216_v39, %s4406_s13  ;;  %1341 = vrot.lane.b32.xlu1 %v5198_v17, %s4409_s23  ;;  %s8170_s13 = sld [smem:[#allocation21_spill]] }
 0x2e5   : > { %v1028_v54 = vpop.permute.xlu0 %1027  ;;  %v5268_v58 = vpop.permute.xlu1 %1098 }
 0x2e7   : > { %1392 = vrot.lane.b32.xlu0 %v5067_v18, %s4410_s15  ;;  %1386 = vrot.lane.b32.xlu1 %v5003_v25, %s4410_s15 }
 0x2e9   : > { %v5274_v13 = vpop.permute.xlu0 %1100  ;;  %v5276_v19 = vpop.permute.xlu1 %1171  ;;  %p8173_p7 = scmp.ne.s32.totalorder %s8170_s13, 0 }
 0x2eb   : > { %1408 = vrot.lane.b32.xlu0 %v5091_v32, %s4410_s15  ;;  %1402 = vrot.lane.b32.xlu1 %v5029_v61, %s4410_s15 }
 0x2ed   : > { %v5282_v56 = vpop.permute.xlu0 %1173  ;;  %v5284_v24 = vpop.permute.xlu1 %1244 }
 0x2ef   : > { %1396 = vrot.lane.b32.xlu0 %v5115_v42, %s4410_s15  ;;  %1390 = vrot.lane.b32.xlu1 %v5061_v16, %s4410_s15 }
 0x2f1   : > { %v5290_v35 = vpop.permute.xlu0 %1246  ;;  %v5292_v36 = vpop.permute.xlu1 %1317 }
 0x2f2   : > { %8044 = vst [vmem:[#allocation62_spill] sm:$0xff] %v5292_v36 }
 0x2f3   : > { %1197 = vrot.lane.b32.xlu0 %v5216_v39, %s4407_s24  ;;  %1406 = vrot.lane.b32.xlu1 %v5085_v20, %s4410_s15  ;;  %s3563_s24 = sshll.u32 %s4510_s12, 5  ;;  %s4415_s12 = smov [#allocation13]  }
 0x2f5   : > { %v5298_v4 = vpop.permute.xlu0 %1319  ;;  %v1042_v11 = vpop.permute.xlu1 %1041 }
 0x2f6   : > { %8045 = vst [vmem:[#allocation63_spill] sm:$0xff] %v5298_v4  ;;  %v1056_v51 = vsel %vm1053_vm9, %v1026_v22, %v1042_v11  ;;  %v1064_v52 = vsel %vm1053_vm9, %v1042_v11, %v1026_v22 }
 0x2f7   : > { %1412 = vrot.lane.b32.xlu0 %v5141_v45, %s4410_s15  ;;  %1394 = vrot.lane.b32.xlu1 %v5109_v40, %s4410_s15  ;;  %v1082_v46 = vmul.f32 %v5226_v49, %v1064_v52  ;;  %v1083_v47 = vmul.f32 %v5212_v38, %v1056_v51  ;;  %v974_v51 = vld [vmem:[#allocation10 + $0x8] sm:$0xff] }
 0x2f8   : > { %1734 = vmatprep.mubr.f32.mxu1 %v974_v51 }
 0x2f9   : > { %v1044_v28 = vpop.permute.xlu0 %1043  ;;  %v5308_v31 = vpop.permute.xlu1 %1114 }
 0x2fa   : > { %v1057_v63 = vsel %vm1053_vm9, %v1028_v54, %v1044_v28  ;;  %v1065_v0 = vsel %vm1053_vm9, %v1044_v28, %v1028_v54 }
 0x2fb   : > { %v1084_v29 = vmul.f32 %v5226_v49, %v1065_v0  ;;  %v1085_v11 = vmul.f32 %v5212_v38, %v1057_v63  ;;  %1400 = vrot.lane.b32.xlu0 %v5169_v5, %s4410_s15  ;;  %1410 = vrot.lane.b32.xlu1 %v5134_v43, %s4410_s15 }
 0x2fd   : > { %v5322_v22 = vpop.permute.xlu0 %1116  ;;  %v5324_v30 = vpop.permute.xlu1 %1187  ;;  %v3604_v6 = vpack.c.bf16 %v1085_v11, %v1083_v47  ;;  %v3606_v28 = vpack.c.bf16 %v1084_v29, %v1082_v46 }
 0x2ff   : > { %1461 = vrot.lane.b32.xlu0 %v5007_v53, %s4411_s27  ;;  %1398 = vrot.lane.b32.xlu1 %v5160_v57, %s4410_s15 }
 0x300   : > { %3605 = vmatprep.subr.bf16.mxu1 %v3604_v6 }
 0x301   : > { %3607 = vmatpush1.bf16.msra.mxu1 %v3606_v28  ;;  %v5330_v63 = vpop.permute.xlu0 %1189  ;;  %v5332_v0 = vpop.permute.xlu1 %1260 }
 0x303   : > { %1270 = vrot.lane.b32.xlu0 %v5216_v39, %s4408_s11  ;;  %1414 = vrot.lane.b32.xlu1 %v5198_v17, %s4410_s15 }
 0x305   : > { %v5338_v29 = vpop.permute.xlu0 %1262  ;;  %v5340_v46 = vpop.permute.xlu1 %1333 }
 0x306   : > { %8046 = vst [vmem:[#allocation64_spill] sm:$0xff] %v5340_v46 }
 0x307   : > { %1477 = vrot.lane.b32.xlu0 %v5039_v12, %s4411_s27  ;;  %1459 = vrot.lane.b32.xlu1 %v5003_v25, %s4411_s27 }
 0x309   : > { %v5346_v47 = vpop.permute.xlu0 %1335  ;;  %v1030_v52 = vpop.permute.xlu1 %1029 }
 0x30a   : > { %8047 = vst [vmem:[#allocation65_spill] sm:$0xff] %v5346_v47 }
 0x30b   : > { %1534 = vrot.lane.b32.xlu0 %v5007_v53, %s4412_s17  ;;  %1475 = vrot.lane.b32.xlu1 %v5029_v61, %s4411_s27 }
 0x30d   : > { %v1032_v6 = vpop.permute.xlu0 %1031  ;;  %v5352_v54 = vpop.permute.xlu1 %1102 }
 0x30f   : > { %1550 = vrot.lane.b32.xlu0 %v5039_v12, %s4412_s17  ;;  %1532 = vrot.lane.b32.xlu1 %v5003_v25, %s4412_s17  ;;  %v1013_v12 = vld [vmem:[%s7839_s6] sm:$0xff] }
 0x311   : > { %v5358_v11 = vpop.permute.xlu0 %1104  ;;  %v5360_v28 = vpop.permute.xlu1 %1175 }
 0x313   : > { %1465 = vrot.lane.b32.xlu0 %v5067_v18, %s4411_s27  ;;  %1548 = vrot.lane.b32.xlu1 %v5029_v61, %s4412_s17 }
 0x315   : > { %v5366_v51 = vpop.permute.xlu0 %1177  ;;  %v5368_v55 = vpop.permute.xlu1 %1248 }
 0x316   : > { %8048 = vst [vmem:[#allocation66_spill] sm:$0xff] %v5368_v55 }
 0x317   : > { %1481 = vrot.lane.b32.xlu0 %v5091_v32, %s4411_s27  ;;  %1463 = vrot.lane.b32.xlu1 %v5061_v16, %s4411_s27 }
 0x319   : > { %v5374_v46 = vpop.permute.xlu0 %1250  ;;  %v5376_v36 = vpop.permute.xlu1 %1321 }
 0x31a   : > { %8049 = vst [vmem:[#allocation67_spill] sm:$0xff] %v5376_v36 }
 0x31b   : > { %1538 = vrot.lane.b32.xlu0 %v5067_v18, %s4412_s17  ;;  %1479 = vrot.lane.b32.xlu1 %v5085_v20, %s4411_s27 }
 0x31d   : > { %v5382_v47 = vpop.permute.xlu0 %1323  ;;  %v1046_v4 = vpop.permute.xlu1 %1045 }
 0x31e   : > { %8050 = vst [vmem:[#allocation68_spill] sm:$0xff] %v5382_v47  ;;  %v1058_v48 = vsel %vm1053_vm9, %v1030_v52, %v1046_v4  ;;  %v1066_v14 = vsel %vm1053_vm9, %v1046_v4, %v1030_v52 }
 0x31f   : > { %1554 = vrot.lane.b32.xlu0 %v5091_v32, %s4412_s17  ;;  %1536 = vrot.lane.b32.xlu1 %v5061_v16, %s4412_s17  ;;  %v1086_v27 = vmul.f32 %v5226_v49, %v1066_v14  ;;  %v1087_v18 = vmul.f32 %v5212_v38, %v1058_v48 }
 0x321   : > { %v1048_v36 = vpop.permute.xlu0 %1047  ;;  %v5392_v34 = vpop.permute.xlu1 %1118 }
 0x322   : > { %v1059_v21 = vsel %vm1053_vm9, %v1032_v6, %v1048_v36  ;;  %v1067_v47 = vsel %vm1053_vm9, %v1048_v36, %v1032_v6 }
 0x323   : > { %v1088_v32 = vmul.f32 %v5226_v49, %v1067_v47  ;;  %v1089_v4 = vmul.f32 %v5212_v38, %v1059_v21  ;;  %1343 = vrot.lane.b32.xlu0 %v5216_v39, %s4409_s23  ;;  %1552 = vrot.lane.b32.xlu1 %v5085_v20, %s4412_s17 }
 0x325   : > { %v5406_v52 = vpop.permute.xlu0 %1120  ;;  %v5408_v16 = vpop.permute.xlu1 %1191  ;;  %v3608_v53 = vpack.c.bf16 %v1089_v4, %v1087_v18  ;;  %v3610_v36 = vpack.c.bf16 %v1088_v32, %v1086_v27 }
 0x327   : > { %1469 = vrot.lane.b32.xlu0 %v5115_v42, %s4411_s27  ;;  %1467 = vrot.lane.b32.xlu1 %v5109_v40, %s4411_s27 }
 0x328   : > { %3609 = vmatprep.subr.bf16.mxu1 %v3608_v53 }
 0x329   : > { %3611 = vmatpush1.bf16.msra.mxu1 %v3610_v36  ;;  %v5414_v14 = vpop.permute.xlu0 %1193  ;;  %v5416_v48 = vpop.permute.xlu1 %1264 }
 0x32b   : > { %1485 = vrot.lane.b32.xlu0 %v5141_v45, %s4411_s27  ;;  %1483 = vrot.lane.b32.xlu1 %v5134_v43, %s4411_s27 }
 0x32d   : > { %v5422_v18 = vpop.permute.xlu0 %1266  ;;  %v5424_v32 = vpop.permute.xlu1 %1337 }
 0x32e   : > { %8051 = vst [vmem:[#allocation69_spill] sm:$0xff] %v5424_v32 }
 0x32f   : > { %1542 = vrot.lane.b32.xlu0 %v5115_v42, %s4412_s17  ;;  %1540 = vrot.lane.b32.xlu1 %v5109_v40, %s4412_s17  ;;  %v7932_v40 = vmov 0.0  }
 0x330   : > { %1960 = vmatprep.mubr.f32.mxu0 %v7932_v40 }
 0x331   : > { %v5430_v53 = vpop.permute.xlu0 %1339  ;;  %v1034_v27 = vpop.permute.xlu1 %1033 }
 0x332   : > { %8052 = vst [vmem:[#allocation70_spill] sm:$0xff] %v5430_v53 }
 0x333   : > { %1416 = vrot.lane.b32.xlu0 %v5216_v39, %s4410_s15  ;;  %1556 = vrot.lane.b32.xlu1 %v5134_v43, %s4412_s17  ;;  %v1127_v43 = vsel %vm1126_vm10, %v5163_v60, %v5218_v26 }
 0x335   : > { %v1036_v21 = vpop.permute.xlu0 %1035  ;;  %v5436_v47 = vpop.permute.xlu1 %1106 }
 0x337   : > { %1558 = vrot.lane.b32.xlu0 %v5141_v45, %s4412_s17  ;;  %1471 = vrot.lane.b32.xlu1 %v5160_v57, %s4411_s27  ;;  %v1128_v45 = vsel %vm1126_vm10, %v5171_v7, %v5237_v59 }
 0x339   : > { %v5442_v6 = vpop.permute.xlu0 %1108  ;;  %v5444_v4 = vpop.permute.xlu1 %1179 }
 0x33b   : > { %1473 = vrot.lane.b32.xlu0 %v5169_v5, %s4411_s27  ;;  %1487 = vrot.lane.b32.xlu1 %v5198_v17, %s4411_s27 }
 0x33d   : > { %v5450_v36 = vpop.permute.xlu0 %1181  ;;  %v5452_v32 = vpop.permute.xlu1 %1252 }
 0x33e   : > { %8053 = vst [vmem:[#allocation71_spill] sm:$0xff] %v5452_v32 }
 0x33f   : > { %1546 = vrot.lane.b32.xlu0 %v5169_v5, %s4412_s17  ;;  %1544 = vrot.lane.b32.xlu1 %v5160_v57, %s4412_s17  ;;  %v5470_v5 = vrot.slane %v5196_v15, %v4834_v37 }
 0x341   : > { %v5458_v53 = vpop.permute.xlu0 %1254  ;;  %v1050_v42 = vpop.permute.xlu1 %1049 }
 0x342   : > { %8054 = vst [vmem:[#allocation72_spill] sm:$0xff] %v5458_v53  ;;  %v1060_v57 = vsel %vm1053_vm9, %v1034_v27, %v1050_v42  ;;  %v1068_v40 = vsel %vm1053_vm9, %v1050_v42, %v1034_v27  ;;  %v1136_v42 = vsel %vm1126_vm10, %v5237_v59, %v5171_v7  ;;  %v1154_v27 = vmul.f32 %v5470_v5, %v1128_v45 }
 0x343   : > { %1489 = vrot.lane.b32.xlu0 %v5216_v39, %s4411_s27  ;;  %1560 = vrot.lane.b32.xlu1 %v5198_v17, %s4412_s17  ;;  %v1090_v53 = vmul.f32 %v5226_v49, %v1068_v40  ;;  %v5504_v45 = vrot.slane %v5208_v33, %v4834_v37  ;;  %v1014_v40 = vld [vmem:[%s7839_s6 + $0x8] sm:$0xff]  ;;  %v1015_v37 = vld [vmem:[%s7839_s6 + $0x10] sm:$0xff]  ;;  %s8117_s27 = smov 111  }
 0x345   : > { %v1052_v20 = vpop.permute.xlu0 %1051  ;;  %v5482_v25 = vpop.permute.xlu1 %1325 }
 0x346   : > { %8055 = vst [vmem:[#allocation73_spill] sm:$0xff] %v5482_v25  ;;  %v1061_v17 = vsel %vm1053_vm9, %v1036_v21, %v1052_v20  ;;  %v1069_v61 = vsel %vm1053_vm9, %v1052_v20, %v1036_v21  ;;  %v1091_v25 = vmul.f32 %v5212_v38, %v1060_v57  ;;  %v1130_v20 = vsel %vm1126_vm10, %v5274_v13, %v5322_v22  ;;  %v1017_v21 = vld [vmem:[%s7839_s6 + $0x20] sm:$0xff] }
 0x347   : > { %v1092_v32 = vmul.f32 %v5226_v49, %v1069_v61  ;;  %v1093_v55 = vmul.f32 %v5212_v38, %v1061_v17  ;;  %1562 = vrot.lane.b32.xlu0 %v5216_v39, %s4412_s17  ;;  %1607 = vperm.xlu1 %4156, %v1013_v12   ;;  %v1135_v61 = vsel %vm1126_vm10, %v5218_v26, %v5163_v60  ;;  %vm1645_vm9 = vcmask 523264  }
 0x348   : > { %v1152_v57 = vmul.f32 %v5470_v5, %v1127_v43  ;;  %v1153_v12 = vmul.f32 %v5504_v45, %v1136_v42  ;;  %v1129_v49 = vsel %vm1126_vm10, %v5268_v58, %v5308_v31  ;;  %v1138_v43 = vsel %vm1126_vm10, %v5322_v22, %v5274_v13 }
 0x349   : > { %v5518_v7 = vpop.permute.xlu0 %1327  ;;  %v3612_v17 = vpack.c.bf16 %v1093_v55, %v1091_v25  ;;  %v3614_v38 = vpack.c.bf16 %v1092_v32, %v1090_v53  ;;  %v1123_v59 = vpop.permute.xlu1 %1122  ;;  %v1158_v60 = vmul.f32 %v5470_v5, %v1130_v20  ;;  %v1151_v55 = vmul.f32 %v5504_v45, %v1135_v61  ;;  %v1016_v32 = vld [vmem:[%s7839_s6 + $0x18] sm:$0xff] }
 0x34a   : > { %v3616_v26 = vpack.c.bf16 %v1154_v27, %v1152_v57  ;;  %v1132_v25 = vsel %vm1126_vm10, %v5358_v11, %v5406_v52  ;;  %v1137_v13 = vsel %vm1126_vm10, %v5308_v31, %v5268_v58  ;;  %v1156_v22 = vmul.f32 %v5470_v5, %v1129_v49 }
 0x34b   : > { %1612 = vperm.xlu0 %4155, %v1014_v40   ;;  %3613 = vmatprep.subr.bf16.mxu1 %v3612_v17  ;;  %v1157_v42 = vmul.f32 %v5504_v45, %v1138_v43  ;;  %v1131_v27 = vsel %vm1126_vm10, %v5352_v54, %v5392_v34  ;;  %v3618_v40 = vpack.c.bf16 %v1153_v12, %v1151_v55 }
 0x34c   : > { %1617 = vperm.xlu1 %4156, %v1015_v37   ;;  %3615 = vmatpush1.bf16.msra.mxu1 %v3614_v38  ;;  %v1140_v31 = vsel %vm1126_vm10, %v5406_v52, %v5358_v11  ;;  %v1162_v58 = vmul.f32 %v5470_v5, %v1132_v25  ;;  %v3620_v61 = vpack.c.bf16 %v1158_v60, %v1156_v22  ;;  %v1018_v37 = vld [vmem:[%s7839_s6 + $0x28] sm:$0xff]  ;;  %v1019_v52 = vld [vmem:[%s7839_s6 + $0x30] sm:$0xff] }
 0x34d   : > { %v5546_v53 = vpop.permute.xlu0 %1388  ;;  %3617 = vmatprep.subr.bf16.mxu1 %v3616_v26  ;;  %v5556_v20 = vpop.permute.xlu1 %1195  ;;  %v1155_v57 = vmul.f32 %v5504_v45, %v1137_v13  ;;  %v1139_v17 = vsel %vm1126_vm10, %v5392_v34, %v5352_v54  ;;  %v1160_v38 = vmul.f32 %v5470_v5, %v1131_v27  ;;  %v1161_v12 = vmul.f32 %v5504_v45, %v1140_v31 }
 0x34e   : > { %v5583_v60 = vrot.slane %v5196_v15, %v4850_v50  ;;  %v1201_v34 = vsel %vm1199_vm11, %v5179_v62, %v5246_v2  ;;  %v1159_v26 = vmul.f32 %v5504_v45, %v1139_v17  ;;  %v1133_v55 = vsel %vm1126_vm10, %v5436_v47, %v1123_v59 }
 0x34f   : > { %1622 = vperm.xlu0 %4155, %v1016_v32   ;;  %v3622_v43 = vpack.c.bf16 %v1157_v42, %v1155_v57  ;;  %v3624_v54 = vpack.c.bf16 %v1162_v58, %v1160_v38  ;;  %v1141_v25 = vsel %vm1126_vm10, %v1123_v59, %v5436_v47  ;;  %v1020_v32 = vld [vmem:[%s7839_s6 + $0x38] sm:$0xff]  ;;  %v1200_v13 = vsel %vm1199_vm11, %v5173_v9, %v5239_v41 }
 0x350   : > { %1627 = vperm.xlu1 %4156, %v1017_v21   ;;  %3619 = vmatpush1.bf16.msra.mxu1 %v3618_v40  ;;  %v1209_v22 = vsel %vm1199_vm11, %v5246_v2, %v5179_v62  ;;  %v1227_v47 = vmul.f32 %v5583_v60, %v1201_v34  ;;  %v3626_v40 = vpack.c.bf16 %v1161_v12, %v1159_v26 }
 0x351   : > { %v5572_v11 = vpop.permute.xlu0 %1404  ;;  %3621 = vmatprep.subr.bf16.mxu1 %v3620_v61  ;;  %v5579_v49 = vpop.permute.xlu1 %1268  ;;  %v1163_v31 = vmul.f32 %v5504_v45, %v1141_v25  ;;  %v1164_v58 = vmul.f32 %v5470_v5, %v1133_v55  ;;  %v1219_v61 = vrot.slane %v5208_v33, %v4850_v50  ;;  %v1208_v57 = vsel %vm1199_vm11, %v5239_v41, %v5173_v9 }
 0x352   : > { %v1202_v50 = vsel %vm1199_vm11, %v5276_v19, %v5324_v30  ;;  %v1211_v12 = vsel %vm1199_vm11, %v5330_v63, %v5282_v56  ;;  %v1205_v34 = vsel %vm1199_vm11, %v5366_v51, %v5414_v14 }
 0x353   : > { %1632 = vperm.xlu0 %4155, %v1018_v37   ;;  %v1225_v37 = vmul.f32 %v5583_v60, %v1200_v13  ;;  %v1226_v38 = vmul.f32 %v1219_v61, %v1209_v22  ;;  %v1229_v26 = vmul.f32 %v5583_v60, %v1202_v50  ;;  %v1213_v13 = vsel %vm1199_vm11, %v5414_v14, %v5366_v51 }
 0x354   : > { %1637 = vperm.xlu1 %4156, %v1019_v52   ;;  %3623 = vmatpush1.bf16.msra.mxu1 %v3622_v43  ;;  %v1224_v43 = vmul.f32 %v1219_v61, %v1208_v57  ;;  %v1274_v14 = vsel %vm1272_vm12, %v5188_v10, %v5254_v44 }
 0x355   : > { %v1125_v21 = vpop.permute.xlu0 %1124  ;;  %3625 = vmatprep.subr.bf16.mxu1 %v3624_v54  ;;  %v5614_v27 = vpop.permute.xlu1 %1341  ;;  %v3632_v41 = vpack.c.bf16 %v1227_v47, %v1225_v37  ;;  %v1210_v54 = vsel %vm1199_vm11, %v5324_v30, %v5276_v19  ;;  %v1235_v30 = vmul.f32 %v5583_v60, %v1205_v34 }
 0x356   : > { %v1134_v59 = vsel %vm1126_vm10, %v5442_v6, %v1125_v21  ;;  %v1142_v42 = vsel %vm1126_vm10, %v1125_v21, %v5442_v6  ;;  %v1203_v6 = vsel %vm1199_vm11, %v5282_v56, %v5330_v63  ;;  %v1230_v56 = vmul.f32 %v1219_v61, %v1211_v12 }
 0x357   : > { %v1165_v62 = vmul.f32 %v5504_v45, %v1142_v42  ;;  %v1166_v2 = vmul.f32 %v5470_v5, %v1134_v59  ;;  %1642 = vperm.xlu0 %4155, %v1020_v32   ;;  %v1231_v9 = vmul.f32 %v5583_v60, %v1203_v6  ;;  %v1204_v63 = vsel %vm1199_vm11, %v5360_v28, %v5408_v16 }
 0x358   : > { %3627 = vmatpush1.bf16.msra.mxu1 %v3626_v40  ;;  %v3634_v32 = vpack.c.bf16 %v1226_v38, %v1224_v43  ;;  %v1228_v22 = vmul.f32 %v1219_v61, %v1210_v54  ;;  %v1212_v21 = vsel %vm1199_vm11, %v5408_v16, %v5360_v28  ;;  %v1233_v47 = vmul.f32 %v5583_v60, %v1204_v63 }
 0x359   : > { %v5631_v45 = vpop.permute.xlu0 %1392  ;;  %v3628_v5 = vpack.c.bf16 %v1166_v2, %v1164_v58  ;;  %v3630_v17 = vpack.c.bf16 %v1165_v62, %v1163_v31  ;;  %v5637_v52 = vpop.permute.xlu1 %1386  ;;  %v3636_v19 = vpack.c.bf16 %v1231_v9, %v1229_v26  ;;  %v1234_v42 = vmul.f32 %v1219_v61, %v1213_v13 }
 0x35a   : > { %v3638_v51 = vpack.c.bf16 %v1230_v56, %v1228_v22  ;;  %v3640_v31 = vpack.c.bf16 %v1235_v30, %v1233_v47  ;;  %v5682_v16 = vrot.slane %v5196_v15, %v4874_v3  ;;  %v1232_v28 = vmul.f32 %v1219_v61, %v1212_v21 }
 0x35b   : > { %3629 = vmatprep.subr.bf16.mxu1 %v3628_v5  ;;  %v1206_v58 = vsel %vm1199_vm11, %v5444_v4, %v5556_v20  ;;  %v1214_v62 = vsel %vm1199_vm11, %v5556_v20, %v5444_v4  ;;  %v1273_v2 = vsel %vm1272_vm12, %v5181_v1, %v5248_v8  ;;  %v1282_v6 = vsel %vm1272_vm12, %v5254_v44, %v5188_v10 }
 0x35c   : > { %3631 = vmatpush1.bf16.msra.mxu1 %v3630_v17  ;;  %v1300_v37 = vmul.f32 %v5682_v16, %v1274_v14  ;;  %v3642_v17 = vpack.c.bf16 %v1234_v42, %v1232_v28  ;;  %v1236_v38 = vmul.f32 %v1219_v61, %v1214_v62  ;;  %v1237_v50 = vmul.f32 %v5583_v60, %v1206_v58 }
 0x35d   : > { %v5653_v55 = vpop.permute.xlu0 %1408  ;;  %3633 = vmatprep.subr.bf16.mxu1 %v3632_v41  ;;  %v5659_v25 = vpop.permute.xlu1 %1402  ;;  %v1292_v44 = vrot.slane %v5208_v33, %v4874_v3  ;;  %v1276_v9 = vsel %vm1272_vm12, %v5290_v35, %v5338_v29  ;;  %v1298_v41 = vmul.f32 %v5682_v16, %v1273_v2  ;;  %v1275_v3 = vsel %vm1272_vm12, %v5284_v24, %v5332_v0  ;;  %v8057_v2 = vld [vmem:[#allocation71_spill] sm:$0xff] }
 0x35e   : > { %v1284_v26 = vsel %vm1272_vm12, %v5338_v29, %v5290_v35  ;;  %v1278_v63 = vsel %vm1272_vm12, %v5374_v46, %v5422_v18  ;;  %v1302_v13 = vmul.f32 %v5682_v16, %v1275_v3  ;;  %v8056_v29 = vld [vmem:[#allocation66_spill] sm:$0xff]  ;;  %v1286_v47 = vsel %vm1272_vm12, %v5422_v18, %v5374_v46 }
 0x35f   : > { %v1299_v34 = vmul.f32 %v1292_v44, %v1282_v6  ;;  %v1303_v35 = vmul.f32 %v1292_v44, %v1284_v26  ;;  %v1307_v28 = vmul.f32 %v1292_v44, %v1286_v47  ;;  %v1279_v6 = vsel %vm1272_vm12, %v8057_v2, %v5579_v49  ;;  %v973_v26 = vld [vmem:[#allocation10] sm:$0xff] }
 0x360   : > { %3635 = vmatpush1.bf16.msra.mxu1 %v3634_v32  ;;  %v1283_v32 = vsel %vm1272_vm12, %v5332_v0, %v5284_v24  ;;  %v1308_v24 = vmul.f32 %v5682_v16, %v1278_v63 }
 0x361   : > { %v5671_v59 = vpop.permute.xlu0 %1396  ;;  %3637 = vmatprep.subr.bf16.mxu1 %v3636_v19  ;;  %v5674_v40 = vpop.permute.xlu1 %1390  ;;  %v1277_v19 = vsel %vm1272_vm12, %v8056_v29, %v5416_v48  ;;  %v1301_v42 = vmul.f32 %v1292_v44, %v1283_v32  ;;  %v8063_v32 = vld [vmem:[#allocation48_spill] sm:$0xff] }
 0x362   : > { %v1306_v14 = vmul.f32 %v5682_v16, %v1277_v19 }
 0x363   : > { %v3654_v62 = vpack.c.bf16 %v1303_v35, %v1301_v42 }
 0x364   : > { %3639 = vmatpush1.bf16.msra.mxu1 %v3638_v51  ;;  %v1285_v51 = vsel %vm1272_vm12, %v5416_v48, %v8056_v29  ;;  %v3656_v46 = vpack.c.bf16 %v1308_v24, %v1306_v14  ;;  %v1287_v48 = vsel %vm1272_vm12, %v5579_v49, %v8057_v2  ;;  %v978_v29 = vld [vmem:[#allocation10 + $0x28] sm:$0xff] }
 0x365   : > { %v1198_v57 = vpop.permute.xlu0 %1197  ;;  %3641 = vmatprep.subr.bf16.mxu1 %v3640_v31  ;;  %v5707_v20 = vpop.permute.xlu1 %1406  ;;  %v1305_v18 = vmul.f32 %v1292_v44, %v1285_v51  ;;  %v8065_v24 = vld [vmem:[#allocation46_spill] sm:$0xff]  ;;  %v8068_v14 = vld [vmem:[#allocation61_spill] sm:$0xff] }
 0x366   : > { %v1207_v5 = vsel %vm1199_vm11, %v5450_v36, %v1198_v57  ;;  %v1215_v4 = vsel %vm1199_vm11, %v1198_v57, %v5450_v36  ;;  %v1281_v36 = vsel %vm1272_vm12, %v5248_v8, %v5181_v1  ;;  %v1304_v1 = vmul.f32 %v5682_v16, %v1276_v9  ;;  %v8067_v51 = vld [vmem:[#allocation58_spill] sm:$0xff]  ;;  %v8071_v2 = vld [vmem:[#allocation33_spill] sm:$0xff] }
 0x367   : > { %v1238_v12 = vmul.f32 %v1219_v61, %v1215_v4  ;;  %v1239_v10 = vmul.f32 %v5583_v60, %v1207_v5  ;;  %v3648_v8 = vpack.c.bf16 %v1300_v37, %v1298_v41  ;;  %v1297_v56 = vmul.f32 %v1292_v44, %v1281_v36  ;;  %v8058_v37 = vld [vmem:[#allocation72_spill] sm:$0xff] }
 0x368   : > { %3643 = vmatpush1.bf16.msra.mxu1 %v3642_v17  ;;  %v3652_v0 = vpack.c.bf16 %v1304_v1, %v1302_v13  ;;  %v8064_v13 = vld [vmem:[#allocation49_spill] sm:$0xff] }
 0x369   : > { %v5722_v43 = vpop.permute.xlu0 %1412  ;;  %v3644_v61 = vpack.c.bf16 %v1239_v10, %v1237_v50  ;;  %v3646_v60 = vpack.c.bf16 %v1238_v12, %v1236_v38  ;;  %v5728_v54 = vpop.permute.xlu1 %1394  ;;  %v3650_v21 = vpack.c.bf16 %v1299_v34, %v1297_v56  ;;  %v3658_v38 = vpack.c.bf16 %v1307_v28, %v1305_v18  ;;  %v8060_v34 = vld [vmem:[#allocation45_spill] sm:$0xff] }
 0x36a   : > { %v1309_v50 = vmul.f32 %v1292_v44, %v1287_v48  ;;  %v1310_v12 = vmul.f32 %v5682_v16, %v1279_v6  ;;  %v3668_v35 = vpack.c.bf16 %v8064_v13, %v8063_v32  ;;  %v1355_v28 = vsel %vm1345_vm14, %v8068_v14, %v8067_v51  ;;  %v5810_v48 = vld [vmem:[#allocation7 + $0x10] ss:$0 sm:$0xff] }
 0x36b   : > { %3645 = vmatprep.subr.bf16.mxu1 %v3644_v61  ;;  %v5808_v6 = vrot.slane %v5196_v15, %v8071_v2 }
 0x36c   : > { %3647 = vmatpush1.bf16.msra.mxu1 %v3646_v60  ;;  %v8059_v60 = vld [vmem:[#allocation44_spill] sm:$0xff] }
 0x36d   : > { %v5744_v30 = vpop.permute.xlu0 %1400  ;;  %3649 = vmatprep.subr.bf16.mxu1 %v3648_v8  ;;  %v5750_v22 = vpop.permute.xlu1 %1410  ;;  %v3664_v3 = vpack.c.bf16 %v8060_v34, %v8059_v60  ;;  %v979_v8 = vld [vmem:[#allocation10 + $0x30] sm:$0xff] }
 0x370   : > { %3651 = vmatpush1.bf16.msra.mxu1 %v3650_v21  ;;  %v984_v21 = vld [vmem:[#allocation10 + $0x58] sm:$0xff] }
 0x371   : > { %v5762_v31 = vpop.permute.xlu0 %1461  ;;  %3653 = vmatprep.subr.bf16.mxu1 %v3652_v0  ;;  %v5764_v58 = vpop.permute.xlu1 %1398  ;;  %v8066_v0 = vld [vmem:[#allocation47_spill] sm:$0xff] }
 0x372   : > { %v3670_v42 = vpack.c.bf16 %v8066_v0, %v8065_v24 }
 0x374   : > { %3655 = vmatpush1.bf16.msra.mxu1 %v3654_v62  ;;  %v8069_v62 = vld [vmem:[#allocation52_spill] sm:$0xff] }
 0x375   : > { %v1271_v57 = vpop.permute.xlu0 %1270  ;;  %3657 = vmatprep.subr.bf16.mxu1 %v3656_v46  ;;  %v5780_v17 = vpop.permute.xlu1 %1414  ;;  %v8070_v46 = vld [vmem:[#allocation53_spill] sm:$0xff] }
 0x376   : > { %v1280_v5 = vsel %vm1272_vm12, %v8058_v37, %v1271_v57  ;;  %v1288_v4 = vsel %vm1272_vm12, %v1271_v57, %v8058_v37  ;;  %v3672_v18 = vpack.c.bf16 %v8070_v46, %v8069_v62  ;;  %v983_v37 = vld [vmem:[#allocation10 + $0x50] sm:$0xff] }
 0x377   : > { %v1311_v10 = vmul.f32 %v1292_v44, %v1288_v4  ;;  %v1312_v49 = vmul.f32 %v5682_v16, %v1280_v5  ;;  %v8061_v44 = vld [vmem:[#allocation42_spill] sm:$0xff]  ;;  %v8062_v16 = vld [vmem:[#allocation43_spill] sm:$0xff]  ;;  %v5816_v5 = vrot.slane %v5208_v33, %v8071_v2 }
 0x378   : > { %3659 = vmatpush1.bf16.msra.mxu1 %v3658_v38  ;;  %v3666_v63 = vpack.c.bf16 %v8062_v16, %v8061_v44  ;;  %v5818_v4 = vld [vmem:[#allocation7 + $0x18] ss:$0 sm:$0xff] }
 0x379   : > { %v5784_v9 = vpop.permute.xlu0 %1477  ;;  %v3660_v36 = vpack.c.bf16 %v1312_v49, %v1310_v12  ;;  %v3662_v41 = vpack.c.bf16 %v1311_v10, %v1309_v50  ;;  %v5786_v61 = vpop.permute.xlu1 %1459  ;;  %v8072_v12 = vld [vmem:[#allocation50_spill] sm:$0xff]  ;;  %v8073_v10 = vld [vmem:[#allocation51_spill] sm:$0xff] }
 0x37a   : > { %v3674_v49 = vpack.c.bf16 %v8073_v10, %v8072_v12 }
 0x37b   : > { %3661 = vmatprep.subr.bf16.mxu1 %v3660_v36  ;;  %v989_v36 = vld [vmem:[#allocation10 + $0x80] sm:$0xff] }
 0x37c   : > { %3663 = vmatpush1.bf16.msra.mxu1 %v3662_v41  ;;  %v8074_v41 = vld [vmem:[#allocation56_spill] sm:$0xff] }
 0x37d   : > { %v1535_v1 = vpop.permute.xlu0 %1534  ;;  %3665 = vmatprep.subr.bf16.mxu1 %v3664_v3  ;;  %v5790_v56 = vpop.permute.xlu1 %1475  ;;  %v8075_v3 = vld [vmem:[#allocation60_spill] sm:$0xff] }
 0x37f   : > { %1735 = vmatmul.mubr.f32.vlgmr.msra.gmra.mrb[0].mxu1 %v973_v26  ;;  %v1354_v26 = vsel %vm1345_vm14, %v8075_v3, %v8074_v41 }
 0x380   : > { %3667 = vmatpush1.bf16.msra.mxu1 %v3666_v63  ;;  %1740 = vmatprep.mubr.f32.mxu1 %v979_v8  ;;  %v1347_v8 = vsel %vm1345_vm14, %v8067_v51, %v8068_v14  ;;  %v1373_v63 = vmul.f32 %v5808_v6, %v1355_v28 }
 0x381   : > { %v1551_v19 = vpop.permute.xlu0 %1550  ;;  %3669 = vmatprep.subr.bf16.mxu1 %v3668_v35  ;;  %v1533_v47 = vpop.permute.xlu1 %1532  ;;  %v8076_v35 = vld [vmem:[#allocation57_spill] sm:$0xff] }
 0x382   : > { %v1566_v57 = vsel %vm1564_vm13, %v1535_v1, %v1551_v19  ;;  %v1574_v38 = vsel %vm1564_vm13, %v1551_v19, %v1535_v1  ;;  %v8077_v19 = vld [vmem:[#allocation63_spill] sm:$0xff] }
 0x383   : > { %1741 = vmatmul.mubr.f32.gmra.mrb[2].mxu1 %v978_v29  ;;  %v3676_v29 = vpack.c.bf16 %v5216_v39, %v8076_v35  ;;  %v1592_v51 = vmul.f32 %v5818_v4, %v1574_v38  ;;  %v988_v39 = vld [vmem:[#allocation10 + $0x78] sm:$0xff]  ;;  %v1371_v35 = vmul.f32 %v5808_v6, %v1354_v26 }
 0x384   : > { %3671 = vmatpush1.bf16.msra.mxu1 %v3670_v42  ;;  %1746 = vmatprep.mubr.f32.mxu1 %v984_v21  ;;  %v8078_v21 = vld [vmem:[#allocation65_spill] sm:$0xff] }
 0x385   : > { %v5822_v50 = vpop.permute.xlu0 %1465  ;;  %3673 = vmatprep.subr.bf16.mxu1 %v3672_v18  ;;  %v1549_v1 = vpop.permute.xlu1 %1548  ;;  %v1357_v42 = vsel %vm1345_vm14, %v8078_v21, %v8077_v19  ;;  %v1591_v18 = vmul.f32 %v5810_v48, %v1566_v57  ;;  %v1346_v57 = vsel %vm1345_vm14, %v8074_v41, %v8075_v3  ;;  %v1349_v41 = vsel %vm1345_vm14, %v8077_v19, %v8078_v21 }
 0x386   : > { %v1565_v2 = vsel %vm1564_vm13, %v1533_v47, %v1549_v1  ;;  %v1573_v46 = vsel %vm1564_vm13, %v1549_v1, %v1533_v47  ;;  %v8079_v47 = vld [vmem:[#allocation54_spill] sm:$0xff]  ;;  %v1372_v1 = vmul.f32 %v5816_v5, %v1347_v8  ;;  %v1377_v3 = vmul.f32 %v5808_v6, %v1357_v42 }
 0x387   : > { %1747 = vmatmul.mubr.f32.gmra.mrb[4].mxu1 %v983_v37  ;;  %v1589_v14 = vmul.f32 %v5810_v48, %v1565_v2  ;;  %v1590_v28 = vmul.f32 %v5818_v4, %v1573_v46  ;;  %v8080_v37 = vld [vmem:[#allocation55_spill] sm:$0xff]  ;;  %v8081_v2 = vld [vmem:[#allocation62_spill] sm:$0xff]  ;;  %v8082_v46 = vld [vmem:[#allocation64_spill] sm:$0xff]  ;;  %v3680_v26 = vpack.c.bf16 %v1373_v63, %v1371_v35  ;;  %v1370_v8 = vmul.f32 %v5816_v5, %v1346_v57 }
 0x388   : > { %3675 = vmatpush1.bf16.msra.mxu1 %v3674_v49  ;;  %1752 = vmatprep.mubr.f32.mxu1 %v989_v36  ;;  %v3678_v38 = vpack.c.bf16 %v8080_v37, %v8079_v47  ;;  %v1356_v49 = vsel %vm1345_vm14, %v8082_v46, %v8081_v2  ;;  %v8083_v37 = vld [vmem:[#allocation68_spill] sm:$0xff]  ;;  %v8084_v47 = vld [vmem:[#allocation70_spill] sm:$0xff]  ;;  %v1348_v19 = vsel %vm1345_vm14, %v8081_v2, %v8082_v46 }
 0x389   : > { %v5854_v62 = vpop.permute.xlu0 %1481  ;;  %3677 = vmatprep.subr.bf16.mxu1 %v3676_v29  ;;  %v3730_v36 = vpack.c.bf16 %v1591_v18, %v1589_v14  ;;  %v5863_v10 = vpop.permute.xlu1 %1463  ;;  %v3728_v12 = vpack.c.bf16 %v1592_v51, %v1590_v28  ;;  %v994_v29 = vld [vmem:[#allocation10 + $0xa8] sm:$0xff]  ;;  %v1359_v18 = vsel %vm1345_vm14, %v8084_v47, %v8083_v37  ;;  %v993_v51 = vld [vmem:[#allocation10 + $0xa0] sm:$0xff]  ;;  %v1375_v21 = vmul.f32 %v5808_v6, %v1356_v49  ;;  %v999_v35 = vld [vmem:[#allocation10 + $0xd0] sm:$0xff] }
 0x38a   : > { %v3682_v42 = vpack.c.bf16 %v1372_v1, %v1370_v8  ;;  %v8085_v14 = vld [vmem:[#allocation67_spill] sm:$0xff]  ;;  %v8086_v28 = vld [vmem:[#allocation69_spill] sm:$0xff]  ;;  %v1374_v1 = vmul.f32 %v5816_v5, %v1348_v19  ;;  %v1427_v19 = vsel %vm1418_vm15, %v5659_v25, %v5637_v52 }
 0x38b   : > { %1753 = vmatmul.mubr.f32.gmra.mrb[6].mxu1 %v988_v39  ;;  %3729 = vmatprep.subr.bf16.mxu0 %v3728_v12  ;;  %v1351_v39 = vsel %vm1345_vm14, %v8083_v37, %v8084_v47  ;;  %v1376_v12 = vmul.f32 %v5816_v5, %v1349_v41  ;;  %v1358_v57 = vsel %vm1345_vm14, %v8086_v28, %v8085_v14  ;;  %v998_v49 = vld [vmem:[#allocation10 + $0xc8] sm:$0xff] }
 0x38c   : > { %3679 = vmatpush1.bf16.msra.mxu1 %v3678_v38  ;;  %3731 = vmatpush1.bf16.msra.mxu0 %v3730_v36  ;;  %v1350_v47 = vsel %vm1345_vm14, %v8085_v14, %v8086_v28  ;;  %v1381_v37 = vmul.f32 %v5808_v6, %v1359_v18  ;;  %v3684_v2 = vpack.c.bf16 %v1377_v3, %v1375_v21  ;;  %v8087_v41 = vld [vmem:[#allocation73_spill] sm:$0xff]  ;;  %v1004_v3 = vld [vmem:[#allocation10 + $0xf8] sm:$0xff] }
 0x38d   : > { %v1539_v63 = vpop.permute.xlu0 %1538  ;;  %3681 = vmatprep.subr.bf16.mxu1 %v3680_v26  ;;  %v5889_v38 = vpop.permute.xlu1 %1479  ;;  %1758 = vmatprep.mubr.f32.mxu1 %v994_v29  ;;  %v1380_v46 = vmul.f32 %v5816_v5, %v1351_v39  ;;  %v1379_v36 = vmul.f32 %v5808_v6, %v1358_v57  ;;  %v1352_v26 = vsel %vm1345_vm14, %v8087_v41, %v5614_v27  ;;  %v8088_v39 = vld [vmem:[#allocation36_spill] sm:$0xff] }
 0x38e   : > { %v3686_v8 = vpack.c.bf16 %v1376_v12, %v1374_v1  ;;  %v1378_v18 = vmul.f32 %v5816_v5, %v1350_v47  ;;  %v1428_v28 = vsel %vm1418_vm15, %v5572_v11, %v5546_v53  ;;  %v1382_v57 = vmul.f32 %v5816_v5, %v1352_v26 }
 0x38f   : > { %1759 = vmatmul.mubr.f32.gmra.mrb[8].mxu1 %v993_v51  ;;  %v1360_v51 = vsel %vm1345_vm14, %v5614_v27, %v8087_v41  ;;  %v3688_v14 = vpack.c.bf16 %v1381_v37, %v1379_v36 }
 0x390   : > { %3683 = vmatpush1.bf16.msra.mxu1 %v3682_v42  ;;  %1764 = vmatprep.mubr.f32.mxu1 %v999_v35  ;;  %v5915_v35 = vrot.slane %v5208_v33, %v8088_v39  ;;  %v5919_v42 = vrot.slane %v5196_v15, %v8088_v39  ;;  %v3690_v27 = vpack.c.bf16 %v1380_v46, %v1378_v18  ;;  %v1003_v33 = vld [vmem:[#allocation10 + $0xf0] sm:$0xff]  ;;  %v1009_v46 = vld [vmem:[#allocation10 + $0x120] sm:$0xff] }
 0x391   : > { %v1555_v29 = vpop.permute.xlu0 %1554  ;;  %3685 = vmatprep.subr.bf16.mxu1 %v3684_v2  ;;  %v1537_v21 = vpop.permute.xlu1 %1536  ;;  %v1383_v47 = vmul.f32 %v5808_v6, %v1360_v51  ;;  %v1419_v15 = vsel %vm1418_vm15, %v5637_v52, %v5659_v25 }
 0x392   : > { %v1568_v12 = vsel %vm1564_vm13, %v1539_v63, %v1555_v29  ;;  %v1444_v37 = vmul.f32 %v5919_v42, %v1427_v19  ;;  %v1576_v2 = vsel %vm1564_vm13, %v1555_v29, %v1539_v63 }
 0x393   : > { %1765 = vmatmul.mubr.f32.gmra.mrb[10].mxu1 %v998_v49  ;;  %v1429_v49 = vsel %vm1418_vm15, %v5707_v20, %v5674_v40  ;;  %v1595_v36 = vmul.f32 %v5810_v48, %v1568_v12  ;;  %v1430_v12 = vsel %vm1418_vm15, %v5653_v55, %v5631_v45 }
 0x394   : > { %3687 = vmatpush1.bf16.msra.mxu1 %v3686_v8  ;;  %1770 = vmatprep.mubr.f32.mxu1 %v1004_v3  ;;  %v1596_v8 = vmul.f32 %v5818_v4, %v1576_v2 }
 0x395   : > { %v1344_v1 = vpop.permute.xlu0 %1343  ;;  %3689 = vmatprep.subr.bf16.mxu1 %v3688_v14  ;;  %v1553_v25 = vpop.permute.xlu1 %1552  ;;  %v1443_v14 = vmul.f32 %v5915_v35, %v1419_v15  ;;  %v1431_v15 = vsel %vm1418_vm15, %v5750_v22, %v5728_v54 }
 0x396   : > { %v1353_v41 = vsel %vm1345_vm14, %v5518_v7, %v1344_v1  ;;  %v1361_v52 = vsel %vm1345_vm14, %v1344_v1, %v5518_v7  ;;  %v1567_v29 = vsel %vm1564_vm13, %v1537_v21, %v1553_v25  ;;  %v1575_v3 = vsel %vm1564_vm13, %v1553_v25, %v1537_v21  ;;  %v1008_v7 = vld [vmem:[#allocation10 + $0x118] sm:$0xff] }
 0x397   : > { %v1384_v63 = vmul.f32 %v5816_v5, %v1353_v41  ;;  %v1385_v26 = vmul.f32 %v5808_v6, %v1361_v52  ;;  %1771 = vmatmul.mubr.f32.gmra.mrb[12].mxu1 %v1003_v33  ;;  %v1593_v18 = vmul.f32 %v5810_v48, %v1567_v29  ;;  %v1594_v51 = vmul.f32 %v5818_v4, %v1575_v3  ;;  %v4165_v29 = vld [vmem:[#allocation7 + $0x8] sm:$0xff]  ;;  %v8089_v3 = vld [vmem:[#allocation39_spill] sm:$0xff] }
 0x398   : > { %3691 = vmatpush1.bf16.msra.mxu1 %v3690_v27  ;;  %1776 = vmatprep.mubr.f32.mxu1 %v1009_v46  ;;  %v1420_v6 = vsel %vm1418_vm15, %v5546_v53, %v5572_v11  ;;  %v1446_v5 = vmul.f32 %v5919_v42, %v1428_v28  ;;  %v1421_v53 = vsel %vm1418_vm15, %v5674_v40, %v5707_v20 }
 0x399   : > { %v3694_v19 = vpack.c.bf16 %v1384_v63, %v1382_v57  ;;  %v5961_v39 = vpop.permute.xlu0 %1469  ;;  %v3692_v21 = vpack.c.bf16 %v1385_v26, %v1383_v47  ;;  %v3734_v27 = vpack.c.bf16 %v1595_v36, %v1593_v18  ;;  %v5968_v33 = vpop.permute.xlu1 %1467  ;;  %v3732_v2 = vpack.c.bf16 %v1596_v8, %v1594_v51  ;;  %v976_v57 = vld [vmem:[#allocation10 + $0x18] sm:$0xff] }
 0x39a   : > { %v1448_v11 = vmul.f32 %v5919_v42, %v1429_v49  ;;  %v3696_v28 = vpack.c.bf16 %v1446_v5, %v1444_v37  ;;  %v1445_v47 = vmul.f32 %v5915_v35, %v1420_v6  ;;  %v1422_v40 = vsel %vm1418_vm15, %v5631_v45, %v5653_v55 }
 0x39b   : > { %3693 = vmatprep.subr.bf16.mxu1 %v3692_v21  ;;  %1777 = vmatmul.mubr.f32.gmra.mrb[14].mxu1 %v1008_v7  ;;  %v1450_v20 = vmul.f32 %v5919_v42, %v1430_v12  ;;  %v1447_v46 = vmul.f32 %v5915_v35, %v1421_v53  ;;  %v1432_v49 = vsel %vm1418_vm15, %v5722_v43, %v5671_v59  ;;  %v4166_v21 = vld [vmem:[#allocation7] sm:$0xff] }
 0x39c   : > { %3733 = vmatprep.subr.bf16.mxu0 %v3732_v2  ;;  %3695 = vmatpush1.bf16.msra.mxu1 %v3694_v19  ;;  %v3698_v1 = vpack.c.bf16 %v1445_v47, %v1443_v14  ;;  %v1423_v36 = vsel %vm1418_vm15, %v5728_v54, %v5750_v22  ;;  %v1452_v55 = vmul.f32 %v5919_v42, %v1431_v15 }
 0x39d   : > { %3735 = vmatpush1.bf16.msra.mxu0 %v3734_v27  ;;  %v5985_v37 = vpop.permute.xlu0 %1485  ;;  %3697 = vmatprep.subr.bf16.mxu1 %v3696_v28  ;;  %v5996_v45 = vpop.permute.xlu1 %1483  ;;  %v3700_v41 = vpack.c.bf16 %v1450_v20, %v1448_v11  ;;  %v1449_v52 = vmul.f32 %v5915_v35, %v1422_v40  ;;  %v1424_v25 = vsel %vm1418_vm15, %v5671_v59, %v5722_v43 }
 0x39e   : > { %1847 = vmatprep.mubr.f32.mxu1 %v976_v57  ;;  %v1454_v63 = vmul.f32 %v5919_v42, %v1432_v49  ;;  %v1451_v26 = vmul.f32 %v5915_v35, %v1423_v36  ;;  %v6008_v8 = vrot.slane %v4165_v29, %v8089_v3  ;;  %v1500_v18 = vsel %vm1491_vm0, %v5790_v56, %v5786_v61 }
 0x39f   : > { %v3702_v22 = vpack.c.bf16 %v1449_v52, %v1447_v46  ;;  %v1453_v43 = vmul.f32 %v5915_v35, %v1424_v25  ;;  %v1425_v51 = vsel %vm1418_vm15, %v5764_v58, %v5780_v17  ;;  %v1433_v7 = vsel %vm1418_vm15, %v5780_v17, %v5764_v58 }
 0x3a0   : > { %3699 = vmatpush1.bf16.msra.mxu1 %v3698_v1  ;;  %v3704_v6 = vpack.c.bf16 %v1454_v63, %v1452_v55  ;;  %v1501_v5 = vsel %vm1491_vm0, %v5784_v9, %v5762_v31  ;;  %v6028_v12 = vrot.slane %v4166_v21, %v8089_v3  ;;  %v1492_v14 = vsel %vm1491_vm0, %v5786_v61, %v5790_v56 }
 0x3a1   : > { %v1543_v54 = vpop.permute.xlu0 %1542  ;;  %3701 = vmatprep.subr.bf16.mxu1 %v3700_v41  ;;  %v1541_v59 = vpop.permute.xlu1 %1540  ;;  %v3706_v19 = vpack.c.bf16 %v1453_v43, %v1451_v26  ;;  %v1517_v27 = vmul.f32 %v6008_v8, %v1500_v18  ;;  %v1455_v17 = vmul.f32 %v5915_v35, %v1425_v51  ;;  %v1456_v2 = vmul.f32 %v5919_v42, %v1433_v7 }
 0x3a2   : > { %v1519_v57 = vmul.f32 %v6008_v8, %v1501_v5  ;;  %v1502_v61 = vsel %vm1491_vm0, %v5889_v38, %v5863_v10  ;;  %v1493_v15 = vsel %vm1491_vm0, %v5762_v31, %v5784_v9  ;;  %v1516_v40 = vmul.f32 %v6028_v12, %v1492_v14 }
 0x3a3   : > { %v1494_v31 = vsel %vm1491_vm0, %v5863_v10, %v5889_v38  ;;  %v1521_v9 = vmul.f32 %v6008_v8, %v1502_v61  ;;  %v1518_v10 = vmul.f32 %v6028_v12, %v1493_v15  ;;  %v1495_v29 = vsel %vm1491_vm0, %v5822_v50, %v5854_v62 }
 0x3a4   : > { %3703 = vmatpush1.bf16.msra.mxu1 %v3702_v22  ;;  %v3712_v49 = vpack.c.bf16 %v1519_v57, %v1517_v27  ;;  %v1505_v22 = vsel %vm1491_vm0, %v5985_v37, %v5961_v39  ;;  %v1520_v51 = vmul.f32 %v6028_v12, %v1494_v31  ;;  %v1497_v5 = vsel %vm1491_vm0, %v5961_v39, %v5985_v37 }
 0x3a5   : > { %v1417_v58 = vpop.permute.xlu0 %1416  ;;  %3705 = vmatprep.subr.bf16.mxu1 %v3704_v6  ;;  %v1557_v28 = vpop.permute.xlu1 %1556  ;;  %v3714_v43 = vpack.c.bf16 %v1518_v10, %v1516_v40  ;;  %v1522_v21 = vmul.f32 %v6028_v12, %v1495_v29  ;;  %v991_v10 = vld [vmem:[#allocation10 + $0x90] sm:$0xff] }
 0x3a6   : > { %v1426_v53 = vsel %vm1418_vm15, %v5744_v30, %v1417_v58  ;;  %v1434_v11 = vsel %vm1418_vm15, %v1417_v58, %v5744_v30  ;;  %v1569_v30 = vsel %vm1564_vm13, %v1541_v59, %v1557_v28  ;;  %v1577_v20 = vsel %vm1564_vm13, %v1557_v28, %v1541_v59  ;;  %v995_v29 = vld [vmem:[#allocation10 + $0xb0] sm:$0xff] }
 0x3a7   : > { %v1457_v56 = vmul.f32 %v5915_v35, %v1426_v53  ;;  %v1458_v47 = vmul.f32 %v5919_v42, %v1434_v11  ;;  %v1503_v35 = vsel %vm1491_vm0, %v5854_v62, %v5822_v50  ;;  %v1597_v52 = vmul.f32 %v5810_v48, %v1569_v30 }
 0x3a8   : > { %3707 = vmatpush1.bf16.msra.mxu1 %v3706_v19  ;;  %v1598_v25 = vmul.f32 %v5818_v4, %v1577_v20  ;;  %v1523_v38 = vmul.f32 %v6008_v8, %v1503_v35  ;;  %v1527_v19 = vmul.f32 %v6008_v8, %v1505_v22  ;;  %v1496_v62 = vsel %vm1491_vm0, %v5968_v33, %v5996_v45  ;;  %v987_v22 = vld [vmem:[#allocation10 + $0x70] sm:$0xff] }
 0x3a9   : > { %v3710_v42 = vpack.c.bf16 %v1457_v56, %v1455_v17  ;;  %v1559_v1 = vpop.permute.xlu0 %1558  ;;  %v3708_v46 = vpack.c.bf16 %v1458_v47, %v1456_v2  ;;  %v1472_v41 = vpop.permute.xlu1 %1471  ;;  %v3718_v27 = vpack.c.bf16 %v1522_v21, %v1520_v51  ;;  %v1526_v58 = vmul.f32 %v6028_v12, %v1497_v5  ;;  %v1006_v51 = vld [vmem:[#allocation10 + $0x108] sm:$0xff]  ;;  %v1011_v5 = vld [vmem:[#allocation10 + $0x130] sm:$0xff] }
 0x3aa   : > { %v1570_v36 = vsel %vm1564_vm13, %v1543_v54, %v1559_v1  ;;  %v1578_v55 = vsel %vm1564_vm13, %v1559_v1, %v1543_v54  ;;  %v1504_v54 = vsel %vm1491_vm0, %v5996_v45, %v5968_v33  ;;  %v3716_v6 = vpack.c.bf16 %v1523_v38, %v1521_v9  ;;  %v975_v9 = vld [vmem:[#allocation10 + $0x10] sm:$0xff]  ;;  %v990_v38 = vld [vmem:[#allocation10 + $0x88] sm:$0xff] }
 0x3ab   : > { %v1599_v63 = vmul.f32 %v5810_v48, %v1570_v36  ;;  %v1600_v26 = vmul.f32 %v5818_v4, %v1578_v55  ;;  %3709 = vmatprep.subr.bf16.mxu1 %v3708_v46  ;;  %v1525_v50 = vmul.f32 %v6008_v8, %v1504_v54  ;;  %v1524_v39 = vmul.f32 %v6028_v12, %v1496_v62  ;;  %v996_v54 = vld [vmem:[#allocation10 + $0xb8] sm:$0xff]  ;;  %v1007_v62 = vld [vmem:[#allocation10 + $0x110] sm:$0xff] }
 0x3ac   : > { %3711 = vmatpush1.bf16.msra.mxu1 %v3710_v42 }
 0x3ad   : > { %v3738_v3 = vpack.c.bf16 %v1599_v63, %v1597_v52  ;;  %v1474_v18 = vpop.permute.xlu0 %1473  ;;  %3713 = vmatprep.subr.bf16.mxu1 %v3712_v49  ;;  %v3736_v59 = vpack.c.bf16 %v1600_v26, %v1598_v25  ;;  %v1488_v7 = vpop.permute.xlu1 %1487  ;;  %v3720_v17 = vpack.c.bf16 %v1527_v19, %v1525_v50  ;;  %v3722_v53 = vpack.c.bf16 %v1526_v58, %v1524_v39  ;;  %v980_v52 = vld [vmem:[#allocation10 + $0x38] sm:$0xff]  ;;  %v977_v25 = vld [vmem:[#allocation10 + $0x20] sm:$0xff]  ;;  %v986_v63 = vld [vmem:[#allocation10 + $0x68] sm:$0xff] }
 0x3ae   : > { %v1498_v2 = vsel %vm1491_vm0, %v1472_v41, %v1488_v7  ;;  %v1506_v33 = vsel %vm1491_vm0, %v1488_v7, %v1472_v41  ;;  %v981_v41 = vld [vmem:[#allocation10 + $0x40] sm:$0xff]  ;;  %v982_v26 = vld [vmem:[#allocation10 + $0x48] sm:$0xff]  ;;  %v1012_v50 = vld [vmem:[#allocation10 + $0x138] sm:$0xff] }
 0x3af   : > { %3737 = vmatprep.subr.bf16.mxu0 %v3736_v59  ;;  %v1528_v61 = vmul.f32 %v6028_v12, %v1498_v2  ;;  %v1529_v56 = vmul.f32 %v6008_v8, %v1506_v33  ;;  %v1000_v59 = vld [vmem:[#allocation10 + $0xd8] sm:$0xff]  ;;  %v1005_v7 = vld [vmem:[#allocation10 + $0x100] sm:$0xff]  ;;  %v1010_v19 = vld [vmem:[#allocation10 + $0x128] sm:$0xff] }
 0x3b0   : > { %3715 = vmatpush1.bf16.msra.mxu1 %v3714_v43  ;;  %3739 = vmatpush1.bf16.msra.mxu0 %v3738_v3  ;;  %v992_v3 = vld [vmem:[#allocation10 + $0x98] sm:$0xff]  ;;  %v997_v43 = vld [vmem:[#allocation10 + $0xc0] sm:$0xff] }
 0x3b1   : > { %v1547_v14 = vpop.permute.xlu0 %1546  ;;  %3717 = vmatprep.subr.bf16.mxu1 %v3716_v6  ;;  %v1545_v37 = vpop.permute.xlu1 %1544  ;;  %v1002_v6 = vld [vmem:[#allocation10 + $0xe8] sm:$0xff] }
 0x3b4   : > { %3719 = vmatpush1.bf16.msra.mxu1 %v3718_v27 }
 0x3b5   : > { %v1490_v45 = vpop.permute.xlu0 %1489  ;;  %3721 = vmatprep.subr.bf16.mxu1 %v3720_v17  ;;  %v1561_v57 = vpop.permute.xlu1 %1560 }
 0x3b6   : > { %v1499_v11 = vsel %vm1491_vm0, %v1474_v18, %v1490_v45  ;;  %v1507_v28 = vsel %vm1491_vm0, %v1490_v45, %v1474_v18  ;;  %v1571_v40 = vsel %vm1564_vm13, %v1545_v37, %v1561_v57  ;;  %v1579_v30 = vsel %vm1564_vm13, %v1561_v57, %v1545_v37  ;;  %v1001_v18 = vld [vmem:[#allocation10 + $0xe0] sm:$0xff] }
 0x3b7   : > { %v1530_v47 = vmul.f32 %v6028_v12, %v1499_v11  ;;  %v1531_v15 = vmul.f32 %v6008_v8, %v1507_v28  ;;  %v1601_v12 = vmul.f32 %v5810_v48, %v1571_v40  ;;  %v1602_v8 = vmul.f32 %v5818_v4, %v1579_v30 }
 0x3b8   : > { %3723 = vmatpush1.bf16.msra.mxu1 %v3722_v53 }
 0x3b9   : > { %v3726_v20 = vpack.c.bf16 %v1530_v47, %v1528_v61  ;;  %v1563_v35 = vpop.permute.xlu0 %1562  ;;  %v3724_v42 = vpack.c.bf16 %v1531_v15, %v1529_v56 }
 0x3ba   : > { %v1572_v1 = vsel %vm1564_vm13, %v1547_v14, %v1563_v35  ;;  %v1580_v46 = vsel %vm1564_vm13, %v1563_v35, %v1547_v14 }
 0x3bb   : > { %v1603_v49 = vmul.f32 %v5810_v48, %v1572_v1  ;;  %v1604_v31 = vmul.f32 %v5818_v4, %v1580_v46  ;;  %3725 = vmatprep.subr.bf16.mxu1 %v3724_v42  ;;  %v8090_v48 = vmov 0.0   ;;  %v985_v4 = vld [vmem:[#allocation10 + $0x60] sm:$0xff] }
 0x3bc   : > { %3727 = vmatpush1.bf16.msra.mxu1 %v3726_v20 }
 0x3bd   : > { %v3742_v36 = vpack.c.bf16 %v1603_v49, %v1601_v12  ;;  %v3740_v55 = vpack.c.bf16 %v1604_v31, %v1602_v8 }
 0x3bf   : > { %1848 = vmatmul.mubr.f32.vlgmr.msra.gmra.mrb[0].mxu1 %v975_v9  ;;  %3741 = vmatprep.subr.bf16.mxu0 %v3740_v55 }
 0x3c0   : > { %3743 = vmatpush1.bf16.msra.mxu0 %v3742_v36  ;;  %1853 = vmatprep.mubr.f32.mxu1 %v981_v41 }
 0x3c3   : > { %1854 = vmatmul.mubr.f32.gmra.mrb[2].mxu1 %v980_v52  ;;  %3543 = vmatmul.mubr.msk.f32.vlgmr.msra.gmra.mrb[16].mxu0 %vm1645_vm9, %v977_v25 }
 0x3c4   : > { %1966 = vmatprep.mubr.f32.mxu0 %v8090_v48  ;;  %1859 = vmatprep.mubr.f32.mxu1 %v986_v63 }
 0x3c6   : > { %v1608_v27 = vpop.permute.xlu1 %1607 }
 0x3c7   : > { %1860 = vmatmul.mubr.f32.gmra.mrb[4].mxu1 %v985_v4  ;;  %3544 = vmatmul.mubr.msk.f32.gmra.mrb[18].mxu0 %vm1645_vm9, %v982_v26 }
 0x3c8   : > { %1972 = vmatprep.mubr.f32.mxu0 %v8090_v48  ;;  %1865 = vmatprep.mubr.f32.mxu1 %v991_v10 }
 0x3ca   : > { %v1613_v53 = vpop.permute.xlu0 %1612 }
 0x3cb   : > { %1866 = vmatmul.mubr.f32.gmra.mrb[6].mxu1 %v990_v38  ;;  %3545 = vmatmul.mubr.msk.f32.gmra.mrb[20].mxu0 %vm1645_vm9, %v987_v22  ;;  %v1618_v20 = vpop.permute.xlu1 %1617 }
 0x3cc   : > { %1978 = vmatprep.mubr.f32.mxu0 %v8090_v48  ;;  %1871 = vmatprep.mubr.f32.mxu1 %v996_v54 }
 0x3ce   : > { %v1623_v9 = vpop.permute.xlu0 %1622 }
 0x3cf   : > { %1872 = vmatmul.mubr.f32.gmra.mrb[8].mxu1 %v995_v29  ;;  %3546 = vmatmul.mubr.msk.f32.gmra.mrb[22].mxu0 %vm1645_vm9, %v992_v3  ;;  %v1628_v26 = vpop.permute.xlu1 %1627 }
 0x3d0   : > { %1984 = vmatprep.mubr.f32.mxu0 %v8090_v48  ;;  %1877 = vmatprep.mubr.f32.mxu1 %v1001_v18 }
 0x3d3   : > { %1878 = vmatmul.mubr.f32.gmra.mrb[10].mxu1 %v1000_v59  ;;  %3547 = vmatmul.mubr.msk.f32.gmra.mrb[24].mxu0 %vm1645_vm9, %v997_v43  ;;  %v1633_v43 = vpop.permute.xlu0 %1632 }
 0x3d4   : > { %1883 = vmatprep.mubr.f32.mxu1 %v1006_v51  ;;  %1990 = vmatprep.mubr.f32.mxu0 %v8090_v48 }
 0x3d7   : > { %1884 = vmatmul.mubr.f32.gmra.mrb[12].mxu1 %v1005_v7  ;;  %3548 = vmatmul.mubr.msk.f32.gmra.mrb[26].mxu0 %vm1645_vm9, %v1002_v6 }
 0x3d8   : > { %1889 = vmatprep.mubr.f32.mxu1 %v1011_v5  ;;  %1996 = vmatprep.mubr.f32.mxu0 %v8090_v48 }
 0x3db   : > { %1890 = vmatmul.mubr.f32.gmra.mrb[14].mxu1 %v1010_v19  ;;  %3549 = vmatmul.mubr.msk.f32.gmra.mrb[28].mxu0 %vm1645_vm9, %v1007_v62 }
 0x3dc   : > { %2002 = vmatprep.mubr.f32.mxu0 %v8090_v48 }
 0x3df   : > { %3550 = vmatmul.mubr.msk.f32.gmra.mrb[30].mxu0 %vm1645_vm9, %v1012_v50 }
 0x492   : > { %v1849_v21 = vpop.f32.mrb[0].mxu1 }
 0x493   : > { %v1851_v14 = vpop.f32.mrb[1].mxu1  ;;  %v3960_v58 = vadd.f32 %v1849_v21, %v1608_v27 }
 0x494   : > { %v3962_v39 = vadd.f32 %v1851_v14, %v1608_v27  ;;  %v1638_v14 = vpop.permute.xlu1 %1637 }
 0x496   : > { %v1855_v37 = vpop.f32.mrb[2].mxu1  ;;  %v1962_v17 = vpop.f32.mrb[16].mxu0 }
 0x497   : > { %v3961_v2 = vadd.f32 %v3960_v58, %v1962_v17  ;;  %v1857_v33 = vpop.f32.mrb[3].mxu1  ;;  %v1964_v45 = vpop.f32.mrb[17].mxu0  ;;  %v3964_v28 = vadd.f32 %v1855_v37, %v1613_v53 }
 0x498   : > { %v3963_v11 = vadd.f32 %v3962_v39, %v1964_v45  ;;  %v3966_v61 = vadd.f32 %v1857_v33, %v1613_v53 }
 0x499   : > { %v6144_v57 = vadd.f32 %v3961_v2, %v8061_v44 }
 0x49a   : > { %v1861_v56 = vpop.f32.mrb[4].mxu1  ;;  %v1968_v47 = vpop.f32.mrb[18].mxu0  ;;  %v6180_v58 = vadd.f32 %v3963_v11, %v8059_v60 }
 0x49b   : > { %8091 = vst [vmem:[#allocation66_spill] sm:$0xff] %v6144_v57  ;;  %v3965_v15 = vadd.f32 %v3964_v28, %v1968_v47  ;;  %v1970_v40 = vpop.f32.mrb[19].mxu0  ;;  %2049 = vrot.lane.b32.xlu1 %v6144_v57, %s4396_s22  ;;  %v1863_v30 = vpop.f32.mrb[5].mxu1  ;;  %v3968_v42 = vadd.f32 %v1861_v56, %v1618_v20 }
 0x49c   : > { %v3967_v35 = vadd.f32 %v3966_v61, %v1970_v40  ;;  %v3970_v46 = vadd.f32 %v1863_v30, %v1618_v20  ;;  %8093 = vst [vmem:[#allocation72_spill] sm:$0xff] %v6180_v58  ;;  %v1643_v28 = vpop.permute.xlu0 %1642 }
 0x49d   : > { %v6149_v1 = vadd.f32 %v3965_v15, %v8062_v16 }
 0x49e   : > { %v1867_v12 = vpop.f32.mrb[6].mxu1  ;;  %v1974_v8 = vpop.f32.mrb[20].mxu0  ;;  %v6191_v60 = vadd.f32 %v3967_v35, %v8060_v34  ;;  %v8101_v35 = vld [vmem:[#allocation51_spill] sm:$0xff] }
 0x49f   : > { %8092 = vst [vmem:[#allocation71_spill] sm:$0xff] %v6149_v1  ;;  %v6151_v44 = vadd.f32 %v3968_v42, %v1974_v8  ;;  %v1976_v49 = vpop.f32.mrb[21].mxu0  ;;  %2113 = vrot.lane.b32.xlu1 %v6144_v57, %s4397_s14  ;;  %2051 = vrot.lane.b32.xlu0 %v6149_v1, %s4396_s22  ;;  %v1869_v31 = vpop.f32.mrb[7].mxu1  ;;  %v3972_v55 = vadd.f32 %v1867_v12, %v1623_v9  ;;  %v8103_v8 = vld [vmem:[#allocation53_spill] sm:$0xff] }
 0x4a0   : > { %v6157_v36 = vadd.f32 %v3970_v46, %v1976_v49  ;;  %v3974_v41 = vadd.f32 %v1869_v31, %v1623_v9  ;;  %8094 = vst [vmem:[#allocation44_spill] sm:$0xff] %v6191_v60  ;;  %v8102_v46 = vld [vmem:[#allocation52_spill] sm:$0xff]  ;;  %v8104_v49 = vld [vmem:[#allocation54_spill] sm:$0xff]  ;;  %v8105_v9 = vld [vmem:[#allocation55_spill] sm:$0xff] }
 0x4a1   : > { %v6213_v34 = vadd.f32 %v6151_v44, %v8065_v24 }
 0x4a2   : > { %v1873_v16 = vpop.f32.mrb[8].mxu1  ;;  %v1980_v52 = vpop.f32.mrb[22].mxu0  ;;  %v6240_v24 = vadd.f32 %v6157_v36, %v8063_v32  ;;  %v8099_v32 = vld [vmem:[#allocation50_spill] sm:$0xff] }
 0x4a3   : > { %v3973_v25 = vadd.f32 %v3972_v55, %v1980_v52  ;;  %v1982_v63 = vpop.f32.mrb[23].mxu0  ;;  %2177 = vrot.lane.b32.xlu1 %v6144_v57, %s4398_s18  ;;  %2115 = vrot.lane.b32.xlu0 %v6149_v1, %s4397_s14  ;;  %v1875_v4 = vpop.f32.mrb[9].mxu1  ;;  %v3976_v38 = vadd.f32 %v1873_v16, %v1628_v26  ;;  %8095 = vst [vmem:[#allocation45_spill] sm:$0xff] %v6213_v34  ;;  %v8106_v52 = vld [vmem:[#allocation57_spill] sm:$0xff] }
 0x4a4   : > { %v6163_v10 = vadd.f32 %v3974_v41, %v1982_v63  ;;  %v3978_v22 = vadd.f32 %v1875_v4, %v1628_v26  ;;  %8097 = vst [vmem:[#allocation43_spill] sm:$0xff] %v6240_v24  ;;  %v8107_v26 = vld [vmem:[#allocation59_spill] sm:$0xff] }
 0x4a5   : > { %v6220_v20 = vadd.f32 %v3973_v25, %v8066_v0 }
 0x4a6   : > { %v1879_v54 = vpop.f32.mrb[10].mxu1  ;;  %v1986_v29 = vpop.f32.mrb[24].mxu0  ;;  %v6248_v0 = vadd.f32 %v6163_v10, %v8064_v13 }
 0x4a7   : > { %v6165_v3 = vadd.f32 %v3976_v38, %v1986_v29  ;;  %v1988_v18 = vpop.f32.mrb[25].mxu0  ;;  %2241 = vrot.lane.b32.xlu1 %v6144_v57, %s4399_s26  ;;  %2179 = vrot.lane.b32.xlu0 %v6149_v1, %s4398_s18  ;;  %v1881_v59 = vpop.f32.mrb[11].mxu1  ;;  %v3980_v7 = vadd.f32 %v1879_v54, %v1633_v43  ;;  %8096 = vst [vmem:[#allocation42_spill] sm:$0xff] %v6220_v20 }
 0x4a8   : > { %v6171_v51 = vadd.f32 %v3978_v22, %v1988_v18  ;;  %v3982_v6 = vadd.f32 %v1881_v59, %v1633_v43  ;;  %8098 = vst [vmem:[#allocation48_spill] sm:$0xff] %v6248_v0 }
 0x4a9   : > { %v6264_v13 = vadd.f32 %v6165_v3, %v8099_v32 }
 0x4aa   : > { %v1885_v5 = vpop.f32.mrb[12].mxu1  ;;  %v1992_v19 = vpop.f32.mrb[26].mxu0  ;;  %v6287_v12 = vadd.f32 %v6171_v51, %v8102_v46 }
 0x4ab   : > { %v3981_v62 = vadd.f32 %v3980_v7, %v1992_v19  ;;  %v1994_v50 = vpop.f32.mrb[27].mxu0  ;;  %2305 = vrot.lane.b32.xlu1 %v6144_v57, %s4400_s2  ;;  %2243 = vrot.lane.b32.xlu0 %v6149_v1, %s4399_s26  ;;  %v1887_v21 = vpop.f32.mrb[13].mxu1  ;;  %v3984_v39 = vadd.f32 %v1885_v5, %v1638_v14  ;;  %8100 = vst [vmem:[#allocation49_spill] sm:$0xff] %v6264_v13  ;;  %v8110_v19 = vld [vmem:[#allocation26_spill] sm:$0xff] }
 0x4ac   : > { %v6177_v27 = vadd.f32 %v3982_v6, %v1994_v50  ;;  %v3986_v37 = vadd.f32 %v1887_v21, %v1638_v14  ;;  %v8111_v50 = vld [vmem:[#allocation25_spill] sm:$0xff] }
 0x4ad   : > { %v6271_v42 = vadd.f32 %v3981_v62, %v8101_v35 }
 0x4ae   : > { %v1891_v17 = vpop.f32.mrb[14].mxu1  ;;  %v1998_v2 = vpop.f32.mrb[28].mxu0  ;;  %v6295_v44 = vadd.f32 %v6177_v27, %v8103_v8  ;;  %v2026_v8 = vld [vmem:[%s7840_s7 + $0x8] sm:$0xff] }
 0x4af   : > { %v6182_v33 = vadd.f32 %v3984_v39, %v1998_v2  ;;  %v2000_v45 = vpop.f32.mrb[29].mxu0  ;;  %2065 = vrot.lane.b32.xlu1 %v6180_v58, %s4396_s22  ;;  %2307 = vrot.lane.b32.xlu0 %v6149_v1, %s4400_s2  ;;  %v1893_v53 = vpop.f32.mrb[15].mxu1  ;;  %v3988_v11 = vadd.f32 %v1891_v17, %v1643_v28 }
 0x4b0   : > { %v6188_v61 = vadd.f32 %v3986_v37, %v2000_v45  ;;  %v3990_v56 = vadd.f32 %v1893_v53, %v1643_v28  ;;  %2657 = vmatprep.mubr.f32.mxu0 %v2026_v8 }
 0x4b1   : > { %v6311_v31 = vadd.f32 %v6182_v33, %v8104_v49 }
 0x4b2   : > { %v2004_v47 = vpop.f32.mrb[30].mxu0  ;;  %v6336_v25 = vadd.f32 %v6188_v61, %v8106_v52 }
 0x4b3   : > { %v3989_v15 = vadd.f32 %v3988_v11, %v2004_v47  ;;  %v2006_v40 = vpop.f32.mrb[31].mxu0  ;;  %2129 = vrot.lane.b32.xlu1 %v6180_v58, %s4397_s14  ;;  %2067 = vrot.lane.b32.xlu0 %v6191_v60, %s4396_s22 }
 0x4b4   : > { %v6197_v30 = vadd.f32 %v3990_v56, %v2006_v40 }
 0x4b5   : > { %v6318_v36 = vadd.f32 %v3989_v15, %v8105_v9 }
 0x4b6   : > { %v6348_v10 = vadd.f32 %v6197_v30, %v8107_v26 }
 0x4b7   : > { %2193 = vrot.lane.b32.xlu1 %v6180_v58, %s4398_s18  ;;  %2131 = vrot.lane.b32.xlu0 %v6191_v60, %s4397_s14 }
 0x4bb   : > { %2257 = vrot.lane.b32.xlu1 %v6180_v58, %s4399_s26  ;;  %2195 = vrot.lane.b32.xlu0 %v6191_v60, %s4398_s18 }
 0x4bf   : > { %2321 = vrot.lane.b32.xlu1 %v6180_v58, %s4400_s2  ;;  %2259 = vrot.lane.b32.xlu0 %v6191_v60, %s4399_s26 }
 0x4c3   : > { %2323 = vrot.lane.b32.xlu0 %v6191_v60, %s4400_s2  ;;  %2053 = vrot.lane.b32.xlu1 %v6213_v34, %s4396_s22 }
 0x4c7   : > { %2117 = vrot.lane.b32.xlu1 %v6213_v34, %s4397_s14  ;;  %2055 = vrot.lane.b32.xlu0 %v6220_v20, %s4396_s22 }
 0x4cb   : > { %2181 = vrot.lane.b32.xlu1 %v6213_v34, %s4398_s18  ;;  %2119 = vrot.lane.b32.xlu0 %v6220_v20, %s4397_s14 }
 0x4cf   : > { %2245 = vrot.lane.b32.xlu1 %v6213_v34, %s4399_s26  ;;  %2183 = vrot.lane.b32.xlu0 %v6220_v20, %s4398_s18 }
 0x4d3   : > { %2309 = vrot.lane.b32.xlu1 %v6213_v34, %s4400_s2  ;;  %2247 = vrot.lane.b32.xlu0 %v6220_v20, %s4399_s26 }
 0x4d7   : > { %2069 = vrot.lane.b32.xlu1 %v6240_v24, %s4396_s22  ;;  %2311 = vrot.lane.b32.xlu0 %v6220_v20, %s4400_s2 }
 0x4db   : > { %2133 = vrot.lane.b32.xlu1 %v6240_v24, %s4397_s14  ;;  %2071 = vrot.lane.b32.xlu0 %v6248_v0, %s4396_s22 }
 0x4df   : > { %2197 = vrot.lane.b32.xlu1 %v6240_v24, %s4398_s18  ;;  %2135 = vrot.lane.b32.xlu0 %v6248_v0, %s4397_s14 }
 0x4e3   : > { %2261 = vrot.lane.b32.xlu1 %v6240_v24, %s4399_s26  ;;  %2199 = vrot.lane.b32.xlu0 %v6248_v0, %s4398_s18 }
 0x4e7   : > { %2263 = vrot.lane.b32.xlu0 %v6248_v0, %s4399_s26  ;;  %2057 = vrot.lane.b32.xlu1 %v6264_v13, %s4396_s22 }
 0x4eb   : > { %2121 = vrot.lane.b32.xlu1 %v6264_v13, %s4397_s14  ;;  %2059 = vrot.lane.b32.xlu0 %v6271_v42, %s4396_s22 }
 0x4ef   : > { %2185 = vrot.lane.b32.xlu1 %v6264_v13, %s4398_s18  ;;  %2123 = vrot.lane.b32.xlu0 %v6271_v42, %s4397_s14 }
 0x4f3   : > { %2249 = vrot.lane.b32.xlu1 %v6264_v13, %s4399_s26  ;;  %2187 = vrot.lane.b32.xlu0 %v6271_v42, %s4398_s18 }
 0x4f7   : > { %2073 = vrot.lane.b32.xlu1 %v6287_v12, %s4396_s22  ;;  %2251 = vrot.lane.b32.xlu0 %v6271_v42, %s4399_s26 }
 0x4fb   : > { %2137 = vrot.lane.b32.xlu1 %v6287_v12, %s4397_s14  ;;  %2075 = vrot.lane.b32.xlu0 %v6295_v44, %s4396_s22 }
 0x4ff   : > { %2201 = vrot.lane.b32.xlu1 %v6287_v12, %s4398_s18  ;;  %2139 = vrot.lane.b32.xlu0 %v6295_v44, %s4397_s14 }
 0x503   : > { %2265 = vrot.lane.b32.xlu1 %v6287_v12, %s4399_s26  ;;  %2203 = vrot.lane.b32.xlu0 %v6295_v44, %s4398_s18 }
 0x507   : > { %2267 = vrot.lane.b32.xlu0 %v6295_v44, %s4399_s26  ;;  %2061 = vrot.lane.b32.xlu1 %v6311_v31, %s4396_s22 }
 0x50b   : > { %2125 = vrot.lane.b32.xlu1 %v6311_v31, %s4397_s14  ;;  %2063 = vrot.lane.b32.xlu0 %v6318_v36, %s4396_s22 }
 0x50d   : > { %v2050_v55 = vpop.permute.xlu1 %2049 }
 0x50f   : > { %2189 = vrot.lane.b32.xlu1 %v6311_v31, %s4398_s18  ;;  %2127 = vrot.lane.b32.xlu0 %v6318_v36, %s4397_s14 }
 0x511   : > { %v6328_v41 = vpop.permute.xlu1 %2113  ;;  %v2052_v16 = vpop.permute.xlu0 %2051 }
 0x513   : > { %2253 = vrot.lane.b32.xlu1 %v6311_v31, %s4399_s26  ;;  %2191 = vrot.lane.b32.xlu0 %v6318_v36, %s4398_s18 }
 0x515   : > { %v6338_v63 = vpop.permute.xlu1 %2177  ;;  %v6340_v4 = vpop.permute.xlu0 %2115 }
 0x517   : > { %2077 = vrot.lane.b32.xlu1 %v6336_v25, %s4396_s22  ;;  %2255 = vrot.lane.b32.xlu0 %v6318_v36, %s4399_s26 }
 0x519   : > { %v6350_v38 = vpop.permute.xlu1 %2241  ;;  %v6352_v22 = vpop.permute.xlu0 %2179 }
 0x51b   : > { %2325 = vrot.lane.b32.xlu1 %v6240_v24, %s4400_s2  ;;  %2079 = vrot.lane.b32.xlu0 %v6348_v10, %s4396_s22 }
 0x51d   : > { %v6358_v54 = vpop.permute.xlu1 %2305  ;;  %v6360_v29 = vpop.permute.xlu0 %2243 }
 0x51e   : > { %8108 = vst [vmem:[#allocation46_spill] sm:$0xff] %v6358_v54 }
 0x51f   : > { %2141 = vrot.lane.b32.xlu1 %v6336_v25, %s4397_s14  ;;  %2327 = vrot.lane.b32.xlu0 %v6248_v0, %s4400_s2 }
 0x521   : > { %v2066_v3 = vpop.permute.xlu1 %2065  ;;  %v6366_v18 = vpop.permute.xlu0 %2307 }
 0x522   : > { %8109 = vst [vmem:[#allocation47_spill] sm:$0xff] %v6366_v18  ;;  %v2081_v59 = vsel %vm583_vm1, %v2050_v55, %v2066_v3  ;;  %v2089_v43 = vsel %vm583_vm1, %v2066_v3, %v2050_v55 }
 0x523   : > { %2205 = vrot.lane.b32.xlu1 %v6336_v25, %s4398_s18  ;;  %2315 = vrot.lane.b32.xlu0 %v6271_v42, %s4400_s2  ;;  %v2097_v62 = vmul.f32 %v2089_v43, %v8110_v19  ;;  %v2098_v21 = vmul.f32 %v2081_v59, %v8111_v50 }
 0x525   : > { %v6376_v51 = vpop.permute.xlu1 %2129  ;;  %v2068_v7 = vpop.permute.xlu0 %2067 }
 0x526   : > { %v2082_v6 = vsel %vm583_vm1, %v2052_v16, %v2068_v7  ;;  %v2090_v5 = vsel %vm583_vm1, %v2068_v7, %v2052_v16 }
 0x527   : > { %v2099_v14 = vmul.f32 %v2090_v5, %v8110_v19  ;;  %v2100_v27 = vmul.f32 %v2082_v6, %v8111_v50  ;;  %2269 = vrot.lane.b32.xlu1 %v6336_v25, %s4399_s26  ;;  %2331 = vrot.lane.b32.xlu0 %v6295_v44, %s4400_s2 }
 0x529   : > { %v3746_v39 = vpack.c.bf16 %v2099_v14, %v2097_v62  ;;  %v6390_v37 = vpop.permute.xlu1 %2193  ;;  %v6392_v17 = vpop.permute.xlu0 %2131  ;;  %v3744_v2 = vpack.c.bf16 %v2100_v27, %v2098_v21 }
 0x52b   : > { %3745 = vmatprep.subr.bf16.mxu0 %v3744_v2  ;;  %2313 = vrot.lane.b32.xlu1 %v6264_v13, %s4400_s2 }
 0x52c   : > { %2143 = vrot.lane.b32.xlu0 %v6348_v10, %s4397_s14  ;;  %3747 = vmatpush1.bf16.msra.mxu0 %v3746_v39 }
 0x52d   : > { %v6398_v33 = vpop.permute.xlu1 %2257  ;;  %v6400_v45 = vpop.permute.xlu0 %2195 }
 0x52f   : > { %2329 = vrot.lane.b32.xlu1 %v6287_v12, %s4400_s2 }
 0x530   : > { %2319 = vrot.lane.b32.xlu0 %v6318_v36, %s4400_s2 }
 0x531   : > { %v6406_v53 = vpop.permute.xlu1 %2321  ;;  %v6408_v28 = vpop.permute.xlu0 %2259 }
 0x532   : > { %8112 = vst [vmem:[#allocation58_spill] sm:$0xff] %v6406_v53 }
 0x533   : > { %2317 = vrot.lane.b32.xlu1 %v6311_v31, %s4400_s2 }
 0x534   : > { %2371 = vrot.lane.b32.xlu0 %v6149_v1, %s4401_s21 }
 0x535   : > { %v6414_v61 = vpop.permute.xlu0 %2323  ;;  %v2054_v11 = vpop.permute.xlu1 %2053 }
 0x536   : > { %8113 = vst [vmem:[#allocation61_spill] sm:$0xff] %v6414_v61 }
 0x537   : > { %2333 = vrot.lane.b32.xlu1 %v6336_v25, %s4400_s2 }
 0x538   : > { %2387 = vrot.lane.b32.xlu0 %v6191_v60, %s4401_s21 }
 0x539   : > { %v6420_v56 = vpop.permute.xlu1 %2117  ;;  %v2056_v47 = vpop.permute.xlu0 %2055 }
 0x53b   : > { %2369 = vrot.lane.b32.xlu1 %v6144_v57, %s4401_s21 }
 0x53c   : > { %2207 = vrot.lane.b32.xlu0 %v6348_v10, %s4398_s18 }
 0x53d   : > { %v6426_v15 = vpop.permute.xlu1 %2181  ;;  %v6428_v40 = vpop.permute.xlu0 %2119 }
 0x53f   : > { %2385 = vrot.lane.b32.xlu1 %v6180_v58, %s4401_s21 }
 0x540   : > { %2375 = vrot.lane.b32.xlu0 %v6220_v20, %s4401_s21 }
 0x541   : > { %v6434_v30 = vpop.permute.xlu1 %2245  ;;  %v6436_v32 = vpop.permute.xlu0 %2183 }
 0x543   : > { %2373 = vrot.lane.b32.xlu1 %v6213_v34, %s4401_s21 }
 0x544   : > { %2391 = vrot.lane.b32.xlu0 %v6248_v0, %s4401_s21 }
 0x545   : > { %v6442_v35 = vpop.permute.xlu1 %2309  ;;  %v6444_v46 = vpop.permute.xlu0 %2247 }
 0x546   : > { %8114 = vst [vmem:[#allocation33_spill] sm:$0xff] %v6442_v35 }
 0x547   : > { %2389 = vrot.lane.b32.xlu1 %v6240_v24, %s4401_s21 }
 0x548   : > { %2379 = vrot.lane.b32.xlu0 %v6271_v42, %s4401_s21 }
 0x549   : > { %v2070_v49 = vpop.permute.xlu1 %2069  ;;  %v6453_v9 = vpop.permute.xlu0 %2311 }
 0x54a   : > { %8115 = vst [vmem:[#allocation56_spill] sm:$0xff] %v6453_v9  ;;  %v2083_v55 = vsel %vm583_vm1, %v2054_v11, %v2070_v49  ;;  %v2091_v16 = vsel %vm583_vm1, %v2070_v49, %v2054_v11 }
 0x54b   : > { %2377 = vrot.lane.b32.xlu1 %v6264_v13, %s4401_s21  ;;  %v2101_v43 = vmul.f32 %v2091_v16, %v8110_v19  ;;  %v2102_v7 = vmul.f32 %v2083_v55, %v8111_v50 }
 0x54c   : > { %2271 = vrot.lane.b32.xlu0 %v6348_v10, %s4399_s26 }
 0x54d   : > { %v6463_v52 = vpop.permute.xlu1 %2133  ;;  %v2072_v26 = vpop.permute.xlu0 %2071 }
 0x54e   : > { %v2084_v3 = vsel %vm583_vm1, %v2056_v47, %v2072_v26  ;;  %v2092_v59 = vsel %vm583_vm1, %v2072_v26, %v2056_v47 }
 0x54f   : > { %v2103_v6 = vmul.f32 %v2092_v59, %v8110_v19  ;;  %v2104_v5 = vmul.f32 %v2084_v3, %v8111_v50  ;;  %2393 = vrot.lane.b32.xlu1 %v6287_v12, %s4401_s21 }
 0x550   : > { %2395 = vrot.lane.b32.xlu0 %v6295_v44, %s4401_s21 }
 0x551   : > { %v3750_v62 = vpack.c.bf16 %v2103_v6, %v2101_v43  ;;  %v6477_v21 = vpop.permute.xlu1 %2197  ;;  %v6479_v14 = vpop.permute.xlu0 %2135  ;;  %v3748_v27 = vpack.c.bf16 %v2104_v5, %v2102_v7 }
 0x553   : > { %3749 = vmatprep.subr.bf16.mxu0 %v3748_v27  ;;  %2381 = vrot.lane.b32.xlu1 %v6311_v31, %s4401_s21 }
 0x554   : > { %2383 = vrot.lane.b32.xlu0 %v6318_v36, %s4401_s21  ;;  %3751 = vmatpush1.bf16.msra.mxu0 %v3750_v62 }
 0x555   : > { %v6485_v39 = vpop.permute.xlu1 %2261  ;;  %v6487_v2 = vpop.permute.xlu0 %2199 }
 0x557   : > { %2397 = vrot.lane.b32.xlu1 %v6336_v25, %s4401_s21 }
 0x558   : > { %2435 = vrot.lane.b32.xlu0 %v6149_v1, %s4402_s20 }
 0x559   : > { %v6493_v11 = vpop.permute.xlu0 %2263  ;;  %v2058_v47 = vpop.permute.xlu1 %2057 }
 0x55b   : > { %2433 = vrot.lane.b32.xlu1 %v6144_v57, %s4402_s20 }
 0x55c   : > { %2451 = vrot.lane.b32.xlu0 %v6191_v60, %s4402_s20 }
 0x55d   : > { %v6499_v8 = vpop.permute.xlu1 %2121  ;;  %v2060_v49 = vpop.permute.xlu0 %2059 }
 0x55f   : > { %2449 = vrot.lane.b32.xlu1 %v6180_v58, %s4402_s20 }
 0x560   : > { %2439 = vrot.lane.b32.xlu0 %v6220_v20, %s4402_s20 }
 0x561   : > { %v6505_v55 = vpop.permute.xlu1 %2185  ;;  %v6507_v16 = vpop.permute.xlu0 %2123 }
 0x563   : > { %2437 = vrot.lane.b32.xlu1 %v6213_v34, %s4402_s20 }
 0x564   : > { %2455 = vrot.lane.b32.xlu0 %v6248_v0, %s4402_s20 }
 0x565   : > { %v6513_v26 = vpop.permute.xlu1 %2249  ;;  %v6515_v3 = vpop.permute.xlu0 %2187 }
 0x566   : > { %8116 = vst [vmem:[#allocation60_spill] sm:$0xff] %v6513_v26 }
 0x567   : > { %2453 = vrot.lane.b32.xlu1 %v6240_v24, %s4402_s20 }
 0x568   : > { %2443 = vrot.lane.b32.xlu0 %v6271_v42, %s4402_s20 }
 0x569   : > { %v2074_v59 = vpop.permute.xlu1 %2073  ;;  %v6521_v43 = vpop.permute.xlu0 %2251 }
 0x56a   : > { %v2085_v7 = vsel %vm583_vm1, %v2058_v47, %v2074_v59  ;;  %v2093_v6 = vsel %vm583_vm1, %v2074_v59, %v2058_v47 }
 0x56b   : > { %2441 = vrot.lane.b32.xlu1 %v6264_v13, %s4402_s20  ;;  %v2105_v35 = vmul.f32 %v2093_v6, %v8110_v19  ;;  %v2106_v9 = vmul.f32 %v2085_v7, %v8111_v50 }
 0x56c   : > { %2335 = vrot.lane.b32.xlu0 %v6348_v10, %s4400_s2 }
 0x56d   : > { %v6531_v5 = vpop.permute.xlu1 %2137  ;;  %v2076_v62 = vpop.permute.xlu0 %2075 }
 0x56e   : > { %v2086_v27 = vsel %vm583_vm1, %v2060_v49, %v2076_v62  ;;  %v2094_v48 = vsel %vm583_vm1, %v2076_v62, %v2060_v49 }
 0x56f   : > { %v2107_v47 = vmul.f32 %v2094_v48, %v8110_v19  ;;  %v2108_v59 = vmul.f32 %v2086_v27, %v8111_v50  ;;  %2457 = vrot.lane.b32.xlu1 %v6287_v12, %s4402_s20 }
 0x570   : > { %2459 = vrot.lane.b32.xlu0 %v6295_v44, %s4402_s20 }
 0x571   : > { %v3754_v53 = vpack.c.bf16 %v2107_v47, %v2105_v35  ;;  %v6545_v54 = vpop.permute.xlu1 %2201  ;;  %v6547_v61 = vpop.permute.xlu0 %2139  ;;  %v3752_v49 = vpack.c.bf16 %v2108_v59, %v2106_v9 }
 0x573   : > { %3753 = vmatprep.subr.bf16.mxu0 %v3752_v49  ;;  %2445 = vrot.lane.b32.xlu1 %v6311_v31, %s4402_s20 }
 0x574   : > { %2447 = vrot.lane.b32.xlu0 %v6318_v36, %s4402_s20  ;;  %3755 = vmatpush1.bf16.msra.mxu0 %v3754_v53 }
 0x575   : > { %v6553_v48 = vpop.permute.xlu1 %2265  ;;  %v6555_v7 = vpop.permute.xlu0 %2203 }
 0x577   : > { %2461 = vrot.lane.b32.xlu1 %v6336_v25, %s4402_s20 }
 0x578   : > { %2499 = vrot.lane.b32.xlu0 %v6149_v1, %s8117_s27 }
 0x579   : > { %v6561_v35 = vpop.permute.xlu0 %2267  ;;  %v2062_v9 = vpop.permute.xlu1 %2061 }
 0x57b   : > { %2497 = vrot.lane.b32.xlu1 %v6144_v57, %s8117_s27  ;;  %v2145_v57 = vsel %vm608_vm2, %v6328_v41, %v6376_v51 }
 0x57c   : > { %2399 = vrot.lane.b32.xlu0 %v6348_v10, %s4401_s21 }
 0x57d   : > { %v6567_v53 = vpop.permute.xlu1 %2125  ;;  %v2064_v6 = vpop.permute.xlu0 %2063 }
 0x57f   : > { %2513 = vrot.lane.b32.xlu1 %v6180_v58, %s8117_s27 }
 0x580   : > { %2515 = vrot.lane.b32.xlu0 %v6191_v60, %s8117_s27 }
 0x581   : > { %v6573_v62 = vpop.permute.xlu1 %2189  ;;  %v6575_v27 = vpop.permute.xlu0 %2127 }
 0x583   : > { %2501 = vrot.lane.b32.xlu1 %v6213_v34, %s8117_s27 }
 0x584   : > { %2503 = vrot.lane.b32.xlu0 %v6220_v20, %s8117_s27  ;;  %v2146_v20 = vsel %vm608_vm2, %v6340_v4, %v6392_v17 }
 0x585   : > { %v6581_v47 = vpop.permute.xlu1 %2253  ;;  %v6583_v59 = vpop.permute.xlu0 %2191 }
 0x586   : > { %8118 = vst [vmem:[#allocation63_spill] sm:$0xff] %v6581_v47  ;;  %v8121_v47 = vld [vmem:[#allocation28_spill] sm:$0xff] }
 0x587   : > { %2517 = vrot.lane.b32.xlu1 %v6240_v24, %s8117_s27  ;;  %v2164_v26 = vmul.f32 %v2146_v20, %v8121_v47  ;;  %v2153_v20 = vsel %vm608_vm2, %v6376_v51, %v6328_v41  ;;  %v2155_v51 = vsel %vm608_vm2, %v6463_v52, %v6420_v56 }
 0x588   : > { %2519 = vrot.lane.b32.xlu0 %v6248_v0, %s8117_s27 }
 0x589   : > { %v2078_v49 = vpop.permute.xlu1 %2077  ;;  %v6589_v18 = vpop.permute.xlu0 %2255 }
 0x58a   : > { %8119 = vst [vmem:[#allocation65_spill] sm:$0xff] %v6589_v18  ;;  %v2087_v1 = vsel %vm583_vm1, %v2062_v9, %v2078_v49  ;;  %v2095_v34 = vsel %vm583_vm1, %v2078_v49, %v2062_v9  ;;  %v2154_v18 = vsel %vm608_vm2, %v6392_v17, %v6340_v4  ;;  %v2162_v4 = vmul.f32 %v2145_v57, %v8121_v47  ;;  %v8122_v17 = vld [vmem:[#allocation27_spill] sm:$0xff] }
 0x58b   : > { %2505 = vrot.lane.b32.xlu1 %v6264_v13, %s8117_s27  ;;  %v2109_v13 = vmul.f32 %v2095_v34, %v8110_v19  ;;  %v2110_v60 = vmul.f32 %v2087_v1, %v8111_v50  ;;  %v2148_v1 = vsel %vm608_vm2, %v6428_v40, %v6479_v14 }
 0x58c   : > { %2463 = vrot.lane.b32.xlu0 %v6348_v10, %s4402_s20  ;;  %v3760_v57 = vpack.c.bf16 %v2164_v26, %v2162_v4 }
 0x58d   : > { %v6603_v0 = vpop.permute.xlu1 %2325  ;;  %v2080_v24 = vpop.permute.xlu0 %2079 }
 0x58e   : > { %8120 = vst [vmem:[#allocation62_spill] sm:$0xff] %v6603_v0  ;;  %v2088_v9 = vsel %vm583_vm1, %v2064_v6, %v2080_v24  ;;  %v2096_v49 = vsel %vm583_vm1, %v2080_v24, %v2064_v6 }
 0x58f   : > { %v2111_v58 = vmul.f32 %v2096_v49, %v8110_v19  ;;  %v2112_v0 = vmul.f32 %v2088_v9, %v8111_v50  ;;  %2521 = vrot.lane.b32.xlu1 %v6287_v12, %s8117_s27  ;;  %v2163_v49 = vmul.f32 %v2154_v18, %v8122_v17  ;;  %v2147_v50 = vsel %vm608_vm2, %v6420_v56, %v6463_v52 }
 0x590   : > { %2507 = vrot.lane.b32.xlu0 %v6271_v42, %s8117_s27  ;;  %v2165_v56 = vmul.f32 %v2155_v51, %v8122_v17  ;;  %v2046_v51 = vld [vmem:[%s7841_s8 + $0x8] sm:$0xff] }
 0x591   : > { %v3758_v34 = vpack.c.bf16 %v2111_v58, %v2109_v13  ;;  %v2142_v24 = vpop.permute.xlu1 %2141  ;;  %v6630_v6 = vpop.permute.xlu0 %2327  ;;  %v3756_v9 = vpack.c.bf16 %v2112_v0, %v2110_v60  ;;  %v2156_v58 = vsel %vm608_vm2, %v6479_v14, %v6428_v40  ;;  %v2168_v60 = vmul.f32 %v2148_v1, %v8121_v47 }
 0x592   : > { %v2161_v0 = vmul.f32 %v2153_v20, %v8122_v17  ;;  %v2150_v13 = vsel %vm608_vm2, %v6507_v16, %v6547_v61  ;;  %v2166_v40 = vmul.f32 %v2147_v50, %v8121_v47  ;;  %v2167_v26 = vmul.f32 %v2156_v58, %v8122_v17  ;;  %v2045_v20 = vld [vmem:[%s7841_s8] sm:$0xff] }
 0x593   : > { %3757 = vmatprep.subr.bf16.mxu0 %v3756_v9  ;;  %2509 = vrot.lane.b32.xlu1 %v6311_v31, %s8117_s27  ;;  %v2149_v1 = vsel %vm608_vm2, %v6499_v8, %v6531_v5  ;;  %v2172_v9 = vmul.f32 %v2150_v13, %v8121_v47  ;;  %v2047_v13 = vld [vmem:[%s7841_s8 + $0x10] sm:$0xff] }
 0x594   : > { %2523 = vrot.lane.b32.xlu0 %v6295_v44, %s8117_s27  ;;  %3759 = vmatpush1.bf16.msra.mxu0 %v3758_v34  ;;  %v3762_v14 = vpack.c.bf16 %v2163_v49, %v2161_v0  ;;  %v2158_v34 = vsel %vm608_vm2, %v6547_v61, %v6507_v16  ;;  %v3764_v50 = vpack.c.bf16 %v2168_v60, %v2166_v40 }
 0x595   : > { %v6656_v41 = vpop.permute.xlu1 %2205  ;;  %v6658_v18 = vpop.permute.xlu0 %2315  ;;  %3761 = vmatprep.subr.bf16.mxu0 %v3760_v57  ;;  %v2157_v61 = vsel %vm608_vm2, %v6531_v5, %v6499_v8  ;;  %v2170_v16 = vmul.f32 %v2149_v1, %v8121_v47  ;;  %v2210_v49 = vsel %vm633_vm3, %v6352_v22, %v6400_v45  ;;  %v3766_v58 = vpack.c.bf16 %v2167_v26, %v2165_v56 }
 0x596   : > { %v2171_v60 = vmul.f32 %v2158_v34, %v8122_v17  ;;  %v2159_v57 = vsel %vm608_vm2, %v2142_v24, %v6567_v53  ;;  %v2169_v5 = vmul.f32 %v2157_v61, %v8122_v17  ;;  %v2151_v0 = vsel %vm608_vm2, %v6567_v53, %v2142_v24  ;;  %v8123_v53 = vld [vmem:[#allocation30_spill] sm:$0xff] }
 0x597   : > { %2525 = vrot.lane.b32.xlu1 %v6336_v25, %s8117_s27  ;;  %v3768_v8 = vpack.c.bf16 %v2172_v9, %v2170_v16  ;;  %v2209_v40 = vsel %vm633_vm3, %v6338_v63, %v6390_v37  ;;  %v2228_v24 = vmul.f32 %v2210_v49, %v8123_v53  ;;  %v2173_v9 = vmul.f32 %v2159_v57, %v8122_v17  ;;  %v2048_v16 = vld [vmem:[%s7841_s8 + $0x18] sm:$0xff] }
 0x598   : > { %2511 = vrot.lane.b32.xlu0 %v6318_v36, %s8117_s27  ;;  %3763 = vmatpush1.bf16.msra.mxu0 %v3762_v14  ;;  %v2218_v14 = vsel %vm633_vm3, %v6400_v45, %v6352_v22  ;;  %v3770_v34 = vpack.c.bf16 %v2171_v60, %v2169_v5  ;;  %v2212_v61 = vsel %vm633_vm3, %v6436_v32, %v6487_v2  ;;  %v8124_v5 = vld [vmem:[#allocation29_spill] sm:$0xff] }
 0x599   : > { %v6680_v52 = vpop.permute.xlu1 %2269  ;;  %3765 = vmatprep.subr.bf16.mxu0 %v3764_v50  ;;  %v6690_v4 = vpop.permute.xlu0 %2331  ;;  %v2226_v49 = vmul.f32 %v2209_v40, %v8123_v53 }
 0x59b   : > { %2563 = vperm.xlu1 %4156, %v2045_v20   ;;  %v2174_v20 = vmul.f32 %v2151_v0, %v8121_v47  ;;  %v2227_v0 = vmul.f32 %v2218_v14, %v8124_v5  ;;  %v2214_v14 = vsel %vm633_vm3, %v6515_v3, %v6555_v7 }
 0x59c   : > { %2527 = vrot.lane.b32.xlu0 %v6348_v10, %s8117_s27  ;;  %3767 = vmatpush1.bf16.msra.mxu0 %v3766_v58 }
 0x59d   : > { %v6721_v26 = vpop.permute.xlu1 %2313  ;;  %3769 = vmatprep.subr.bf16.mxu0 %v3768_v8 }
 0x59e   : > { %v2144_v1 = vpop.permute.xlu0 %2143 }
 0x59f   : > { %v2152_v50 = vsel %vm608_vm2, %v6575_v27, %v2144_v1  ;;  %v2160_v56 = vsel %vm608_vm2, %v2144_v1, %v6575_v27  ;;  %2573 = vperm.xlu1 %4156, %v2047_v13   ;;  %v2217_v27 = vsel %vm633_vm3, %v6390_v37, %v6338_v63  ;;  %v2211_v13 = vsel %vm633_vm3, %v6426_v15, %v6477_v21 }
 0x5a0   : > { %v2175_v22 = vmul.f32 %v2160_v56, %v8122_v17  ;;  %v2176_v45 = vmul.f32 %v2152_v50, %v8121_v47  ;;  %2568 = vperm.xlu0 %4155, %v2046_v51   ;;  %3771 = vmatpush1.bf16.msra.mxu0 %v3770_v34  ;;  %v2220_v63 = vsel %vm633_vm3, %v6487_v2, %v6436_v32 }
 0x5a1   : > { %v6745_v60 = vpop.permute.xlu1 %2329  ;;  %v2232_v37 = vmul.f32 %v2212_v61, %v8123_v53  ;;  %v3776_v51 = vpack.c.bf16 %v2228_v24, %v2226_v49  ;;  %v2225_v40 = vmul.f32 %v2217_v27, %v8124_v5  ;;  %v2219_v1 = vsel %vm633_vm3, %v6477_v21, %v6426_v15 }
 0x5a2   : > { %v3774_v58 = vpack.c.bf16 %v2175_v22, %v2173_v9  ;;  %v6747_v57 = vpop.permute.xlu0 %2319  ;;  %v3772_v8 = vpack.c.bf16 %v2176_v45, %v2174_v20  ;;  %v2230_v32 = vmul.f32 %v2211_v13, %v8123_v53  ;;  %v2231_v9 = vmul.f32 %v2220_v63, %v8124_v5 }
 0x5a3   : > { %v3778_v24 = vpack.c.bf16 %v2227_v0, %v2225_v40  ;;  %v2213_v50 = vsel %vm633_vm3, %v6505_v55, %v6545_v54  ;;  %v2222_v15 = vsel %vm633_vm3, %v6555_v7, %v6515_v3  ;;  %v2236_v21 = vmul.f32 %v2214_v14, %v8123_v53 }
 0x5a4   : > { %2578 = vperm.xlu0 %4155, %v2048_v16   ;;  %3773 = vmatprep.subr.bf16.mxu0 %v3772_v8  ;;  %v3780_v56 = vpack.c.bf16 %v2232_v37, %v2230_v32  ;;  %v2229_v20 = vmul.f32 %v2219_v1, %v8124_v5  ;;  %v2221_v22 = vsel %vm633_vm3, %v6545_v54, %v6505_v55  ;;  %v8125_v37 = vld [vmem:[#allocation32_spill] sm:$0xff] }
 0x5a5   : > { %3775 = vmatpush1.bf16.msra.mxu0 %v3774_v58  ;;  %v6769_v2 = vpop.permute.xlu1 %2317  ;;  %v2234_v45 = vmul.f32 %v2213_v50, %v8123_v53  ;;  %v2235_v3 = vmul.f32 %v2222_v15, %v8124_v5  ;;  %v2274_v7 = vsel %vm658_vm4, %v6360_v29, %v6408_v28  ;;  %v2233_v58 = vmul.f32 %v2221_v22, %v8124_v5 }
 0x5a6   : > { %3777 = vmatprep.subr.bf16.mxu0 %v3776_v51  ;;  %v6771_v34 = vpop.permute.xlu0 %2371  ;;  %v3782_v27 = vpack.c.bf16 %v2231_v9, %v2229_v20  ;;  %v2215_v54 = vsel %vm633_vm3, %v6573_v62, %v6656_v41  ;;  %v2223_v55 = vsel %vm633_vm3, %v6656_v41, %v6573_v62  ;;  %v2273_v8 = vsel %vm658_vm4, %v6350_v38, %v6398_v33 }
 0x5a7   : > { %v3784_v49 = vpack.c.bf16 %v2236_v21, %v2234_v45  ;;  %v2282_v0 = vsel %vm658_vm4, %v6408_v28, %v6360_v29  ;;  %v2292_v51 = vmul.f32 %v2274_v7, %v8125_v37  ;;  %v3786_v40 = vpack.c.bf16 %v2235_v3, %v2233_v58 }
 0x5a8   : > { %v2237_v14 = vmul.f32 %v2223_v55, %v8124_v5  ;;  %v2238_v1 = vmul.f32 %v2215_v54, %v8123_v53  ;;  %v2276_v32 = vsel %vm658_vm4, %v6444_v46, %v6493_v11  ;;  %v2275_v22 = vsel %vm658_vm4, %v6434_v30, %v6485_v39  ;;  %v8127_v55 = vld [vmem:[#allocation60_spill] sm:$0xff] }
 0x5a9   : > { %3779 = vmatpush1.bf16.msra.mxu0 %v3778_v24  ;;  %v6789_v61 = vpop.permute.xlu1 %2333  ;;  %v2281_v24 = vsel %vm658_vm4, %v6398_v33, %v6350_v38  ;;  %v2284_v38 = vsel %vm658_vm4, %v6493_v11, %v6444_v46  ;;  %v2296_v33 = vmul.f32 %v2276_v32, %v8125_v37  ;;  %v2278_v3 = vsel %vm658_vm4, %v6521_v43, %v6561_v35 }
 0x5aa   : > { %3781 = vmatprep.subr.bf16.mxu0 %v3780_v56  ;;  %v6791_v16 = vpop.permute.xlu0 %2387  ;;  %v8126_v56 = vld [vmem:[#allocation31_spill] sm:$0xff]  ;;  %v2283_v7 = vsel %vm658_vm4, %v6485_v39, %v6434_v30  ;;  %v2286_v30 = vsel %vm658_vm4, %v6561_v35, %v6521_v43  ;;  %v2300_v39 = vmul.f32 %v2278_v3, %v8125_v37 }
 0x5ab   : > { %v2291_v20 = vmul.f32 %v2282_v0, %v8126_v56  ;;  %v2295_v54 = vmul.f32 %v2284_v38, %v8126_v56  ;;  %v2299_v43 = vmul.f32 %v2286_v30, %v8126_v56 }
 0x5ad   : > { %3783 = vmatpush1.bf16.msra.mxu0 %v3782_v27  ;;  %v6815_v13 = vpop.permute.xlu1 %2369  ;;  %v2289_v27 = vmul.f32 %v2281_v24, %v8126_v56 }
 0x5ae   : > { %3785 = vmatprep.subr.bf16.mxu0 %v3784_v49  ;;  %v2208_v63 = vpop.permute.xlu0 %2207  ;;  %v2294_v49 = vmul.f32 %v2275_v22, %v8125_v37 }
 0x5af   : > { %v2216_v62 = vsel %vm633_vm3, %v6583_v59, %v2208_v63  ;;  %v2224_v41 = vsel %vm633_vm3, %v2208_v63, %v6583_v59  ;;  %v2290_v59 = vmul.f32 %v2273_v8, %v8125_v37  ;;  %v3794_v58 = vpack.c.bf16 %v2291_v20, %v2289_v27 }
 0x5b0   : > { %v2239_v29 = vmul.f32 %v2224_v41, %v8124_v5  ;;  %v2240_v28 = vmul.f32 %v2216_v62, %v8123_v53  ;;  %v2277_v8 = vsel %vm658_vm4, %v8127_v55, %v6553_v48  ;;  %v3796_v0 = vpack.c.bf16 %v2296_v33, %v2294_v49  ;;  %v8130_v49 = vld [vmem:[#allocation72_spill] sm:$0xff] }
 0x5b1   : > { %3787 = vmatpush1.bf16.msra.mxu0 %v3786_v40  ;;  %v6837_v50 = vpop.permute.xlu1 %2385  ;;  %v3792_v45 = vpack.c.bf16 %v2292_v51, %v2290_v59  ;;  %v2293_v63 = vmul.f32 %v2283_v7, %v8126_v56  ;;  %v2285_v51 = vsel %vm658_vm4, %v6553_v48, %v8127_v55  ;;  %v2298_v40 = vmul.f32 %v2277_v8, %v8125_v37  ;;  %v2025_v55 = vld [vmem:[%s7840_s7] sm:$0xff] }
 0x5b2   : > { %v3790_v9 = vpack.c.bf16 %v2239_v29, %v2237_v14  ;;  %v6839_v15 = vpop.permute.xlu0 %2375  ;;  %v3788_v21 = vpack.c.bf16 %v2240_v28, %v2238_v1  ;;  %v2297_v1 = vmul.f32 %v2285_v51, %v8126_v56  ;;  %v8128_v29 = vld [vmem:[#allocation63_spill] sm:$0xff] }
 0x5b3   : > { %v3798_v14 = vpack.c.bf16 %v2295_v54, %v2293_v63  ;;  %v3800_v35 = vpack.c.bf16 %v2300_v39, %v2298_v40  ;;  %v2279_v28 = vsel %vm658_vm4, %v8128_v29, %v6680_v52  ;;  %v2287_v48 = vsel %vm658_vm4, %v6680_v52, %v8128_v29  ;;  %v2031_v39 = vld [vmem:[%s7840_s7 + $0x30] sm:$0xff] }
 0x5b4   : > { %3789 = vmatprep.subr.bf16.mxu0 %v3788_v21  ;;  %v3802_v59 = vpack.c.bf16 %v2299_v43, %v2297_v1  ;;  %v2301_v22 = vmul.f32 %v2287_v48, %v8126_v56  ;;  %v2302_v38 = vmul.f32 %v2279_v28, %v8125_v37  ;;  %v8133_v63 = vld [vmem:[#allocation71_spill] sm:$0xff]  ;;  %v8136_v48 = vld [vmem:[#allocation45_spill] sm:$0xff] }
 0x5b5   : > { %3791 = vmatpush1.bf16.msra.mxu0 %v3790_v9  ;;  %v6861_v46 = vpop.permute.xlu1 %2373  ;;  %v8129_v9 = vld [vmem:[#allocation65_spill] sm:$0xff]  ;;  %v8134_v40 = vld [vmem:[#allocation43_spill] sm:$0xff] }
 0x5b6   : > { %3793 = vmatprep.subr.bf16.mxu0 %v3792_v45  ;;  %v6863_v11 = vpop.permute.xlu0 %2391  ;;  %v2036_v28 = vld [vmem:[%s7840_s7 + $0x58] sm:$0xff] }
 0x5b9   : > { %3795 = vmatpush1.bf16.msra.mxu0 %v3794_v58  ;;  %v6881_v62 = vpop.permute.xlu1 %2389  ;;  %v8131_v58 = vld [vmem:[#allocation44_spill] sm:$0xff] }
 0x5ba   : > { %3797 = vmatprep.subr.bf16.mxu0 %v3796_v0  ;;  %v6883_v41 = vpop.permute.xlu0 %2379  ;;  %v3808_v54 = vpack.c.bf16 %v8131_v58, %v8130_v49  ;;  %v8132_v0 = vld [vmem:[#allocation66_spill] sm:$0xff]  ;;  %v8142_v49 = vld [vmem:[#allocation49_spill] sm:$0xff] }
 0x5bb   : > { %v3810_v51 = vpack.c.bf16 %v8133_v63, %v8132_v0  ;;  %v3818_v58 = vpack.c.bf16 %v6271_v42, %v8142_v49  ;;  %v3820_v0 = vpack.c.bf16 %v6348_v10, %v6336_v25  ;;  %v8144_v63 = vld [vmem:[#allocation56_spill] sm:$0xff]  ;;  %v2350_v49 = vsel %vm683_vm5, %v6690_v4, %v6658_v18 }
 0x5bc   : > { %v2040_v42 = vld [vmem:[%s7840_s7 + $0x78] sm:$0xff] }
 0x5bd   : > { %3799 = vmatpush1.bf16.msra.mxu0 %v3798_v14  ;;  %v6895_v32 = vpop.permute.xlu1 %2377  ;;  %v8135_v14 = vld [vmem:[#allocation48_spill] sm:$0xff] }
 0x5be   : > { %3801 = vmatprep.subr.bf16.mxu0 %v3800_v35  ;;  %v2272_v24 = vpop.permute.xlu0 %2271  ;;  %v3812_v43 = vpack.c.bf16 %v8135_v14, %v8134_v40  ;;  %v2030_v35 = vld [vmem:[%s7840_s7 + $0x28] sm:$0xff] }
 0x5bf   : > { %v2280_v21 = vsel %vm658_vm4, %v8129_v9, %v2272_v24  ;;  %v2288_v20 = vsel %vm658_vm4, %v2272_v24, %v8129_v9  ;;  %v8137_v24 = vld [vmem:[#allocation42_spill] sm:$0xff]  ;;  %v3816_v9 = vpack.c.bf16 %v6295_v44, %v6287_v12  ;;  %v2041_v12 = vld [vmem:[%s7840_s7 + $0x80] sm:$0xff] }
 0x5c0   : > { %v2303_v52 = vmul.f32 %v2288_v20, %v8126_v56  ;;  %v2304_v33 = vmul.f32 %v2280_v21, %v8125_v37  ;;  %v8138_v21 = vld [vmem:[#allocation47_spill] sm:$0xff]  ;;  %v8139_v20 = vld [vmem:[#allocation61_spill] sm:$0xff]  ;;  %v8140_v44 = vld [vmem:[#allocation46_spill] sm:$0xff] }
 0x5c1   : > { %3803 = vmatpush1.bf16.msra.mxu0 %v3802_v59  ;;  %v6907_v27 = vpop.permute.xlu1 %2393  ;;  %v3814_v59 = vpack.c.bf16 %v8137_v24, %v8136_v48  ;;  %v8146_v48 = vld [vmem:[#allocation33_spill] sm:$0xff]  ;;  %v8147_v24 = vld [vmem:[#allocation62_spill] sm:$0xff] }
 0x5c2   : > { %v3806_v45 = vpack.c.bf16 %v2303_v52, %v2301_v22  ;;  %v6909_v3 = vpop.permute.xlu0 %2395  ;;  %v3804_v7 = vpack.c.bf16 %v2304_v33, %v2302_v38  ;;  %v2346_v22 = vsel %vm683_vm5, %v8139_v20, %v8138_v21  ;;  %v2035_v38 = vld [vmem:[%s7840_s7 + $0x50] sm:$0xff] }
 0x5c4   : > { %3805 = vmatprep.subr.bf16.mxu0 %v3804_v7 }
 0x5c5   : > { %3807 = vmatpush1.bf16.msra.mxu0 %v3806_v45  ;;  %v6916_v8 = vpop.permute.xlu1 %2381  ;;  %v8141_v45 = vld [vmem:[#allocation58_spill] sm:$0xff] }
 0x5c6   : > { %3809 = vmatprep.subr.bf16.mxu0 %v3808_v54  ;;  %v6918_v30 = vpop.permute.xlu0 %2383  ;;  %v2345_v7 = vsel %vm683_vm5, %v8141_v45, %v8140_v44  ;;  %v2338_v54 = vsel %vm683_vm5, %v8138_v21, %v8139_v20  ;;  %v2337_v40 = vsel %vm683_vm5, %v8140_v44, %v8141_v45  ;;  %v2340_v21 = vsel %vm683_vm5, %v8144_v63, %v6630_v6 }
 0x5c8   : > { %2658 = vmatmul.mubr.f32.vlgmr.msra.gmra.mrb[32].mxu0 %v2025_v55  ;;  %v8143_v55 = vld [vmem:[#allocation35_spill] sm:$0xff] }
 0x5c9   : > { %3811 = vmatpush1.bf16.msra.mxu0 %v3810_v51  ;;  %2663 = vmatprep.mubr.f32.mxu0 %v2031_v39  ;;  %v6930_v1 = vpop.permute.xlu1 %2397  ;;  %v2356_v39 = vmul.f32 %v2346_v22, %v8143_v55  ;;  %v2348_v51 = vsel %vm683_vm5, %v6630_v6, %v8144_v63  ;;  %v2354_v14 = vmul.f32 %v2345_v7, %v8143_v55 }
 0x5ca   : > { %3813 = vmatprep.subr.bf16.mxu0 %v3812_v43  ;;  %v6932_v29 = vpop.permute.xlu0 %2435  ;;  %v2028_v43 = vld [vmem:[%s7840_s7 + $0x18] sm:$0xff]  ;;  %v2360_v20 = vmul.f32 %v2348_v51, %v8143_v55  ;;  %v2342_v63 = vsel %vm683_vm5, %v6658_v18, %v6690_v4  ;;  %v2364_v51 = vmul.f32 %v2350_v49, %v8143_v55  ;;  %v2351_v18 = vsel %vm683_vm5, %v6789_v61, %v6769_v2 }
 0x5cb   : > { %v3824_v22 = vpack.c.bf16 %v2356_v39, %v2354_v14 }
 0x5cc   : > { %2664 = vmatmul.mubr.f32.gmra.mrb[34].mxu0 %v2030_v35  ;;  %v8145_v35 = vld [vmem:[#allocation34_spill] sm:$0xff] }
 0x5cd   : > { %3815 = vmatpush1.bf16.msra.mxu0 %v3814_v59  ;;  %2669 = vmatprep.mubr.f32.mxu0 %v2036_v28  ;;  %v6948_v52 = vpop.permute.xlu1 %2433  ;;  %v2355_v28 = vmul.f32 %v2338_v54, %v8145_v35  ;;  %v2347_v59 = vsel %vm683_vm5, %v8147_v24, %v8146_v48  ;;  %v2359_v7 = vmul.f32 %v2340_v21, %v8145_v35 }
 0x5ce   : > { %3817 = vmatprep.subr.bf16.mxu0 %v3816_v9  ;;  %v6950_v33 = vpop.permute.xlu0 %2451  ;;  %v3822_v9 = vpack.c.bf16 %v6318_v36, %v6311_v31  ;;  %v2339_v31 = vsel %vm683_vm5, %v8146_v48, %v8147_v24  ;;  %v2358_v36 = vmul.f32 %v2347_v59, %v8143_v55  ;;  %v2410_v24 = vsel %vm708_vm6, %v6791_v16, %v6771_v34 }
 0x5d0   : > { %2670 = vmatmul.mubr.f32.gmra.mrb[36].mxu0 %v2035_v38  ;;  %v2353_v38 = vmul.f32 %v2337_v40, %v8145_v35  ;;  %v3828_v39 = vpack.c.bf16 %v2360_v20, %v2358_v36 }
 0x5d1   : > { %3819 = vmatpush1.bf16.msra.mxu0 %v3818_v58  ;;  %2675 = vmatprep.mubr.f32.mxu0 %v2041_v12  ;;  %v6980_v25 = vpop.permute.xlu1 %2449  ;;  %v2349_v12 = vsel %vm683_vm5, %v6745_v60, %v6721_v26  ;;  %v2341_v58 = vsel %vm683_vm5, %v6721_v26, %v6745_v60  ;;  %v2363_v60 = vmul.f32 %v2342_v63, %v8145_v35 }
 0x5d2   : > { %v6982_v10 = vpop.permute.xlu0 %2439  ;;  %3821 = vmatprep.subr.bf16.mxu0 %v3820_v0  ;;  %v3826_v45 = vpack.c.bf16 %v2355_v28, %v2353_v38  ;;  %v2362_v54 = vmul.f32 %v2349_v12, %v8143_v55  ;;  %v2357_v0 = vmul.f32 %v2339_v31, %v8145_v35  ;;  %v2409_v28 = vsel %vm708_vm6, %v6837_v50, %v6815_v13  ;;  %v8148_v38 = vld [vmem:[#allocation38_spill] sm:$0xff] }
 0x5d3   : > { %v2418_v12 = vmul.f32 %v2409_v28, %v8148_v38  ;;  %v2405_v28 = vsel %vm708_vm6, %v6895_v32, %v6907_v27 }
 0x5d4   : > { %2676 = vmatmul.mubr.f32.gmra.mrb[38].mxu0 %v2040_v42  ;;  %v2361_v42 = vmul.f32 %v2341_v58, %v8145_v35  ;;  %v3830_v26 = vpack.c.bf16 %v2359_v7, %v2357_v0  ;;  %v3832_v4 = vpack.c.bf16 %v2364_v51, %v2362_v54  ;;  %v2420_v7 = vmul.f32 %v2410_v24, %v8148_v38  ;;  %v8149_v54 = vld [vmem:[#allocation37_spill] sm:$0xff] }
 0x5d5   : > { %3823 = vmatpush1.bf16.msra.mxu0 %v3822_v9  ;;  %2746 = vmatprep.mubr.f32.mxu0 %v2028_v43  ;;  %v7009_v6 = vpop.permute.xlu1 %2437  ;;  %v2343_v43 = vsel %vm683_vm5, %v6769_v2, %v6789_v61  ;;  %v2366_v2 = vmul.f32 %v2351_v18, %v8143_v55  ;;  %v2412_v0 = vsel %vm708_vm6, %v6863_v11, %v6839_v15 }
 0x5d6   : > { %v7011_v44 = vpop.permute.xlu0 %2455  ;;  %3825 = vmatprep.subr.bf16.mxu0 %v3824_v22  ;;  %v3834_v48 = vpack.c.bf16 %v2363_v60, %v2361_v42  ;;  %v2365_v21 = vmul.f32 %v2343_v43, %v8145_v35  ;;  %v2401_v22 = vsel %vm708_vm6, %v6815_v13, %v6837_v50  ;;  %v3840_v63 = vpack.c.bf16 %v2420_v7, %v2418_v12 }
 0x5d7   : > { %v2413_v42 = vsel %vm708_vm6, %v6907_v27, %v6895_v32 }
 0x5d9   : > { %3827 = vmatpush1.bf16.msra.mxu0 %v3826_v45  ;;  %v7030_v40 = vpop.permute.xlu1 %2453  ;;  %v2411_v45 = vsel %vm708_vm6, %v6881_v62, %v6861_v46 }
 0x5da   : > { %v7032_v14 = vpop.permute.xlu0 %2443  ;;  %3829 = vmatprep.subr.bf16.mxu0 %v3828_v39  ;;  %v2417_v39 = vmul.f32 %v2401_v22, %v8149_v54  ;;  %v2473_v22 = vsel %vm733_vm7, %v6980_v25, %v6948_v52 }
 0x5dd   : > { %3831 = vmatpush1.bf16.msra.mxu0 %v3830_v26  ;;  %v7051_v59 = vpop.permute.xlu1 %2441  ;;  %v2414_v26 = vsel %vm708_vm6, %v6909_v3, %v6883_v41 }
 0x5de   : > { %v2336_v9 = vpop.permute.xlu0 %2335  ;;  %3833 = vmatprep.subr.bf16.mxu0 %v3832_v4 }
 0x5df   : > { %v2344_v61 = vsel %vm683_vm5, %v6747_v57, %v2336_v9  ;;  %v2352_v20 = vsel %vm683_vm5, %v2336_v9, %v6747_v57  ;;  %v2402_v57 = vsel %vm708_vm6, %v6771_v34, %v6791_v16  ;;  %v2403_v34 = vsel %vm708_vm6, %v6861_v46, %v6881_v62 }
 0x5e0   : > { %v2367_v31 = vmul.f32 %v2344_v61, %v8145_v35  ;;  %v2368_v36 = vmul.f32 %v2352_v20, %v8143_v55  ;;  %v2422_v16 = vmul.f32 %v2411_v45, %v8148_v38  ;;  %v2419_v51 = vmul.f32 %v2402_v57, %v8149_v54 }
 0x5e1   : > { %3835 = vmatpush1.bf16.msra.mxu0 %v3834_v48  ;;  %v7077_v50 = vpop.permute.xlu1 %2457  ;;  %v2404_v46 = vsel %vm708_vm6, %v6839_v15, %v6863_v11  ;;  %v2424_v62 = vmul.f32 %v2412_v0, %v8148_v38  ;;  %v2421_v4 = vmul.f32 %v2403_v34, %v8149_v54  ;;  %v2406_v15 = vsel %vm708_vm6, %v6883_v41, %v6909_v3 }
 0x5e2   : > { %v3838_v13 = vpack.c.bf16 %v2367_v31, %v2365_v21  ;;  %v7079_v49 = vpop.permute.xlu0 %2459  ;;  %v3836_v58 = vpack.c.bf16 %v2368_v36, %v2366_v2  ;;  %v3842_v18 = vpack.c.bf16 %v2419_v51, %v2417_v39  ;;  %v2426_v11 = vmul.f32 %v2413_v42, %v8148_v38 }
 0x5e3   : > { %v2428_v48 = vmul.f32 %v2414_v26, %v8148_v38  ;;  %v3844_v24 = vpack.c.bf16 %v2424_v62, %v2422_v16  ;;  %v2423_v9 = vmul.f32 %v2404_v46, %v8149_v54  ;;  %v2425_v21 = vmul.f32 %v2405_v28, %v8149_v54  ;;  %v8151_v26 = vld [vmem:[#allocation40_spill] sm:$0xff] }
 0x5e4   : > { %3837 = vmatprep.subr.bf16.mxu0 %v3836_v58  ;;  %v2427_v2 = vmul.f32 %v2406_v15, %v8149_v54  ;;  %v2407_v41 = vsel %vm708_vm6, %v6916_v8, %v6930_v1  ;;  %v2415_v3 = vsel %vm708_vm6, %v6930_v1, %v6916_v8  ;;  %v2474_v8 = vsel %vm733_vm7, %v6950_v33, %v6932_v29  ;;  %v8150_v58 = vld [vmem:[#allocation41_spill] sm:$0xff] }
 0x5e5   : > { %3839 = vmatpush1.bf16.msra.mxu0 %v3838_v13  ;;  %v7105_v60 = vpop.permute.xlu1 %2445  ;;  %v3846_v27 = vpack.c.bf16 %v2423_v9, %v2421_v4  ;;  %v3848_v20 = vpack.c.bf16 %v2428_v48, %v2426_v11  ;;  %v2429_v31 = vmul.f32 %v2407_v41, %v8149_v54  ;;  %v2430_v57 = vmul.f32 %v2415_v3, %v8148_v38 }
 0x5e6   : > { %v7107_v43 = vpop.permute.xlu0 %2447  ;;  %3841 = vmatprep.subr.bf16.mxu0 %v3840_v63  ;;  %v3850_v12 = vpack.c.bf16 %v2427_v2, %v2425_v21  ;;  %v2465_v13 = vsel %vm733_vm7, %v6948_v52, %v6980_v25  ;;  %v2482_v39 = vmul.f32 %v2473_v22, %v8150_v58  ;;  %v2475_v16 = vsel %vm733_vm7, %v7030_v40, %v7009_v6 }
 0x5e7   : > { %v2484_v63 = vmul.f32 %v2474_v8, %v8150_v58  ;;  %v2481_v46 = vmul.f32 %v2465_v13, %v8151_v26  ;;  %v2476_v62 = vsel %vm733_vm7, %v7011_v44, %v6982_v10  ;;  %v2477_v28 = vsel %vm733_vm7, %v7077_v50, %v7051_v59 }
 0x5e8   : > { %v2478_v15 = vsel %vm733_vm7, %v7079_v49, %v7032_v14  ;;  %v2469_v21 = vsel %vm733_vm7, %v7051_v59, %v7077_v50  ;;  %v2470_v2 = vsel %vm733_vm7, %v7032_v14, %v7079_v49 }
 0x5e9   : > { %3843 = vmatpush1.bf16.msra.mxu0 %v3842_v18  ;;  %v7123_v61 = vpop.permute.xlu1 %2461  ;;  %v2467_v18 = vsel %vm733_vm7, %v7009_v6, %v7030_v40  ;;  %v2468_v6 = vsel %vm733_vm7, %v6982_v10, %v7011_v44  ;;  %v2488_v40 = vmul.f32 %v2476_v62, %v8150_v58  ;;  %v2490_v10 = vmul.f32 %v2477_v28, %v8150_v58 }
 0x5ea   : > { %v7125_v32 = vpop.permute.xlu0 %2499  ;;  %3845 = vmatprep.subr.bf16.mxu0 %v3844_v24  ;;  %v2485_v9 = vmul.f32 %v2467_v18, %v8151_v26  ;;  %v2492_v44 = vmul.f32 %v2478_v15, %v8150_v58  ;;  %v2487_v41 = vmul.f32 %v2468_v6, %v8151_v26  ;;  %v2489_v3 = vmul.f32 %v2469_v21, %v8151_v26  ;;  %v2027_v6 = vld [vmem:[%s7840_s7 + $0x10] sm:$0xff] }
 0x5ec   : > { %v3862_v59 = vpack.c.bf16 %v2487_v41, %v2485_v9  ;;  %v3864_v49 = vpack.c.bf16 %v2492_v44, %v2490_v10 }
 0x5ed   : > { %3847 = vmatpush1.bf16.msra.mxu0 %v3846_v27  ;;  %v2498_v36 = vpop.permute.xlu1 %2497 }
 0x5ee   : > { %v2400_v45 = vpop.permute.xlu0 %2399  ;;  %3849 = vmatprep.subr.bf16.mxu0 %v3848_v20  ;;  %v2491_v20 = vmul.f32 %v2470_v2, %v8151_v26 }
 0x5ef   : > { %v2408_v1 = vsel %vm708_vm6, %v6918_v30, %v2400_v45  ;;  %v2416_v7 = vsel %vm708_vm6, %v2400_v45, %v6918_v30  ;;  %v2466_v30 = vsel %vm733_vm7, %v6932_v29, %v6950_v33  ;;  %v2486_v29 = vmul.f32 %v2475_v16, %v8150_v58 }
 0x5f0   : > { %v2431_v0 = vmul.f32 %v2408_v1, %v8149_v54  ;;  %v2432_v34 = vmul.f32 %v2416_v7, %v8148_v38  ;;  %v3856_v33 = vpack.c.bf16 %v2484_v63, %v2482_v39  ;;  %v2483_v4 = vmul.f32 %v2466_v30, %v8151_v26  ;;  %v7223_v39 = vld [vmem:[#allocation4 + $0x18] ss:$0 sm:$0xff] }
 0x5f1   : > { %3851 = vmatpush1.bf16.msra.mxu0 %v3850_v12  ;;  %v2514_v25 = vpop.permute.xlu1 %2513  ;;  %v3860_v27 = vpack.c.bf16 %v2488_v40, %v2486_v29  ;;  %v2479_v45 = vsel %vm733_vm7, %v7123_v61, %v7105_v60  ;;  %8152 = vst [vmem:[#allocation64_spill] sm:$0xff] %v7223_v39 }
 0x5f2   : > { %v3854_v52 = vpack.c.bf16 %v2431_v0, %v2429_v31  ;;  %v2516_v51 = vpop.permute.xlu0 %2515  ;;  %v3852_v42 = vpack.c.bf16 %v2432_v34, %v2430_v57  ;;  %v3858_v24 = vpack.c.bf16 %v2483_v4, %v2481_v46  ;;  %v2537_v50 = vsel %vm758_vm8, %v2514_v25, %v2498_v36 }
 0x5f3   : > { %v2538_v14 = vsel %vm758_vm8, %v2516_v51, %v7125_v32  ;;  %v2471_v31 = vsel %vm733_vm7, %v7105_v60, %v7123_v61  ;;  %v3866_v57 = vpack.c.bf16 %v2491_v20, %v2489_v3  ;;  %v2529_v8 = vsel %vm758_vm8, %v2498_v36, %v2514_v25  ;;  %v7241_v25 = vld [vmem:[#allocation4 + $0x10] ss:$0 sm:$0xff]  ;;  %v2032_v3 = vld [vmem:[%s7840_s7 + $0x38] sm:$0xff] }
 0x5f4   : > { %3853 = vmatprep.subr.bf16.mxu0 %v3852_v42  ;;  %v2530_v1 = vsel %vm758_vm8, %v7125_v32, %v2516_v51  ;;  %v2546_v0 = vmul.f32 %v7223_v39, %v2537_v50  ;;  %v2548_v34 = vmul.f32 %v7223_v39, %v2538_v14  ;;  %v2493_v36 = vmul.f32 %v2471_v31, %v8151_v26  ;;  %v2038_v50 = vld [vmem:[%s7840_s7 + $0x68] sm:$0xff] }
 0x5f5   : > { %3855 = vmatpush1.bf16.msra.mxu0 %v3854_v52  ;;  %v2502_v11 = vpop.permute.xlu1 %2501  ;;  %v2494_v32 = vmul.f32 %v2479_v45, %v8150_v58  ;;  %8153 = vst [vmem:[#allocation68_spill] sm:$0xff] %v7241_v25  ;;  %v2545_v51 = vmul.f32 %v7241_v25, %v2529_v8 }
 0x5f6   : > { %v2504_v48 = vpop.permute.xlu0 %2503  ;;  %3857 = vmatprep.subr.bf16.mxu0 %v3856_v33  ;;  %v3872_v29 = vpack.c.bf16 %v2548_v34, %v2546_v0 }
 0x5f9   : > { %3859 = vmatpush1.bf16.msra.mxu0 %v3858_v24  ;;  %v2518_v22 = vpop.permute.xlu1 %2517 }
 0x5fa   : > { %v2520_v12 = vpop.permute.xlu0 %2519  ;;  %3861 = vmatprep.subr.bf16.mxu0 %v3860_v27  ;;  %v2539_v63 = vsel %vm758_vm8, %v2518_v22, %v2502_v11  ;;  %v2531_v33 = vsel %vm758_vm8, %v2502_v11, %v2518_v22  ;;  %v2033_v11 = vld [vmem:[%s7840_s7 + $0x40] sm:$0xff] }
 0x5fb   : > { %v2540_v52 = vsel %vm758_vm8, %v2520_v12, %v2504_v48  ;;  %v2550_v4 = vmul.f32 %v7223_v39, %v2539_v63  ;;  %v2532_v28 = vsel %vm758_vm8, %v2504_v48, %v2520_v12  ;;  %v2549_v21 = vmul.f32 %v7241_v25, %v2531_v33 }
 0x5fc   : > { %v2552_v15 = vmul.f32 %v7223_v39, %v2540_v52  ;;  %v2551_v48 = vmul.f32 %v7241_v25, %v2532_v28 }
 0x5fd   : > { %3863 = vmatpush1.bf16.msra.mxu0 %v3862_v59  ;;  %v2506_v7 = vpop.permute.xlu1 %2505 }
 0x5fe   : > { %v2464_v13 = vpop.permute.xlu0 %2463  ;;  %3865 = vmatprep.subr.bf16.mxu0 %v3864_v49  ;;  %v3876_v41 = vpack.c.bf16 %v2552_v15, %v2550_v4  ;;  %v3878_v14 = vpack.c.bf16 %v2551_v48, %v2549_v21 }
 0x5ff   : > { %v2472_v60 = vsel %vm733_vm7, %v7107_v43, %v2464_v13  ;;  %v2480_v61 = vsel %vm733_vm7, %v2464_v13, %v7107_v43  ;;  %v2547_v43 = vmul.f32 %v7241_v25, %v2530_v1  ;;  %v2037_v1 = vld [vmem:[%s7840_s7 + $0x60] sm:$0xff]  ;;  %v2043_v13 = vld [vmem:[%s7840_s7 + $0x90] sm:$0xff] }
 0x600   : > { %v2495_v16 = vmul.f32 %v2472_v60, %v8151_v26  ;;  %v2496_v30 = vmul.f32 %v2480_v61, %v8150_v58 }
 0x601   : > { %3867 = vmatpush1.bf16.msra.mxu0 %v3866_v57  ;;  %v2522_v46 = vpop.permute.xlu1 %2521  ;;  %v3874_v40 = vpack.c.bf16 %v2547_v43, %v2545_v51  ;;  %v8154_v51 = vmov 0.0   ;;  %v2029_v43 = vld [vmem:[%s7840_s7 + $0x20] sm:$0xff] }
 0x602   : > { %v3870_v42 = vpack.c.bf16 %v2495_v16, %v2493_v36  ;;  %v2508_v62 = vpop.permute.xlu0 %2507  ;;  %v3868_v18 = vpack.c.bf16 %v2496_v30, %v2494_v32  ;;  %v2541_v2 = vsel %vm758_vm8, %v2522_v46, %v2506_v7  ;;  %v2533_v20 = vsel %vm758_vm8, %v2506_v7, %v2522_v46  ;;  %v2042_v30 = vld [vmem:[%s7840_s7 + $0x88] sm:$0xff]  ;;  %v2039_v46 = vld [vmem:[%s7840_s7 + $0x70] sm:$0xff] }
 0x603   : > { %v2554_v22 = vmul.f32 %v7223_v39, %v2541_v2  ;;  %v2553_v45 = vmul.f32 %v7241_v25, %v2533_v20 }
 0x604   : > { %3869 = vmatprep.subr.bf16.mxu0 %v3868_v18 }
 0x605   : > { %3871 = vmatpush1.bf16.msra.mxu0 %v3870_v42  ;;  %v2510_v24 = vpop.permute.xlu1 %2509  ;;  %v2034_v42 = vld [vmem:[%s7840_s7 + $0x48] sm:$0xff] }
 0x606   : > { %v2524_v9 = vpop.permute.xlu0 %2523  ;;  %3873 = vmatprep.subr.bf16.mxu0 %v3872_v29 }
 0x607   : > { %v2542_v10 = vsel %vm758_vm8, %v2524_v9, %v2508_v62  ;;  %v2534_v44 = vsel %vm758_vm8, %v2508_v62, %v2524_v9  ;;  %v2044_v62 = vld [vmem:[%s7840_s7 + $0x98] sm:$0xff] }
 0x608   : > { %v2556_v27 = vmul.f32 %v7223_v39, %v2542_v10  ;;  %2747 = vmatmul.mubr.f32.vlgmr.msra.gmra.mrb[32].mxu0 %v2027_v6  ;;  %v2555_v49 = vmul.f32 %v7241_v25, %v2534_v44 }
 0x609   : > { %3875 = vmatpush1.bf16.msra.mxu0 %v3874_v40  ;;  %2752 = vmatprep.mubr.f32.mxu0 %v2033_v11  ;;  %v2526_v12 = vpop.permute.xlu1 %2525 }
 0x60a   : > { %v2512_v59 = vpop.permute.xlu0 %2511  ;;  %3877 = vmatprep.subr.bf16.mxu0 %v3876_v41  ;;  %v3880_v31 = vpack.c.bf16 %v2556_v27, %v2554_v22  ;;  %v2535_v57 = vsel %vm758_vm8, %v2510_v24, %v2526_v12  ;;  %v2543_v8 = vsel %vm758_vm8, %v2526_v12, %v2510_v24  ;;  %v3882_v0 = vpack.c.bf16 %v2555_v49, %v2553_v45 }
 0x60b   : > { %v2557_v61 = vmul.f32 %v7241_v25, %v2535_v57  ;;  %v2558_v36 = vmul.f32 %v7223_v39, %v2543_v8  ;;  %v2869_v8 = vld [vmem:[#allocation12 + $0x8] sm:$0xff] }
 0x60c   : > { %2753 = vmatmul.mubr.f32.gmra.mrb[34].mxu0 %v2032_v3  ;;  %3213 = vmatprep.mubr.f32.mxu1 %v2869_v8 }
 0x60d   : > { %3879 = vmatpush1.bf16.msra.mxu0 %v3878_v14  ;;  %2758 = vmatprep.mubr.f32.mxu0 %v2038_v50 }
 0x60e   : > { %v2528_v7 = vpop.permute.xlu0 %2527  ;;  %3881 = vmatprep.subr.bf16.mxu0 %v3880_v31 }
 0x60f   : > { %v2536_v34 = vsel %vm758_vm8, %v2512_v59, %v2528_v7  ;;  %v2544_v60 = vsel %vm758_vm8, %v2528_v7, %v2512_v59 }
 0x610   : > { %v2559_v32 = vmul.f32 %v7241_v25, %v2536_v34  ;;  %v2560_v16 = vmul.f32 %v7223_v39, %v2544_v60  ;;  %2759 = vmatmul.mubr.f32.gmra.mrb[36].mxu0 %v2037_v1 }
 0x611   : > { %3883 = vmatpush1.bf16.msra.mxu0 %v3882_v0  ;;  %2764 = vmatprep.mubr.f32.mxu0 %v2043_v13 }
 0x612   : > { %v3886_v63 = vpack.c.bf16 %v2559_v32, %v2557_v61  ;;  %v3884_v52 = vpack.c.bf16 %v2560_v16, %v2558_v36  ;;  %v3307_v32 = vld [vmem:[%s8156_s16] sm:$0xff] }
 0x614   : > { %2765 = vmatmul.mubr.f32.gmra.mrb[38].mxu0 %v2042_v30  ;;  %3885 = vmatprep.subr.bf16.mxu0 %v3884_v52  ;;  %v3337_v52 = vld [vmem:[#allocation2] sm:$0x1] }
 0x615   : > { %3887 = vmatpush1.bf16.msra.mxu0 %v3886_v63  ;;  %2835 = vmatprep.mubr.f32.mxu0 %v8154_v51  ;;  %v3308_v63 = vld [vmem:[%s8156_s16 + $0x8] sm:$0xff] }
 0x618   : > { %3551 = vmatmul.mubr.msk.f32.vlgmr.msra.gmra.mrb[32].mxu0 %vm1645_vm9, %v2029_v43 }
 0x619   : > { %2841 = vmatprep.mubr.f32.mxu0 %v8154_v51 }
 0x61a   : > { %v2564_v18 = vpop.permute.xlu1 %2563 }
 0x61c   : > { %3552 = vmatmul.mubr.msk.f32.gmra.mrb[34].mxu0 %vm1645_vm9, %v2034_v42 }
 0x61d   : > { %2847 = vmatprep.mubr.f32.mxu0 %v8154_v51 }
 0x61e   : > { %v2574_v3 = vpop.permute.xlu1 %2573 }
 0x61f   : > { %v2569_v15 = vpop.permute.xlu0 %2568 }
 0x620   : > { %3553 = vmatmul.mubr.msk.f32.gmra.mrb[36].mxu0 %vm1645_vm9, %v2039_v46 }
 0x621   : > { %2853 = vmatprep.mubr.f32.mxu0 %v8154_v51 }
 0x623   : > { %v2579_v22 = vpop.permute.xlu0 %2578 }
 0x624   : > { %3554 = vmatmul.mubr.msk.f32.gmra.mrb[38].mxu0 %vm1645_vm9, %v2044_v62 }
 0x6eb   : > { %v2837_v29 = vpop.f32.mrb[32].mxu0 }
 0x6ec   : > { %v3992_v33 = vadd.f32 %v2837_v29, %v2564_v18  ;;  %v2839_v4 = vpop.f32.mrb[33].mxu0 }
 0x6ed   : > { %v3993_v10 = vadd.f32 %v2839_v4, %v2564_v18 }
 0x6ee   : > { %v7318_v28 = vmax.f32 %v3992_v33, 0.0 }
 0x6ef   : > { %v2843_v6 = vpop.f32.mrb[34].mxu0  ;;  %v7340_v44 = vmax.f32 %v3993_v10, 0.0 }
 0x6f0   : > { %v3994_v40 = vadd.f32 %v2843_v6, %v2569_v15  ;;  %v2845_v24 = vpop.f32.mrb[35].mxu0  ;;  %2876 = vrot.lane.b32.xlu1 %v7318_v28, %s4396_s22  ;;  %v8157_v6 = vld [vmem:[#allocation25_spill] sm:$0xff] }
 0x6f1   : > { %v3995_v27 = vadd.f32 %v2845_v24, %v2569_v15 }
 0x6f2   : > { %v7322_v9 = vmax.f32 %v3994_v40, 0.0 }
 0x6f3   : > { %v2849_v11 = vpop.f32.mrb[36].mxu0  ;;  %v7346_v41 = vmax.f32 %v3995_v27, 0.0 }
 0x6f4   : > { %v2851_v21 = vpop.f32.mrb[37].mxu0  ;;  %2878 = vrot.lane.b32.xlu0 %v7322_v9, %s4396_s22  ;;  %2908 = vrot.lane.b32.xlu1 %v7318_v28, %s4397_s14  ;;  %v3996_v20 = vadd.f32 %v2849_v11, %v2574_v3 }
 0x6f5   : > { %v3997_v14 = vadd.f32 %v2851_v21, %v2574_v3 }
 0x6f6   : > { %v7364_v12 = vmax.f32 %v3996_v20, 0.0 }
 0x6f7   : > { %v2855_v48 = vpop.f32.mrb[38].mxu0  ;;  %v7388_v49 = vmax.f32 %v3997_v14, 0.0 }
 0x6f8   : > { %v2857_v2 = vpop.f32.mrb[39].mxu0  ;;  %2910 = vrot.lane.b32.xlu0 %v7322_v9, %s4397_s14  ;;  %2940 = vrot.lane.b32.xlu1 %v7318_v28, %s4398_s18  ;;  %v3998_v59 = vadd.f32 %v2855_v48, %v2579_v22 }
 0x6f9   : > { %v3999_v31 = vadd.f32 %v2857_v2, %v2579_v22 }
 0x6fa   : > { %v7370_v50 = vmax.f32 %v3998_v59, 0.0 }
 0x6fb   : > { %v7394_v45 = vmax.f32 %v3999_v31, 0.0 }
 0x6fc   : > { %2942 = vrot.lane.b32.xlu0 %v7322_v9, %s4398_s18  ;;  %2972 = vrot.lane.b32.xlu1 %v7318_v28, %s4399_s26 }
 0x700   : > { %2974 = vrot.lane.b32.xlu0 %v7322_v9, %s4399_s26  ;;  %3004 = vrot.lane.b32.xlu1 %v7318_v28, %s4400_s2 }
 0x704   : > { %3006 = vrot.lane.b32.xlu0 %v7322_v9, %s4400_s2  ;;  %2884 = vrot.lane.b32.xlu1 %v7340_v44, %s4396_s22 }
 0x708   : > { %2886 = vrot.lane.b32.xlu0 %v7346_v41, %s4396_s22  ;;  %2916 = vrot.lane.b32.xlu1 %v7340_v44, %s4397_s14 }
 0x70c   : > { %2918 = vrot.lane.b32.xlu0 %v7346_v41, %s4397_s14  ;;  %2948 = vrot.lane.b32.xlu1 %v7340_v44, %s4398_s18 }
 0x710   : > { %2950 = vrot.lane.b32.xlu0 %v7346_v41, %s4398_s18  ;;  %2980 = vrot.lane.b32.xlu1 %v7340_v44, %s4399_s26 }
 0x714   : > { %2982 = vrot.lane.b32.xlu0 %v7346_v41, %s4399_s26  ;;  %3012 = vrot.lane.b32.xlu1 %v7340_v44, %s4400_s2 }
 0x718   : > { %3014 = vrot.lane.b32.xlu0 %v7346_v41, %s4400_s2  ;;  %2880 = vrot.lane.b32.xlu1 %v7364_v12, %s4396_s22 }
 0x71c   : > { %2882 = vrot.lane.b32.xlu0 %v7370_v50, %s4396_s22  ;;  %2912 = vrot.lane.b32.xlu1 %v7364_v12, %s4397_s14 }
 0x720   : > { %2914 = vrot.lane.b32.xlu0 %v7370_v50, %s4397_s14  ;;  %2944 = vrot.lane.b32.xlu1 %v7364_v12, %s4398_s18 }
 0x724   : > { %2946 = vrot.lane.b32.xlu0 %v7370_v50, %s4398_s18  ;;  %2976 = vrot.lane.b32.xlu1 %v7364_v12, %s4399_s26 }
 0x728   : > { %2978 = vrot.lane.b32.xlu0 %v7370_v50, %s4399_s26  ;;  %3008 = vrot.lane.b32.xlu1 %v7364_v12, %s4400_s2 }
 0x72c   : > { %3010 = vrot.lane.b32.xlu0 %v7370_v50, %s4400_s2  ;;  %2888 = vrot.lane.b32.xlu1 %v7388_v49, %s4396_s22 }
 0x730   : > { %2890 = vrot.lane.b32.xlu0 %v7394_v45, %s4396_s22  ;;  %3036 = vrot.lane.b32.xlu1 %v7318_v28, %s4401_s21  ;;  %s8172_s22 = sld [smem:[#allocation77_spill]] }
 0x734   : > { %3038 = vrot.lane.b32.xlu0 %v7322_v9, %s4401_s21  ;;  %2920 = vrot.lane.b32.xlu1 %v7388_v49, %s4397_s14 }
 0x738   : > { %2922 = vrot.lane.b32.xlu0 %v7394_v45, %s4397_s14  ;;  %2952 = vrot.lane.b32.xlu1 %v7388_v49, %s4398_s18  ;;  %s7789_s14 = scalar_lea.hbm %s8172_s22, %s3563_s24 }
 0x73c   : > { %3046 = vrot.lane.b32.xlu0 %v7346_v41, %s4401_s21  ;;  %2984 = vrot.lane.b32.xlu1 %v7388_v49, %s4399_s26 }
 0x740   : > { %2954 = vrot.lane.b32.xlu0 %v7394_v45, %s4398_s18  ;;  %3016 = vrot.lane.b32.xlu1 %v7388_v49, %s4400_s2  ;;  %s8155_s18 = sld [smem:[#allocation75_spill]] }
 0x744   : > { %3042 = vrot.lane.b32.xlu0 %v7370_v50, %s4401_s21  ;;  %3044 = vrot.lane.b32.xlu1 %v7340_v44, %s4401_s21 }
 0x746   : > { %v2874_v34 = vld [vmem:[%s8155_s18] sm:$0xff]  ;;  %v2875_v36 = vld [vmem:[%s8155_s18 + $0x8] sm:$0xff] }
 0x748   : > { %2986 = vrot.lane.b32.xlu0 %v7394_v45, %s4399_s26  ;;  %3040 = vrot.lane.b32.xlu1 %v7364_v12, %s4401_s21  ;;  %s3383_s26 = scalar_lea.sflag [#allocation6], %s4687_s19 }
 0x74c   : > { %3070 = vrot.lane.b32.xlu0 %v7322_v9, %s4402_s20  ;;  %3048 = vrot.lane.b32.xlu1 %v7388_v49, %s4401_s21 }
 0x750   : > { %3078 = vrot.lane.b32.xlu0 %v7346_v41, %s4402_s20  ;;  %3068 = vrot.lane.b32.xlu1 %v7318_v28, %s4402_s20 }
 0x754   : > { %3074 = vrot.lane.b32.xlu0 %v7370_v50, %s4402_s20  ;;  %3076 = vrot.lane.b32.xlu1 %v7340_v44, %s4402_s20 }
 0x758   : > { %3018 = vrot.lane.b32.xlu0 %v7394_v45, %s4400_s2  ;;  %3072 = vrot.lane.b32.xlu1 %v7364_v12, %s4402_s20 }
 0x75c   : > { %3102 = vrot.lane.b32.xlu0 %v7322_v9, %s8117_s27  ;;  %3080 = vrot.lane.b32.xlu1 %v7388_v49, %s4402_s20 }
 0x760   : > { %3050 = vrot.lane.b32.xlu0 %v7394_v45, %s4401_s21  ;;  %3100 = vrot.lane.b32.xlu1 %v7318_v28, %s8117_s27  ;;  %s4313_s21 = sshll.u32 %s4415_s12, 4  ;;  %s4314_s21 = int_to_ptr.vmem [resolvable:$false] %s4313_s21 }
 0x762   : > { %v2877_v57 = vpop.permute.xlu1 %2876 }
 0x764   : > { %3110 = vrot.lane.b32.xlu0 %v7346_v41, %s8117_s27  ;;  %3108 = vrot.lane.b32.xlu1 %v7340_v44, %s8117_s27 }
 0x766   : > { %v2879_v1 = vpop.permute.xlu0 %2878  ;;  %v7452_v7 = vpop.permute.xlu1 %2908 }
 0x768   : > { %3082 = vrot.lane.b32.xlu0 %v7394_v45, %s4402_s20  ;;  %3104 = vrot.lane.b32.xlu1 %v7364_v12, %s8117_s27  ;;  %s4315_s20 = scalar_lea.vmem %s4314_s21, 64 }
 0x76a   : > { %v7458_v13 = vpop.permute.xlu0 %2910  ;;  %v7460_v0 = vpop.permute.xlu1 %2940 }
 0x76c   : > { %3106 = vrot.lane.b32.xlu0 %v7370_v50, %s8117_s27  ;;  %3112 = vrot.lane.b32.xlu1 %v7388_v49, %s8117_s27 }
 0x76e   : > { %v7469_v60 = vpop.permute.xlu0 %2942  ;;  %v2973_v61 = vpop.permute.xlu1 %2972 }
 0x770   : > { %3114 = vrot.lane.b32.xlu0 %v7394_v45, %s8117_s27  ;;  %3134 = vperm.xlu1 %4156, %v2874_v34   ;;  %s3530_s27 = sshll.u32 %s4687_s19, 1 }
 0x771   : > { %s539_s11 = scalar_lea.vmem [#allocation13], %s3530_s27 }
 0x772   : > { %v2975_v16 = vpop.permute.xlu0 %2974  ;;  %v3005_v30 = vpop.permute.xlu1 %3004  ;;  %s3397_s23 = sshll.u32 %s539_s11, 4  ;;  %s7791_s23 = int_to_ptr.vmem [resolvable:$true] %s3397_s23 }
 0x773   : > { %s4309_s2 = scalar_lea.vmem %s7791_s23, 32  ;;  %p4316_p13 = scmp.lt.s32.totalorder %s7791_s23, %s4314_s21 }
 0x774   : > { %3139 = vperm.xlu0 %4155, %v2875_v36   ;;  %3311 = vperm.xlu1 %4156, %v3307_v32   ;;  %p4310_p4 = scmp.ne.s32.totalorder %s7791_s23, %s4309_s2  ;;  %p4317_p2 = scmp.lt.s32.totalorder %s4315_s20, %s4309_s2 }
 0x776   : > { %v3007_v43 = vpop.permute.xlu0 %3006  ;;  %v2885_v42 = vpop.permute.xlu1 %2884  ;;  %p4311_p8 = pnand %p4310_p4, %p8173_p7  ;;  %p4318_p0 = por %p4317_p2, %p4316_p13 }
 0x777   : > { %v2892_v46 = vsel %vm583_vm1, %v2877_v57, %v2885_v42  ;;  %v2896_v62 = vsel %vm583_vm1, %v2885_v42, %v2877_v57 }
 0x778   : > { %3316 = vperm.xlu0 %4155, %v3308_v63   ;;  %3340 = vperm.xlu1 %4156, %v3337_v52   ;;  %v2900_v15 = vmul.f32 %v2896_v62, %v8110_v19  ;;  %v2901_v40 = vmul.f32 %v2892_v46, %v8157_v6  ;;  %p4312_p9 = pneg %p4311_p8 }
 0x77a   : > { %v2887_v18 = vpop.permute.xlu0 %2886  ;;  %v7486_v29 = vpop.permute.xlu1 %2916  ;;  %p4319_p6 = pnand %p4318_p0, %p4312_p9 }
 0x77b   : > { %v2893_v33 = vsel %vm583_vm1, %v2879_v1, %v2887_v18  ;;  %v2897_v4 = vsel %vm583_vm1, %v2887_v18, %v2879_v1 }
 0x77c   : > { %v2902_v24 = vmul.f32 %v2897_v4, %v8110_v19  ;;  %v2903_v11 = vmul.f32 %v2893_v33, %v8157_v6 }
 0x77e   : > { %v3890_v21 = vpack.c.bf16 %v2902_v24, %v2900_v15  ;;  %v2919_v48 = vpop.permute.xlu0 %2918  ;;  %v7496_v2 = vpop.permute.xlu1 %2948  ;;  %v3888_v10 = vpack.c.bf16 %v2903_v11, %v2901_v40 }
 0x77f   : > { %v2960_v27 = vsel %vm633_vm3, %v7496_v2, %v7460_v0 }
 0x780   : > { %3889 = vmatprep.subr.bf16.mxu1 %v3888_v10  ;;  %v7506_v59 = vmul.f32 %v2960_v27, %v8124_v5 }
 0x781   : > { %3891 = vmatpush1.bf16.msra.mxu1 %v3890_v21 }
 0x782   : > { %v2951_v3 = vpop.permute.xlu0 %2950  ;;  %v2981_v20 = vpop.permute.xlu1 %2980 }
 0x783   : > { %v2961_v22 = vsel %vm633_vm3, %v2951_v3, %v7469_v60  ;;  %v2988_v31 = vsel %vm658_vm4, %v2973_v61, %v2981_v20  ;;  %v2992_v57 = vsel %vm658_vm4, %v2981_v20, %v2973_v61 }
 0x784   : > { %v7509_v14 = vmul.f32 %v2961_v22, %v8124_v5  ;;  %v7522_v63 = vmul.f32 %v2992_v57, %v8126_v56  ;;  %v7525_v52 = vmul.f32 %v2988_v31, %v8125_v37 }
 0x786   : > { %v2983_v1 = vpop.permute.xlu0 %2982  ;;  %v3013_v34 = vpop.permute.xlu1 %3012 }
 0x787   : > { %v2989_v36 = vsel %vm658_vm4, %v2975_v16, %v2983_v1  ;;  %v2993_v32 = vsel %vm658_vm4, %v2983_v1, %v2975_v16  ;;  %v3020_v46 = vsel %vm683_vm5, %v3005_v30, %v3013_v34  ;;  %v3024_v62 = vsel %vm683_vm5, %v3013_v34, %v3005_v30 }
 0x788   : > { %v7528_v42 = vmul.f32 %v2993_v32, %v8126_v56  ;;  %v7531_v61 = vmul.f32 %v2989_v36, %v8125_v37  ;;  %v7546_v24 = vmul.f32 %v3020_v46, %v8145_v35  ;;  %v7549_v11 = vmul.f32 %v3024_v62, %v8143_v55 }
 0x789   : > { %v2925_v62 = vsel %vm608_vm2, %v7458_v13, %v2919_v48  ;;  %v2929_v16 = vsel %vm608_vm2, %v2919_v48, %v7458_v13  ;;  %v2928_v13 = vsel %vm608_vm2, %v7486_v29, %v7452_v7 }
 0x78a   : > { %v3015_v18 = vpop.permute.xlu0 %3014  ;;  %v2881_v33 = vpop.permute.xlu1 %2880  ;;  %v2935_v4 = vmul.f32 %v2925_v62, %v8121_v47 }
 0x78b   : > { %v3021_v15 = vsel %vm683_vm5, %v3007_v43, %v3015_v18  ;;  %v3025_v40 = vsel %vm683_vm5, %v3015_v18, %v3007_v43 }
 0x78c   : > { %v7552_v30 = vmul.f32 %v3021_v15, %v8145_v35  ;;  %v7555_v21 = vmul.f32 %v3025_v40, %v8143_v55  ;;  %v2924_v40 = vsel %vm608_vm2, %v7452_v7, %v7486_v29 }
 0x78d   : > { %v2933_v48 = vmul.f32 %v2924_v40, %v8121_v47 }
 0x78e   : > { %v2883_v27 = vpop.permute.xlu0 %2882  ;;  %v2913_v20 = vpop.permute.xlu1 %2912 }
 0x792   : > { %v2915_v22 = vpop.permute.xlu0 %2914  ;;  %v2945_v31 = vpop.permute.xlu1 %2944 }
 0x796   : > { %v2947_v57 = vpop.permute.xlu0 %2946  ;;  %v7561_v1 = vpop.permute.xlu1 %2976 }
 0x79a   : > { %v7563_v34 = vpop.permute.xlu0 %2978  ;;  %v7565_v36 = vpop.permute.xlu1 %3008 }
 0x79e   : > { %v7567_v32 = vpop.permute.xlu0 %3010  ;;  %v2889_v46 = vpop.permute.xlu1 %2888 }
 0x79f   : > { %v2894_v18 = vsel %vm583_vm1, %v2881_v33, %v2889_v46  ;;  %v2898_v15 = vsel %vm583_vm1, %v2889_v46, %v2881_v33 }
 0x7a0   : > { %v2904_v46 = vmul.f32 %v2898_v15, %v8110_v19  ;;  %v2905_v51 = vmul.f32 %v2894_v18, %v8157_v6 }
 0x7a2   : > { %v2891_v10 = vpop.permute.xlu0 %2890  ;;  %v7580_v43 = vpop.permute.xlu1 %3036 }
 0x7a3   : > { %v2895_v8 = vsel %vm583_vm1, %v2883_v27, %v2891_v10  ;;  %v2899_v33 = vsel %vm583_vm1, %v2891_v10, %v2883_v27  ;;  %v2934_v27 = vmul.f32 %v2929_v16, %v8122_v17  ;;  %vm3142_vm1 = vcmask 261120  }
 0x7a4   : > { %v2906_v25 = vmul.f32 %v2899_v33, %v8110_v19  ;;  %v2907_v39 = vmul.f32 %v2895_v8, %v8157_v6  ;;  %v2957_v19 = vsel %vm633_vm3, %v7469_v60, %v2951_v3  ;;  %v3896_v6 = vpack.c.bf16 %v2935_v4, %v2933_v48 }
 0x7a5   : > { %v2932_v8 = vmul.f32 %v2928_v13, %v8122_v17  ;;  %v2967_v3 = vmul.f32 %v2957_v19, %v8123_v53 }
 0x7a6   : > { %v3894_v62 = vpack.c.bf16 %v2906_v25, %v2904_v46  ;;  %v7599_v26 = vpop.permute.xlu0 %3038  ;;  %v2921_v58 = vpop.permute.xlu1 %2920  ;;  %v3892_v10 = vpack.c.bf16 %v2907_v39, %v2905_v51  ;;  %v2956_v39 = vsel %vm633_vm3, %v7460_v0, %v7496_v2 }
 0x7a7   : > { %v2926_v7 = vsel %vm608_vm2, %v2913_v20, %v2921_v58  ;;  %v2930_v25 = vsel %vm608_vm2, %v2921_v58, %v2913_v20  ;;  %v3898_v60 = vpack.c.bf16 %v2934_v27, %v2932_v8  ;;  %v2965_v2 = vmul.f32 %v2956_v39, %v8123_v53 }
 0x7a8   : > { %3893 = vmatprep.subr.bf16.mxu1 %v3892_v10  ;;  %v2936_v58 = vmul.f32 %v2930_v25, %v8122_v17  ;;  %v2937_v20 = vmul.f32 %v2926_v7, %v8121_v47 }
 0x7a9   : > { %3895 = vmatpush1.bf16.msra.mxu1 %v3894_v62  ;;  %v3904_v13 = vpack.c.bf16 %v2967_v3, %v2965_v2 }
 0x7aa   : > { %v2923_v51 = vpop.permute.xlu0 %2922  ;;  %3897 = vmatprep.subr.bf16.mxu1 %v3896_v6  ;;  %v2953_v29 = vpop.permute.xlu1 %2952 }
 0x7ab   : > { %v2927_v16 = vsel %vm608_vm2, %v2915_v22, %v2923_v51  ;;  %v2931_v4 = vsel %vm608_vm2, %v2923_v51, %v2915_v22  ;;  %v2958_v22 = vsel %vm633_vm3, %v2945_v31, %v2953_v29  ;;  %v2962_v48 = vsel %vm633_vm3, %v2953_v29, %v2945_v31 }
 0x7ac   : > { %v2938_v18 = vmul.f32 %v2931_v4, %v8122_v17  ;;  %v2939_v0 = vmul.f32 %v2927_v16, %v8121_v47  ;;  %v2968_v27 = vmul.f32 %v2962_v48, %v8124_v5  ;;  %v2969_v19 = vmul.f32 %v2958_v22, %v8123_v53 }
 0x7ad   : > { %3899 = vmatpush1.bf16.msra.mxu1 %v3898_v60  ;;  %v8158_v31 = vpack.c.bf16 %v7509_v14, %v7506_v59  ;;  %v8159_v59 = vpack.c.bf16 %v7531_v61, %v7525_v52  ;;  %v8160_v52 = vpack.c.bf16 %v7528_v42, %v7522_v63  ;;  %v8162_v48 = vpack.c.bf16 %v7552_v30, %v7546_v24 }
 0x7ae   : > { %v3902_v15 = vpack.c.bf16 %v2938_v18, %v2936_v58  ;;  %v7624_v40 = vpop.permute.xlu0 %3046  ;;  %v2985_v33 = vpop.permute.xlu1 %2984  ;;  %v3900_v46 = vpack.c.bf16 %v2939_v0, %v2937_v20 }
 0x7b0   : > { %3901 = vmatprep.subr.bf16.mxu1 %v3900_v46 }
 0x7b1   : > { %3903 = vmatpush1.bf16.msra.mxu1 %v3902_v15  ;;  %v3926_v15 = vpack.c.bf16 %v7370_v50, %v7364_v12  ;;  %v8161_v50 = vpack.c.bf16 %v7555_v21, %v7549_v11 }
 0x7b2   : > { %v2955_v17 = vpop.permute.xlu0 %2954  ;;  %3905 = vmatprep.subr.bf16.mxu1 %v3904_v13  ;;  %v3017_v47 = vpop.permute.xlu1 %3016 }
 0x7b3   : > { %v2959_v62 = vsel %vm633_vm3, %v2947_v57, %v2955_v17  ;;  %v2963_v10 = vsel %vm633_vm3, %v2955_v17, %v2947_v57  ;;  %v2990_v57 = vsel %vm658_vm4, %v7561_v1, %v2985_v33 }
 0x7b4   : > { %v2970_v6 = vmul.f32 %v2963_v10, %v8124_v5  ;;  %v2971_v8 = vmul.f32 %v2959_v62, %v8123_v53  ;;  %v2994_v5 = vsel %vm658_vm4, %v2985_v33, %v7561_v1  ;;  %v3001_v16 = vmul.f32 %v2990_v57, %v8125_v37 }
 0x7b5   : > { %3907 = vmatpush1.bf16.msra.mxu1 %v8158_v31  ;;  %v3000_v3 = vmul.f32 %v2994_v5, %v8126_v56  ;;  %v8163_v5 = vld [vmem:[#allocation41_spill] sm:$0xff] }
 0x7b6   : > { %v3910_v7 = vpack.c.bf16 %v2970_v6, %v2968_v27  ;;  %v7641_v25 = vpop.permute.xlu0 %3042  ;;  %v3045_v39 = vpop.permute.xlu1 %3044  ;;  %v3908_v51 = vpack.c.bf16 %v2971_v8, %v2969_v19 }
 0x7b8   : > { %3909 = vmatprep.subr.bf16.mxu1 %v3908_v51 }
 0x7b9   : > { %3911 = vmatpush1.bf16.msra.mxu1 %v3910_v7 }
 0x7ba   : > { %v2987_v53 = vpop.permute.xlu0 %2986  ;;  %3913 = vmatprep.subr.bf16.mxu1 %v8159_v59  ;;  %v3041_v14 = vpop.permute.xlu1 %3040 }
 0x7bb   : > { %v2991_v29 = vsel %vm658_vm4, %v7563_v34, %v2987_v53  ;;  %v2995_v60 = vsel %vm658_vm4, %v2987_v53, %v7563_v34  ;;  %v3920_v34 = vpack.c.bf16 %v7346_v41, %v7340_v44  ;;  %v3022_v44 = vsel %vm683_vm5, %v7565_v36, %v3017_v47 }
 0x7bc   : > { %v3002_v1 = vmul.f32 %v2995_v60, %v8126_v56  ;;  %v3003_v4 = vmul.f32 %v2991_v29, %v8125_v37  ;;  %v3922_v56 = vpack.c.bf16 %v7322_v9, %v7318_v28  ;;  %v3924_v37 = vpack.c.bf16 %v7394_v45, %v7388_v49 }
 0x7bd   : > { %3915 = vmatpush1.bf16.msra.mxu1 %v8160_v52  ;;  %v3026_v41 = vsel %vm683_vm5, %v3017_v47, %v7565_v36  ;;  %v3056_v28 = vsel %vm708_vm6, %v3045_v39, %v7580_v43  ;;  %v3057_v9 = vsel %vm708_vm6, %v7624_v40, %v7599_v26  ;;  %v3032_v45 = vmul.f32 %v3022_v44, %v8145_v35 }
 0x7be   : > { %v3918_v61 = vpack.c.bf16 %v3002_v1, %v3000_v3  ;;  %v3071_v58 = vpop.permute.xlu0 %3070  ;;  %v3049_v20 = vpop.permute.xlu1 %3048  ;;  %v3916_v18 = vpack.c.bf16 %v3003_v4, %v3001_v16  ;;  %v3052_v36 = vsel %vm708_vm6, %v7580_v43, %v3045_v39  ;;  %v3033_v13 = vmul.f32 %v3026_v41, %v8143_v55  ;;  %v8164_v3 = vld [vmem:[#allocation40_spill] sm:$0xff] }
 0x7bf   : > { %v3061_v22 = vmul.f32 %v3056_v28, %v8148_v38  ;;  %v3053_v43 = vsel %vm708_vm6, %v7599_v26, %v7624_v40  ;;  %v3063_v17 = vmul.f32 %v3057_v9, %v8148_v38  ;;  %v3058_v26 = vsel %vm708_vm6, %v3049_v20, %v3041_v14  ;;  %v8165_v28 = vld [vmem:[#allocation64_spill] sm:$0xff] }
 0x7c0   : > { %3917 = vmatprep.subr.bf16.mxu1 %v3916_v18  ;;  %v3065_v57 = vmul.f32 %v3058_v26, %v8148_v38  ;;  %v2871_v26 = vld [vmem:[#allocation12 + $0x18] sm:$0xff] }
 0x7c1   : > { %3919 = vmatpush1.bf16.msra.mxu1 %v3918_v61  ;;  %v3936_v19 = vpack.c.bf16 %v3063_v17, %v3061_v22 }
 0x7c2   : > { %v3079_v0 = vpop.permute.xlu0 %3078  ;;  %3921 = vmatprep.subr.bf16.mxu1 %v3920_v34  ;;  %v3069_v2 = vpop.permute.xlu1 %3068 }
 0x7c3   : > { %v3089_v31 = vsel %vm733_vm7, %v3079_v0, %v3071_v58  ;;  %v3085_v29 = vsel %vm733_vm7, %v3071_v58, %v3079_v0 }
 0x7c4   : > { %v3095_v60 = vmul.f32 %v3089_v31, %v8163_v5 }
 0x7c5   : > { %3923 = vmatpush1.bf16.msra.mxu1 %v3922_v56 }
 0x7c6   : > { %v7671_v63 = vpop.permute.xlu0 %3074  ;;  %v3077_v42 = vpop.permute.xlu1 %3076  ;;  %3925 = vmatprep.subr.bf16.mxu1 %v3924_v37 }
 0x7c7   : > { %v3088_v24 = vsel %vm733_vm7, %v3077_v42, %v3069_v2  ;;  %v3084_v7 = vsel %vm733_vm7, %v3069_v2, %v3077_v42 }
 0x7c8   : > { %v3093_v53 = vmul.f32 %v3088_v24, %v8163_v5  ;;  %v3092_v16 = vmul.f32 %v3084_v7, %v8164_v3 }
 0x7c9   : > { %3927 = vmatpush1.bf16.msra.mxu1 %v3926_v15 }
 0x7ca   : > { %v3019_v49 = vpop.permute.xlu0 %3018  ;;  %v3073_v12 = vpop.permute.xlu1 %3072  ;;  %3929 = vmatprep.subr.bf16.mxu1 %v8161_v50 }
 0x7cb   : > { %v3023_v33 = vsel %vm683_vm5, %v7567_v32, %v3019_v49  ;;  %v3027_v46 = vsel %vm683_vm5, %v3019_v49, %v7567_v32  ;;  %v3060_v32 = vmul.f32 %v3052_v36, %v8149_v54 }
 0x7cc   : > { %v3034_v11 = vmul.f32 %v3023_v33, %v8145_v35  ;;  %v3035_v21 = vmul.f32 %v3027_v46, %v8143_v55  ;;  %v3054_v55 = vsel %vm708_vm6, %v3041_v14, %v3049_v20  ;;  %v3062_v35 = vmul.f32 %v3053_v43, %v8149_v54 }
 0x7cd   : > { %3931 = vmatpush1.bf16.msra.mxu1 %v8162_v48  ;;  %v3064_v40 = vmul.f32 %v3054_v55, %v8149_v54  ;;  %v3944_v20 = vpack.c.bf16 %v3095_v60, %v3093_v53  ;;  %v2868_v48 = vld [vmem:[#allocation12] sm:$0xff] }
 0x7ce   : > { %v3934_v47 = vpack.c.bf16 %v3034_v11, %v3032_v45  ;;  %v3103_v62 = vpop.permute.xlu0 %3102  ;;  %v3081_v10 = vpop.permute.xlu1 %3080  ;;  %v3932_v27 = vpack.c.bf16 %v3035_v21, %v3033_v13  ;;  %v3938_v30 = vpack.c.bf16 %v3062_v35, %v3060_v32  ;;  %v8166_v13 = vld [vmem:[#allocation68_spill] sm:$0xff] }
 0x7cf   : > { %v3086_v61 = vsel %vm733_vm7, %v3073_v12, %v3081_v10  ;;  %v2872_v32 = vld [vmem:[#allocation12 + $0x20] sm:$0xff] }
 0x7d0   : > { %3933 = vmatprep.subr.bf16.mxu1 %v3932_v27  ;;  %v3096_v0 = vmul.f32 %v3086_v61, %v8164_v3 }
 0x7d1   : > { %3935 = vmatpush1.bf16.msra.mxu1 %v3934_v47 }
 0x7d2   : > { %v3051_v6 = vpop.permute.xlu0 %3050  ;;  %v3101_v8 = vpop.permute.xlu1 %3100  ;;  %3937 = vmatprep.subr.bf16.mxu1 %v3936_v19 }
 0x7d3   : > { %v3055_v39 = vsel %vm708_vm6, %v7641_v25, %v3051_v6  ;;  %v3059_v51 = vsel %vm708_vm6, %v3051_v6, %v7641_v25  ;;  %v2873_v6 = vld [vmem:[#allocation12 + $0x28] sm:$0xff] }
 0x7d4   : > { %v3066_v59 = vmul.f32 %v3055_v39, %v8149_v54  ;;  %v3067_v14 = vmul.f32 %v3059_v51, %v8148_v38  ;;  %v3090_v54 = vsel %vm733_vm7, %v3081_v10, %v3073_v12  ;;  %v3094_v38 = vmul.f32 %v3085_v29, %v8164_v3 }
 0x7d5   : > { %3939 = vmatpush1.bf16.msra.mxu1 %v3938_v30  ;;  %v3097_v2 = vmul.f32 %v3090_v54, %v8163_v5 }
 0x7d6   : > { %v3942_v1 = vpack.c.bf16 %v3066_v59, %v3064_v40  ;;  %v3111_v4 = vpop.permute.xlu0 %3110  ;;  %v3109_v52 = vpop.permute.xlu1 %3108  ;;  %v3940_v25 = vpack.c.bf16 %v3067_v14, %v3065_v57  ;;  %v3946_v34 = vpack.c.bf16 %v3094_v38, %v3092_v16  ;;  %v8167_v40 = vmov 0.0  }
 0x7d7   : > { %v3121_v58 = vsel %vm758_vm8, %v3111_v4, %v3103_v62  ;;  %v3120_v18 = vsel %vm758_vm8, %v3109_v52, %v3101_v8  ;;  %v3117_v42 = vsel %vm758_vm8, %v3103_v62, %v3111_v4  ;;  %v3116_v15 = vsel %vm758_vm8, %v3101_v8, %v3109_v52 }
 0x7d8   : > { %3941 = vmatprep.subr.bf16.mxu1 %v3940_v25  ;;  %v3127_v9 = vmul.f32 %v8165_v28, %v3121_v58  ;;  %v3125_v49 = vmul.f32 %v8165_v28, %v3120_v18  ;;  %v3126_v22 = vmul.f32 %v8166_v13, %v3117_v42  ;;  %v3124_v11 = vmul.f32 %v8166_v13, %v3116_v15 }
 0x7d9   : > { %3943 = vmatpush1.bf16.msra.mxu1 %v3942_v1 }
 0x7da   : > { %v3083_v56 = vpop.permute.xlu0 %3082  ;;  %v3105_v37 = vpop.permute.xlu1 %3104  ;;  %3945 = vmatprep.subr.bf16.mxu1 %v3944_v20  ;;  %v3952_v21 = vpack.c.bf16 %v3127_v9, %v3125_v49  ;;  %v3954_v47 = vpack.c.bf16 %v3126_v22, %v3124_v11 }
 0x7db   : > { %v3087_v44 = vsel %vm733_vm7, %v7671_v63, %v3083_v56  ;;  %v3091_v41 = vsel %vm733_vm7, %v3083_v56, %v7671_v63 }
 0x7dc   : > { %v3098_v12 = vmul.f32 %v3087_v44, %v8164_v3  ;;  %v3099_v50 = vmul.f32 %v3091_v41, %v8163_v5 }
 0x7dd   : > { %3947 = vmatpush1.bf16.msra.mxu1 %v3946_v34 }
 0x7de   : > { %v3950_v45 = vpack.c.bf16 %v3098_v12, %v3096_v0  ;;  %v3107_v36 = vpop.permute.xlu0 %3106  ;;  %v3113_v33 = vpop.permute.xlu1 %3112  ;;  %v3948_v46 = vpack.c.bf16 %v3099_v50, %v3097_v2 }
 0x7df   : > { %v3118_v63 = vsel %vm758_vm8, %v3105_v37, %v3113_v33  ;;  %v3122_v43 = vsel %vm758_vm8, %v3113_v33, %v3105_v37 }
 0x7e0   : > { %3949 = vmatprep.subr.bf16.mxu1 %v3948_v46  ;;  %v3128_v27 = vmul.f32 %v8166_v13, %v3118_v63  ;;  %v3129_v55 = vmul.f32 %v8165_v28, %v3122_v43  ;;  %v4414_v43 = vmov 1966171168  }
 0x7e1   : > { %3951 = vmatpush1.bf16.msra.mxu1 %v3950_v45 }
 0x7e2   : > { %v3115_v17 = vpop.permute.xlu0 %3114  ;;  %3953 = vmatprep.subr.bf16.mxu1 %v3952_v21 }
 0x7e3   : > { %v3119_v62 = vsel %vm758_vm8, %v3107_v36, %v3115_v17  ;;  %v3123_v10 = vsel %vm758_vm8, %v3115_v17, %v3107_v36 }
 0x7e4   : > { %v3130_v35 = vmul.f32 %v8166_v13, %v3119_v62  ;;  %v3131_v19 = vmul.f32 %v8165_v28, %v3123_v10  ;;  %3214 = vmatmul.mubr.f32.vlgmr.msra.gmra.mrb[16].mxu1 %v2868_v48  ;;  %v8168_v28 = vld [vmem:[#allocation24_spill] sm:$0xff]  ;;  %v3363_v48 = vunpack.c.l.s4 %v4414_v43 }
 0x7e5   : > { %3955 = vmatpush1.bf16.msra.mxu1 %v3954_v47  ;;  %3219 = vmatprep.mubr.f32.mxu1 %v2872_v32  ;;  %v8169_v47 = vld [vmem:[#allocation23_spill] sm:$0xff] }
 0x7e6   : > { %v3958_v24 = vpack.c.bf16 %v3130_v35, %v3128_v27  ;;  %v3956_v30 = vpack.c.bf16 %v3131_v19, %v3129_v55  ;;  %v3364_v17 = vunpack.c.0.s8 %v3363_v48  ;;  %v8171_v35 = vlaneseq }
 0x7e8   : > { %3220 = vmatmul.mubr.f32.gmra.mrb[18].mxu1 %v2871_v26  ;;  %3957 = vmatprep.subr.bf16.mxu1 %v3956_v30  ;;  %v3367_v62 = vsub.s32 %v3364_v17, %v8169_v47  ;;  %vm3379_vm2 = vcmp.lt.s32.totalorder %v8171_v35, 256 }
 0x7e9   : > { %3959 = vmatpush1.bf16.msra.mxu1 %v3958_v24  ;;  %3290 = vmatprep.mubr.f32.mxu1 %v8167_v40 }
 0x7ec   : > { %3555 = vmatmul.mubr.msk.f32.vlgmr.msra.gmra.mrb[16].mxu1 %vm3142_vm1, %v2870_v23 }
 0x7ed   : > { %3296 = vmatprep.mubr.f32.mxu1 %v8167_v40 }
 0x7ef   : > { %v3135_v8 = vpop.permute.xlu1 %3134 }
 0x7f0   : > { %3556 = vmatmul.mubr.msk.f32.gmra.mrb[18].mxu1 %vm3142_vm1, %v2873_v6 }
 0x7f3   : > { %v3140_v51 = vpop.permute.xlu0 %3139  ;;  %v3312_v16 = vpop.permute.xlu1 %3311 }
 0x7f7   : > { %v3317_v1 = vpop.permute.xlu0 %3316  ;;  %v3341_v42 = vpop.permute.xlu1 %3340 }
 0x7f8   : > { %v3346_v9 = vrot.slane %v3341_v42, %v8168_v28 }
 0x8bf   : > { %v3292_v31 = vpop.f32.mrb[16].mxu1 }
 0x8c0   : > { %v4000_v7 = vadd.f32 %v3292_v31, %v3135_v8  ;;  %v3294_v39 = vpop.f32.mrb[17].mxu1 }
 0x8c1   : > { %v4001_v57 = vadd.f32 %v3294_v39, %v3135_v8 }
 0x8c2   : > { %v3303_v53 = vmax.f32 %v4000_v7, 0.0 }
 0x8c3   : > { %v3298_v5 = vpop.f32.mrb[18].mxu1  ;;  %v3304_v29 = vmax.f32 %v4001_v57, 0.0 }
 0x8c4   : > { %v4002_v59 = vadd.f32 %v3298_v5, %v3140_v51  ;;  %v3300_v14 = vpop.f32.mrb[19].mxu1  ;;  %v3319_v52 = vmul.f32 %v3312_v16, %v3303_v53 }
 0x8c5   : > { %v4003_v60 = vadd.f32 %v3300_v14, %v3140_v51  ;;  %v3320_v61 = vmul.f32 %v3312_v16, %v3304_v29 }
 0x8c6   : > { %v3305_v3 = vmax.f32 %v4002_v59, 0.0 }
 0x8c7   : > { %v3306_v4 = vmax.f32 %v4003_v60, 0.0 }
 0x8c8   : > { %v3321_v25 = vmul.f32 %v3317_v1, %v3305_v3 }
 0x8c9   : > { %v3322_v54 = vmul.f32 %v3317_v1, %v3306_v4 }
 0x8ca   : > { %v3323_v38 = vadd.f32 %v3321_v25, %v3319_v52 }
 0x8cb   : > { %v3330_v20 = vadd.f32 %v3322_v54, %v3320_v61 }
 0x8cc   : > { %v3324_v58 = vrot.slane %v3323_v38, 4 }
 0x8cd   : > { %v3331_v18 = vrot.slane %v3330_v20, 4 }
 0x8ce   : > { %v3325_v34 = vadd.f32 %v3324_v58, %v3323_v38 }
 0x8cf   : > { %v3332_v0 = vadd.f32 %v3331_v18, %v3330_v20 }
 0x8d0   : > { %v3326_v2 = vrot.slane %v3325_v34, 2 }
 0x8d1   : > { %v3333_v56 = vrot.slane %v3332_v0, 2 }
 0x8d2   : > { %v3327_v37 = vadd.f32 %v3326_v2, %v3325_v34 }
 0x8d3   : > { %v3334_v15 = vadd.f32 %v3333_v56, %v3332_v0 }
 0x8d4   : > { %v3328_v44 = vrot.slane %v3327_v37, 1 }
 0x8d5   : > { %v3335_v41 = vrot.slane %v3334_v15, 1 }
 0x8d6   : > { %v3329_v49 = vadd.f32 %v3328_v44, %v3327_v37 }
 0x8d7   : > { %v3336_v12 = vadd.f32 %v3335_v41, %v3334_v15 }
 0x8d8   : > { %v3347_v50 = vadd.f32 %v3346_v9, %v3329_v49 }
 0x8d9   : > { %v3348_v45 = vadd.f32 %v3346_v9, %v3336_v12 }
 0x8da   : > { %v3349_v36 = vsub.f32 0.0, %v3347_v50 }
 0x8db   : > { %v3350_v33 = vsub.f32 0.0, %v3348_v45 }
 0x8dc   : > { %v3351_v46 = vmul.f32 1.442695, %v3349_v36 }
 0x8dd   : > { %v3353_v13 = vmul.f32 1.442695, %v3350_v33 }
 0x8de   : > { %4157 = vpow2.f32 %v3351_v46 }
 0x8df   : > { %4159 = vpow2.f32 %v3353_v13 }
 0x8e8   : > { %v4158_v22 = vpop.eup %4157 }
 0x8e9   : > { %v4160_v11 = vpop.eup %4159  ;;  %v3355_v21 = vadd.f32 1.0, %v4158_v22 }
 0x8ea   : > { %v3356_v63 = vadd.f32 1.0, %v4160_v11 }
 0x8eb   : > { %4161 = vrcp.f32 %v3355_v21 }
 0x8ec   : > { %4163 = vrcp.f32 %v3356_v63 }
 0x8f5   : > { %v4162_v32 = vpop.eup %4161 }
 0x8f6   : > { %v4164_v10 = vpop.eup %4163 }
 0x8f7   : > { %v3361_v27 = vcombine.low %v4162_v32, %v4164_v10 }
 0x8f9   : > { %v3368_v55 = vrot.slane %v3361_v27, %v3367_v62 }
 0x8fb   : > { %v3375_v19 = vrot.slane %v3368_v55, %v3367_v62 }
 0x8fd   : > { %3381 = vst.msk [vmem:[%s539_s11] sm:$0x3] %vm3379_vm2, %v3375_v19 }
 0x8fe   : > { %4322 = shalt.err (!%p4319_p6)
}
 0x8ff   : > { %s4323_s19 = scalar_lea.hbm %s7789_s14, 32  ;;  %s4327_s27 = scalar_lea.hbm %s8172_s22, 64 }
 0x900   : > { %p4324_p10 = scmp.ne.s32.totalorder %s7789_s14, %s4323_s19  ;;  %p4328_p1 = scmp.lt.u32.totalorder %s7789_s14, %s8172_s22 }
 0x901   : > { %p4329_p3 = scmp.lt.u32.totalorder %s4327_s27, %s4323_s19  ;;  %p4331_p8 = scmp.lt.u32.totalorder %s4323_s19, %s7789_s14 }
 0x902   : > { %p4325_p11 = pnand %p4324_p10, %p8173_p7 }
 0x903   : > { %p4330_p4 = por %p4329_p3, %p4328_p1 }
 0x904   : > { %p4326_p12 = pneg %p4325_p11 }
 0x905   : > { %p4332_p9 = por %p4331_p8, %p4330_p4 }
 0x907   : > { %p4333_p13 = pnand %p4332_p9, %p4326_p12 }
 0x909   : > { %4336 = shalt.err (!%p4333_p13)
}
 0x90a   : > { %4060 = dma.vmem_to_hbm [thread:$0]  (%p8173_p7), %s7791_s23, 32, %s7789_s14, %s3383_s26  }
 0x90b PF: > { %s8174_s15 = sld [smem:[#allocation18_spill]]  ;;  %s8175_s17 = sld [smem:[#allocation22_spill]] }
 0x911   : > { %s3409_s2 = sand.u32 1, %s8174_s15   ;;  %p8176_p2 = scmp.ne.s32.totalorder %s8175_s17, 0 }
 0x912   : > { %s3410_s12 = scalar_lea.sflag [#allocation6], %s3409_s2 }
 0x913   : > { %p4079_p0 = pnand %p3519_p5, %p8176_p2 }
 0x915   : > { %4366 = dma.done.wait (!%p4079_p0), %s3410_s12, 32  }
 0x916   : > { %4368 = vsyncadd (!%p4079_p0), %s3410_s12, 4294967264  ;;  %s8177_s30 = sld [smem:[#allocation19_spill]]  ;;  %s8178_s21 = sld [smem:[#allocation20_spill]] }
 0x917   : > { %s8179_s27 = smov %s4375_s28  ;;  %s8180_s28 = smov %s4379_s29 }
 0x91c   : > { %p28_p6 = scmp.ge.s32.totalorder %s8177_s30, 4   ;;  %s8181_s29 = smov %s8178_s21 }
 0x91e   :  { %30 = sbr.rel (!%p28_p6) target bundleno = 11 (0xb), region = 156 }
 0x925   :  { %3415 = vsyncpa [#allocation5], 1 }
 0x926   :  { %3417 = vsyncpa [#allocation5 + $0x1], 1 }
 0x927   :  { %3418 = vsyncpa [#allocation8], 1 }
 0x928   :  { %3419 = vsyncpa [#allocation11], 1 }
 0x929   :  { %3420 = vsyncpa [#allocation6], 1 }
 0x92a   :  { %3422 = vsyncpa [#allocation6 + $0x1], 1 }

</bundles_post_ra>
